<compile_context>
chip_gen: v7x
topology: tpu7x:2x2x1
jax: 0.10.0
libtpu: 0.0.40
codegen_flags: <defaults>
</compile_context>

<pallas_src>
import jax
import jax.numpy as jnp
from jax import lax
from jax.experimental import pallas as pl
from jax.experimental.pallas import tpu as pltpu

EPS = 1e-5


# --------------------------------------------------------------------------- #
# Kernel
# --------------------------------------------------------------------------- #
def _zero_halo(ref):
    """Zero only the 1-pixel spatial border of a (Nb, Hq, Wq, C) scratch ref."""
    Nb, Hq, Wq, C = ref.shape
    dt = ref.dtype
    ref[:, 0:1, :, :] = jnp.zeros((Nb, 1, Wq, C), dt)
    ref[:, Hq - 1:Hq, :, :] = jnp.zeros((Nb, 1, Wq, C), dt)
    ref[:, :, 0:1, :] = jnp.zeros((Nb, Hq, 1, C), dt)
    ref[:, :, Wq - 1:Wq, :] = jnp.zeros((Nb, Hq, 1, C), dt)


def _conv3x3(pad_ref, w_ref, Nb, Hp, Wp):
    """3x3 conv (pad already applied) as 9 per-tap MXU dots accumulated in f32.

    pad_ref: (Nb, Hp+2, Wp+2, C) bf16 padded activations
    w_ref:   (9, C, Cout)        bf16 per-tap weights (tap = dy*3 + dx)
    returns: (Nb*Hp*Wp, Cout)    f32
    """
    C = pad_ref.shape[-1]
    Cout = w_ref.shape[-1]
    M = Nb * Hp * Wp
    acc = jnp.zeros((M, Cout), jnp.float32)
    for dy in range(3):
        for dx in range(3):
            win = pad_ref[:, dy:dy + Hp, dx:dx + Wp, :]            # (Nb,Hp,Wp,C) bf16
            acc = acc + jnp.dot(win.reshape(M, C), w_ref[dy * 3 + dx],
                                preferred_element_type=jnp.float32)
    return acc


def _down_kernel(x_ref, w1_ref, s1_ref, b1_ref, w2_ref, s2_ref, b2_ref, o_ref,
                 pad1, pad2):
    # x_ref:  (Nb, Hp, 2, Wp, 2*Cin) bf16   pool-friendly layout
    # w1_ref: (9, Cin,  Cout) bf16          per-tap conv1 weights
    # w2_ref: (9, Cout, Cout) bf16          per-tap conv2 weights
    # s*/b*:  (1, Cout) f32                 folded BN scale / bias
    # o_ref:  (Nb, Hp, Wp*Cout) f32  (lane-dense)   or (Nb, Hp, Wp, Cout) f32
    # pad1:   (Nb, Hp+2, Wp+2, Cin)  bf16   zero-padded pooled input
    # pad2:   (Nb, Hp+2, Wp+2, Cout) bf16   zero-padded conv1 output
    Nb, Hp, _, Wp, two_cin = x_ref.shape
    Cin = two_cin // 2
    Cout = w2_ref.shape[-1]

    # Re-zero only the 1-pixel halo each step (the interior is fully rewritten
    # below); keeps the kernel correct when the "parallel" batch axis is split
    # across TensorCores, each with its own scratch.
    _zero_halo(pad1)
    _zero_halo(pad2)

    # ---------------- MaxPool2d(kernel=2, stride=2), vectorized -------------
    xb = x_ref[...]                                              # bf16
    col = jnp.maximum(xb[..., :Cin], xb[..., Cin:])              # max over W pair
    pooled = jnp.maximum(col[:, :, 0, :, :], col[:, :, 1, :, :])  # max over H pair
    pad1[:, 1:Hp + 1, 1:Wp + 1, :] = pooled                      # (Nb, Hp, Wp, Cin)

    # ---------------- conv1 (3x3, pad=1) + folded BN + ReLU -----------------
    y1 = _conv3x3(pad1, w1_ref, Nb, Hp, Wp)                      # (M, Cout) f32
    y1 = jnp.maximum(y1 * s1_ref[...] + b1_ref[...], 0.0)
    pad2[:, 1:Hp + 1, 1:Wp + 1, :] = (
        y1.astype(pad2.dtype).reshape(Nb, Hp, Wp, Cout))

    # ---------------- conv2 (3x3, pad=1) + folded BN + ReLU -----------------
    y2 = _conv3x3(pad2, w2_ref, Nb, Hp, Wp)
    y2 = jnp.maximum(y2 * s2_ref[...] + b2_ref[...], 0.0)        # (M, Cout) f32

    if len(o_ref.shape) == 3:
        # lane-dense flattened slab: last dim Wp*Cout (multiple of 128) -> wide vst
        o_ref[...] = y2.reshape(Nb, Hp, Wp * Cout).astype(o_ref.dtype)
    else:
        # natural layout (used when Cout % 128 == 0, or as a fallback)
        o_ref[...] = y2.reshape(Nb, Hp, Wp, Cout).astype(o_ref.dtype)


# --------------------------------------------------------------------------- #
# Wrapper
# --------------------------------------------------------------------------- #
def _fold_bn(w_oihw, b_conv, gamma, beta, mean, var):
    """Fold conv bias + eval-mode BN into (per-tap bf16 weights, scale, bias)."""
    s = gamma / jnp.sqrt(var + EPS)                              # (Cout,)
    bias = (b_conv - mean) * s + beta                            # (Cout,)
    cout, cin = w_oihw.shape[0], w_oihw.shape[1]
    # OIHW -> (ky, kx, Cin, Cout) -> (tap = ky*3 + kx, Cin, Cout)
    w_taps = jnp.transpose(w_oihw, (2, 3, 1, 0)).reshape(9, cin, cout)
    return (w_taps.astype(jnp.bfloat16),
            s.reshape(1, -1).astype(jnp.float32),
            bias.reshape(1, -1).astype(jnp.float32))


def _pick_nb(N, Hp, Wp, target_m=256, max_nb=8):
    """Smallest divisor of N (<= max_nb) that pushes M = Nb*Hp*Wp to >= target_m."""
    nb = 1
    for cand in range(1, min(N, max_nb) + 1):
        if N % cand == 0:
            nb = cand
            if cand * Hp * Wp >= target_m:
                break
    return nb


def _padded_bytes(shape, dtype):
    """Generous VMEM estimate: minor dims rounded up to the native (sublane,128) tile."""
    itemsize = jnp.dtype(dtype).itemsize
    s = list(shape)
    if len(s) >= 1:
        s[-1] = max(pl.cdiv(s[-1], 128) * 128, 128)
    if len(s) >= 2:
        sub = 8 * (4 // min(itemsize, 4))     # 8 for f32, 16 for bf16
        s[-2] = max(pl.cdiv(s[-2], sub) * sub, sub)
    n = 1
    for d in s:
        n *= d
    return n * itemsize


def _down_impl(x_pool, wk1, s1, b1, wk2, s2, b2,
               N, Nb, Hp, Wp, Cin, Cout, flat_out):
    grid = (N // Nb,)

    in_specs = [
        pl.BlockSpec((Nb, Hp, 2, Wp, 2 * Cin), lambda n: (n, 0, 0, 0, 0)),
        pl.BlockSpec((9, Cin, Cout), lambda n: (0, 0, 0)),   # w1 (resident)
        pl.BlockSpec((1, Cout), lambda n: (0, 0)),            # s1
        pl.BlockSpec((1, Cout), lambda n: (0, 0)),            # b1
        pl.BlockSpec((9, Cout, Cout), lambda n: (0, 0, 0)),   # w2 (resident)
        pl.BlockSpec((1, Cout), lambda n: (0, 0)),            # s2
        pl.BlockSpec((1, Cout), lambda n: (0, 0)),            # b2
    ]

    if flat_out:
        out_block = (Nb, Hp, Wp * Cout)
        out_shape = jax.ShapeDtypeStruct((N, Hp, Wp * Cout), jnp.float32)
        out_spec = pl.BlockSpec(out_block, lambda n: (n, 0, 0))
    else:
        out_block = (Nb, Hp, Wp, Cout)
        out_shape = jax.ShapeDtypeStruct((N, Hp, Wp, Cout), jnp.float32)
        out_spec = pl.BlockSpec(out_block, lambda n: (n, 0, 0, 0))

    scratch_shapes = [
        pltpu.VMEM((Nb, Hp + 2, Wp + 2, Cin), jnp.bfloat16),   # padded pooled input
        pltpu.VMEM((Nb, Hp + 2, Wp + 2, Cout), jnp.bfloat16),  # padded conv1 output
    ]

    # Explicit scoped-VMEM limit sized from the actual (tile-padded) footprint:
    # 2x (double-buffered) input/weight/output blocks + scratch, with margin.
    blk_bytes = (_padded_bytes((Nb, Hp, 2, Wp, 2 * Cin), jnp.bfloat16)
                 + _padded_bytes((9, Cin, Cout), jnp.bfloat16)
                 + _padded_bytes((9, Cout, Cout), jnp.bfloat16)
                 + 4 * _padded_bytes((1, Cout), jnp.float32)
                 + _padded_bytes(out_block, jnp.float32))
    scratch_bytes = (_padded_bytes((Nb, Hp + 2, Wp + 2, Cin), jnp.bfloat16)
                     + _padded_bytes((Nb, Hp + 2, Wp + 2, Cout), jnp.bfloat16))
    vmem_limit = int(min(64 << 20, max(32 << 20, 2 * (2 * blk_bytes + scratch_bytes))))

    return pl.pallas_call(
        _down_kernel,
        out_shape=out_shape,
        grid=grid,
        in_specs=in_specs,
        out_specs=out_spec,
        scratch_shapes=scratch_shapes,
        compiler_params=pltpu.CompilerParams(
            dimension_semantics=("parallel",),
            vmem_limit_bytes=vmem_limit),
    )(x_pool, wk1, s1, b1, wk2, s2, b2)


def down_pallas(x_nchw, params):
    (w1, b1, g1, be1, m1, v1, w2, b2, g2, be2, m2, v2) = params
    N, Cin, H, W = x_nchw.shape
    Cout = w1.shape[0]
    assert H % 2 == 0 and W % 2 == 0, "MaxPool2d(2) path assumes even H, W"
    Hp, Wp = H // 2, W // 2
    Nb = _pick_nb(N, Hp, Wp)

    # One HBM pass: NCHW -> NHWC transpose fused with the f32->bf16 cast, then a
    # free reshape to the pool-friendly layout (N, Hp, 2, Wp, 2*Cin).
    x_pool = jnp.transpose(x_nchw, (0, 2, 3, 1)).astype(jnp.bfloat16)
    x_pool = x_pool.reshape(N, Hp, 2, Wp, 2 * Cin)

    wk1, s1, bb1 = _fold_bn(w1, b1, g1, be1, m1, v1)
    wk2, s2, bb2 = _fold_bn(w2, b2, g2, be2, m2, v2)

    # lane-dense flattened output only needed when Cout itself is lane-sparse.
    flat_out = (Cout % 128) != 0
    try:
        out = _down_impl(x_pool, wk1, s1, bb1, wk2, s2, bb2,
                         N, Nb, Hp, Wp, Cin, Cout, flat_out)
        out = jax.block_until_ready(out)
    except Exception:
        # Fallback: natural (..., Cout) layout (masked stores when Cout < 128) in
        # case the in-kernel lane-flatten relayout is rejected by this toolchain.
        flat_out = False
        out = _down_impl(x_pool, wk1, s1, bb1, wk2, s2, bb2,
                         N, Nb, Hp, Wp, Cin, Cout, False)

    if flat_out:
        out = out.reshape(N, Hp, Wp, Cout)
    # TODO(synk): skip this transpose (return NHWC) when the consumer accepts NHWC.
    return jnp.transpose(out, (0, 3, 1, 2))


# --------------------------------------------------------------------------- #
# Pure-JAX reference (mirrors the PyTorch module, eval-mode BN), NCHW.
# --------------------------------------------------------------------------- #
def down_ref(x, params):
    (w1, b1, g1, be1, m1, v1, w2, b2, g2, be2, m2, v2) = params
    p = lax.reduce_window(x, -jnp.inf, lax.max, (1, 1, 2, 2), (1, 1, 2, 2), "VALID")

    def block(h, w, b, g, beta, mean, var):
        y = lax.conv_general_dilated(h, w, (1, 1), ((1, 1), (1, 1)),
                                     dimension_numbers=("NCHW", "OIHW", "NCHW"),
                                     precision=lax.Precision.HIGHEST)
        y = y + b[None, :, None, None]
        y = (y - mean[None, :, None, None]) / jnp.sqrt(var[None, :, None, None] + EPS)
        y = y * g[None, :, None, None] + beta[None, :, None, None]
        return jnp.maximum(y, 0.0)

    h = block(p, w1, b1, g1, be1, m1, v1)
    h = block(h, w2, b2, g2, be2, m2, v2)
    return h


if __name__ == "__main__":
    N, Cin, Cout, H, W = 2, 4, 8, 16, 16
    key = jax.random.PRNGKey(0)
    ks = jax.random.split(key, 13)

    x = jax.random.normal(ks[0], (N, Cin, H, W), jnp.float32)

    # deterministic synthetic parameters (shapes as in the module's __init__)
    w1 = 0.1 * jax.random.normal(ks[1], (Cout, Cin, 3, 3), jnp.float32)
    b1 = 0.05 * jax.random.normal(ks[2], (Cout,), jnp.float32)
    g1 = 1.0 + 0.1 * jax.random.normal(ks[3], (Cout,), jnp.float32)
    be1 = 0.1 * jax.random.normal(ks[4], (Cout,), jnp.float32)
    m1 = 0.1 * jax.random.normal(ks[5], (Cout,), jnp.float32)
    v1 = jax.random.uniform(ks[6], (Cout,), jnp.float32, 0.5, 1.5)

    w2 = 0.1 * jax.random.normal(ks[7], (Cout, Cout, 3, 3), jnp.float32)
    b2 = 0.05 * jax.random.normal(ks[8], (Cout,), jnp.float32)
    g2 = 1.0 + 0.1 * jax.random.normal(ks[9], (Cout,), jnp.float32)
    be2 = 0.1 * jax.random.normal(ks[10], (Cout,), jnp.float32)
    m2 = 0.1 * jax.random.normal(ks[11], (Cout,), jnp.float32)
    v2 = jax.random.uniform(ks[12], (Cout,), jnp.float32, 0.5, 1.5)

    params = (w1, b1, g1, be1, m1, v1, w2, b2, g2, be2, m2, v2)

    out = down_pallas(x, params)
    out = jax.block_until_ready(out)

    ref = down_ref(x, params)
    assert out.shape == (N, Cout, H // 2, W // 2), out.shape
    # Tolerance reflects bf16 MXU operands / bf16 activation path (f32 accumulate).
    max_err = float(jnp.max(jnp.abs(out - ref)))
    assert max_err < 7e-2, f"max abs error {max_err}"
    print("KERNEL_OK")
</pallas_src>

<mosaic_0001>
module attributes {stable_mosaic.version = 11 : i64} {
  func.func @_down_kernel(%arg0: i32, %arg1: memref<2x8x2x8x8xbf16, #tpu.memory_space<vmem>>, %arg2: memref<9x4x8xbf16, #tpu.memory_space<vmem>>, %arg3: memref<1x8xf32, #tpu.memory_space<vmem>>, %arg4: memref<1x8xf32, #tpu.memory_space<vmem>>, %arg5: memref<9x8x8xbf16, #tpu.memory_space<vmem>>, %arg6: memref<1x8xf32, #tpu.memory_space<vmem>>, %arg7: memref<1x8xf32, #tpu.memory_space<vmem>>, %arg8: memref<2x8x64xf32, #tpu.memory_space<vmem>>, %arg9: memref<2x10x10x4xbf16, #tpu.memory_space<vmem>>, %arg10: memref<2x10x10x8xbf16, #tpu.memory_space<vmem>>) attributes {dimension_semantics = [#tpu.dimension_semantics<parallel>], iteration_bounds = array<i64: 1>, scalar_prefetch = 0 : i64, scratch_operands = 2 : i64, tpu.core_type = #tpu.core_type<tc>, window_params = [{transform_indices = @transform_0, window_bounds = array<i64: 2, 8, 2, 8, 8>}, {pipeline_mode = #tpu.pipeline_mode<synchronous>, transform_indices = @transform_1, window_bounds = array<i64: 9, 4, 8>}, {pipeline_mode = #tpu.pipeline_mode<synchronous>, transform_indices = @transform_2, window_bounds = array<i64: 1, 8>}, {pipeline_mode = #tpu.pipeline_mode<synchronous>, transform_indices = @transform_3, window_bounds = array<i64: 1, 8>}, {pipeline_mode = #tpu.pipeline_mode<synchronous>, transform_indices = @transform_4, window_bounds = array<i64: 9, 8, 8>}, {pipeline_mode = #tpu.pipeline_mode<synchronous>, transform_indices = @transform_5, window_bounds = array<i64: 1, 8>}, {pipeline_mode = #tpu.pipeline_mode<synchronous>, transform_indices = @transform_6, window_bounds = array<i64: 1, 8>}, {transform_indices = @transform_7, window_bounds = array<i64: 2, 8, 64>}]} {
    %cst = arith.constant 0.000000e+00 : bf16
    %0 = vector.broadcast %cst : bf16 to vector<2x1x10x4xbf16>
    %c0 = arith.constant 0 : index
    %c0_0 = arith.constant 0 : index
    %c0_1 = arith.constant 0 : index
    %c0_2 = arith.constant 0 : index
    %1 = vector.load %arg9[%c0, %c0_0, %c0_1, %c0_2] : memref<2x10x10x4xbf16, #tpu.memory_space<vmem>>, vector<2x1x10x4xbf16>
    tpu.vector_store %arg9[%c0, %c0_0, %c0_1, %c0_2], %0 {strides = array<i32>} : memref<2x10x10x4xbf16, #tpu.memory_space<vmem>>, vector<2x1x10x4xbf16>,
    %cst_3 = arith.constant 0.000000e+00 : bf16
    %2 = vector.broadcast %cst_3 : bf16 to vector<2x1x10x4xbf16>
    %c0_4 = arith.constant 0 : index
    %c9 = arith.constant 9 : index
    %c0_5 = arith.constant 0 : index
    %c0_6 = arith.constant 0 : index
    %3 = vector.load %arg9[%c0_4, %c9, %c0_5, %c0_6] : memref<2x10x10x4xbf16, #tpu.memory_space<vmem>>, vector<2x1x10x4xbf16>
    tpu.vector_store %arg9[%c0_4, %c9, %c0_5, %c0_6], %2 {strides = array<i32>} : memref<2x10x10x4xbf16, #tpu.memory_space<vmem>>, vector<2x1x10x4xbf16>,
    %cst_7 = arith.constant 0.000000e+00 : bf16
    %4 = vector.broadcast %cst_7 : bf16 to vector<2x10x1x4xbf16>
    %c0_8 = arith.constant 0 : index
    %c0_9 = arith.constant 0 : index
    %c0_10 = arith.constant 0 : index
    %c0_11 = arith.constant 0 : index
    %5 = vector.load %arg9[%c0_8, %c0_9, %c0_10, %c0_11] : memref<2x10x10x4xbf16, #tpu.memory_space<vmem>>, vector<2x10x1x4xbf16>
    tpu.vector_store %arg9[%c0_8, %c0_9, %c0_10, %c0_11], %4 {strides = array<i32>} : memref<2x10x10x4xbf16, #tpu.memory_space<vmem>>, vector<2x10x1x4xbf16>,
    %cst_12 = arith.constant 0.000000e+00 : bf16
    %6 = vector.broadcast %cst_12 : bf16 to vector<2x10x1x4xbf16>
    %c0_13 = arith.constant 0 : index
    %c0_14 = arith.constant 0 : index
    %c9_15 = arith.constant 9 : index
    %c0_16 = arith.constant 0 : index
    %7 = vector.load %arg9[%c0_13, %c0_14, %c9_15, %c0_16] : memref<2x10x10x4xbf16, #tpu.memory_space<vmem>>, vector<2x10x1x4xbf16>
    tpu.vector_store %arg9[%c0_13, %c0_14, %c9_15, %c0_16], %6 {strides = array<i32>} : memref<2x10x10x4xbf16, #tpu.memory_space<vmem>>, vector<2x10x1x4xbf16>,
    %cst_17 = arith.constant 0.000000e+00 : bf16
    %8 = vector.broadcast %cst_17 : bf16 to vector<2x1x10x8xbf16>
    %c0_18 = arith.constant 0 : index
    %c0_19 = arith.constant 0 : index
    %c0_20 = arith.constant 0 : index
    %c0_21 = arith.constant 0 : index
    %9 = vector.load %arg10[%c0_18, %c0_19, %c0_20, %c0_21] : memref<2x10x10x8xbf16, #tpu.memory_space<vmem>>, vector<2x1x10x8xbf16>
    tpu.vector_store %arg10[%c0_18, %c0_19, %c0_20, %c0_21], %8 {strides = array<i32>} : memref<2x10x10x8xbf16, #tpu.memory_space<vmem>>, vector<2x1x10x8xbf16>,
    %cst_22 = arith.constant 0.000000e+00 : bf16
    %10 = vector.broadcast %cst_22 : bf16 to vector<2x1x10x8xbf16>
    %c0_23 = arith.constant 0 : index
    %c9_24 = arith.constant 9 : index
    %c0_25 = arith.constant 0 : index
    %c0_26 = arith.constant 0 : index
    %11 = vector.load %arg10[%c0_23, %c9_24, %c0_25, %c0_26] : memref<2x10x10x8xbf16, #tpu.memory_space<vmem>>, vector<2x1x10x8xbf16>
    tpu.vector_store %arg10[%c0_23, %c9_24, %c0_25, %c0_26], %10 {strides = array<i32>} : memref<2x10x10x8xbf16, #tpu.memory_space<vmem>>, vector<2x1x10x8xbf16>,
    %cst_27 = arith.constant 0.000000e+00 : bf16
    %12 = vector.broadcast %cst_27 : bf16 to vector<2x10x1x8xbf16>
    %c0_28 = arith.constant 0 : index
    %c0_29 = arith.constant 0 : index
    %c0_30 = arith.constant 0 : index
    %c0_31 = arith.constant 0 : index
    %13 = vector.load %arg10[%c0_28, %c0_29, %c0_30, %c0_31] : memref<2x10x10x8xbf16, #tpu.memory_space<vmem>>, vector<2x10x1x8xbf16>
    tpu.vector_store %arg10[%c0_28, %c0_29, %c0_30, %c0_31], %12 {strides = array<i32>} : memref<2x10x10x8xbf16, #tpu.memory_space<vmem>>, vector<2x10x1x8xbf16>,
    %cst_32 = arith.constant 0.000000e+00 : bf16
    %14 = vector.broadcast %cst_32 : bf16 to vector<2x10x1x8xbf16>
    %c0_33 = arith.constant 0 : index
    %c0_34 = arith.constant 0 : index
    %c9_35 = arith.constant 9 : index
    %c0_36 = arith.constant 0 : index
    %15 = vector.load %arg10[%c0_33, %c0_34, %c9_35, %c0_36] : memref<2x10x10x8xbf16, #tpu.memory_space<vmem>>, vector<2x10x1x8xbf16>
    tpu.vector_store %arg10[%c0_33, %c0_34, %c9_35, %c0_36], %14 {strides = array<i32>} : memref<2x10x10x8xbf16, #tpu.memory_space<vmem>>, vector<2x10x1x8xbf16>,
    %c0_37 = arith.constant 0 : index
    %c0_38 = arith.constant 0 : index
    %c0_39 = arith.constant 0 : index
    %c0_40 = arith.constant 0 : index
    %c0_41 = arith.constant 0 : index
    %16 = vector.load %arg1[%c0_37, %c0_38, %c0_39, %c0_40, %c0_41] : memref<2x8x2x8x8xbf16, #tpu.memory_space<vmem>>, vector<2x8x2x8x8xbf16>
    %17 = vector.extract_strided_slice %16 {offsets = [0, 0, 0, 0, 0], sizes = [2, 8, 2, 8, 4], strides = [1, 1, 1, 1, 1]} : vector<2x8x2x8x8xbf16> to vector<2x8x2x8x4xbf16>
    %18 = vector.extract_strided_slice %16 {offsets = [0, 0, 0, 0, 4], sizes = [2, 8, 2, 8, 4], strides = [1, 1, 1, 1, 1]} : vector<2x8x2x8x8xbf16> to vector<2x8x2x8x4xbf16>
    %19 = arith.maximumf %17, %18 : vector<2x8x2x8x4xbf16>
    %20 = vector.extract_strided_slice %19 {offsets = [0, 0, 0, 0, 0], sizes = [2, 8, 1, 8, 4], strides = [1, 1, 1, 1, 1]} : vector<2x8x2x8x4xbf16> to vector<2x8x1x8x4xbf16>
    %21 = vector.shape_cast %20 : vector<2x8x1x8x4xbf16> to vector<2x8x8x4xbf16>
    %22 = vector.extract_strided_slice %19 {offsets = [0, 0, 1, 0, 0], sizes = [2, 8, 1, 8, 4], strides = [1, 1, 1, 1, 1]} : vector<2x8x2x8x4xbf16> to vector<2x8x1x8x4xbf16>
    %23 = vector.shape_cast %22 : vector<2x8x1x8x4xbf16> to vector<2x8x8x4xbf16>
    %24 = arith.maximumf %21, %23 : vector<2x8x8x4xbf16>
    %c0_42 = arith.constant 0 : index
    %c1 = arith.constant 1 : index
    %c1_43 = arith.constant 1 : index
    %c0_44 = arith.constant 0 : index
    %25 = vector.load %arg9[%c0_42, %c1, %c1_43, %c0_44] : memref<2x10x10x4xbf16, #tpu.memory_space<vmem>>, vector<2x8x8x4xbf16>
    tpu.vector_store %arg9[%c0_42, %c1, %c1_43, %c0_44], %24 {strides = array<i32>} : memref<2x10x10x4xbf16, #tpu.memory_space<vmem>>, vector<2x8x8x4xbf16>,
    %cst_45 = arith.constant 0.000000e+00 : f32
    %26 = vector.broadcast %cst_45 : f32 to vector<128x8xf32>
    %c0_46 = arith.constant 0 : index
    %c0_47 = arith.constant 0 : index
    %c0_48 = arith.constant 0 : index
    %c0_49 = arith.constant 0 : index
    %27 = vector.load %arg9[%c0_46, %c0_47, %c0_48, %c0_49] : memref<2x10x10x4xbf16, #tpu.memory_space<vmem>>, vector<2x8x8x4xbf16>
    %28 = vector.shape_cast %27 : vector<2x8x8x4xbf16> to vector<128x4xbf16>
    %c0_50 = arith.constant 0 : index
    %c0_51 = arith.constant 0 : index
    %c0_52 = arith.constant 0 : index
    %29 = vector.load %arg2[%c0_50, %c0_51, %c0_52] : memref<9x4x8xbf16, #tpu.memory_space<vmem>>, vector<1x4x8xbf16>
    %30 = vector.shape_cast %29 : vector<1x4x8xbf16> to vector<4x8xbf16>
    %cst_53 = arith.constant dense<0.000000e+00> : vector<128x8xf32>
    %31 = tpu.matmul %28, %30, %cst_53 {dimension_numbers = #tpu.dot_dimension_numbers<[1], [0], [0], [1], [0, 0, 1, 1], [], []>} : vector<128x4xbf16>, vector<4x8xbf16>, vector<128x8xf32> -> vector<128x8xf32>
    %32 = arith.addf %26, %31 : vector<128x8xf32>
    %c0_54 = arith.constant 0 : index
    %c0_55 = arith.constant 0 : index
    %c1_56 = arith.constant 1 : index
    %c0_57 = arith.constant 0 : index
    %33 = vector.load %arg9[%c0_54, %c0_55, %c1_56, %c0_57] : memref<2x10x10x4xbf16, #tpu.memory_space<vmem>>, vector<2x8x8x4xbf16>
    %34 = vector.shape_cast %33 : vector<2x8x8x4xbf16> to vector<128x4xbf16>
    %c1_58 = arith.constant 1 : index
    %c0_59 = arith.constant 0 : index
    %c0_60 = arith.constant 0 : index
    %35 = vector.load %arg2[%c1_58, %c0_59, %c0_60] : memref<9x4x8xbf16, #tpu.memory_space<vmem>>, vector<1x4x8xbf16>
    %36 = vector.shape_cast %35 : vector<1x4x8xbf16> to vector<4x8xbf16>
    %cst_61 = arith.constant dense<0.000000e+00> : vector<128x8xf32>
    %37 = tpu.matmul %34, %36, %cst_61 {dimension_numbers = #tpu.dot_dimension_numbers<[1], [0], [0], [1], [0, 0, 1, 1], [], []>} : vector<128x4xbf16>, vector<4x8xbf16>, vector<128x8xf32> -> vector<128x8xf32>
    %38 = arith.addf %32, %37 : vector<128x8xf32>
    %c0_62 = arith.constant 0 : index
    %c0_63 = arith.constant 0 : index
    %c2 = arith.constant 2 : index
    %c0_64 = arith.constant 0 : index
    %39 = vector.load %arg9[%c0_62, %c0_63, %c2, %c0_64] : memref<2x10x10x4xbf16, #tpu.memory_space<vmem>>, vector<2x8x8x4xbf16>
    %40 = vector.shape_cast %39 : vector<2x8x8x4xbf16> to vector<128x4xbf16>
    %c2_65 = arith.constant 2 : index
    %c0_66 = arith.constant 0 : index
    %c0_67 = arith.constant 0 : index
    %41 = vector.load %arg2[%c2_65, %c0_66, %c0_67] : memref<9x4x8xbf16, #tpu.memory_space<vmem>>, vector<1x4x8xbf16>
    %42 = vector.shape_cast %41 : vector<1x4x8xbf16> to vector<4x8xbf16>
    %cst_68 = arith.constant dense<0.000000e+00> : vector<128x8xf32>
    %43 = tpu.matmul %40, %42, %cst_68 {dimension_numbers = #tpu.dot_dimension_numbers<[1], [0], [0], [1], [0, 0, 1, 1], [], []>} : vector<128x4xbf16>, vector<4x8xbf16>, vector<128x8xf32> -> vector<128x8xf32>
    %44 = arith.addf %38, %43 : vector<128x8xf32>
    %c0_69 = arith.constant 0 : index
    %c1_70 = arith.constant 1 : index
    %c0_71 = arith.constant 0 : index
    %c0_72 = arith.constant 0 : index
    %45 = vector.load %arg9[%c0_69, %c1_70, %c0_71, %c0_72] : memref<2x10x10x4xbf16, #tpu.memory_space<vmem>>, vector<2x8x8x4xbf16>
    %46 = vector.shape_cast %45 : vector<2x8x8x4xbf16> to vector<128x4xbf16>
    %c3 = arith.constant 3 : index
    %c0_73 = arith.constant 0 : index
    %c0_74 = arith.constant 0 : index
    %47 = vector.load %arg2[%c3, %c0_73, %c0_74] : memref<9x4x8xbf16, #tpu.memory_space<vmem>>, vector<1x4x8xbf16>
    %48 = vector.shape_cast %47 : vector<1x4x8xbf16> to vector<4x8xbf16>
    %cst_75 = arith.constant dense<0.000000e+00> : vector<128x8xf32>
    %49 = tpu.matmul %46, %48, %cst_75 {dimension_numbers = #tpu.dot_dimension_numbers<[1], [0], [0], [1], [0, 0, 1, 1], [], []>} : vector<128x4xbf16>, vector<4x8xbf16>, vector<128x8xf32> -> vector<128x8xf32>
    %50 = arith.addf %44, %49 : vector<128x8xf32>
    %c0_76 = arith.constant 0 : index
    %c1_77 = arith.constant 1 : index
    %c1_78 = arith.constant 1 : index
    %c0_79 = arith.constant 0 : index
    %51 = vector.load %arg9[%c0_76, %c1_77, %c1_78, %c0_79] : memref<2x10x10x4xbf16, #tpu.memory_space<vmem>>, vector<2x8x8x4xbf16>
    %52 = vector.shape_cast %51 : vector<2x8x8x4xbf16> to vector<128x4xbf16>
    %c4 = arith.constant 4 : index
    %c0_80 = arith.constant 0 : index
    %c0_81 = arith.constant 0 : index
    %53 = vector.load %arg2[%c4, %c0_80, %c0_81] : memref<9x4x8xbf16, #tpu.memory_space<vmem>>, vector<1x4x8xbf16>
    %54 = vector.shape_cast %53 : vector<1x4x8xbf16> to vector<4x8xbf16>
    %cst_82 = arith.constant dense<0.000000e+00> : vector<128x8xf32>
    %55 = tpu.matmul %52, %54, %cst_82 {dimension_numbers = #tpu.dot_dimension_numbers<[1], [0], [0], [1], [0, 0, 1, 1], [], []>} : vector<128x4xbf16>, vector<4x8xbf16>, vector<128x8xf32> -> vector<128x8xf32>
    %56 = arith.addf %50, %55 : vector<128x8xf32>
    %c0_83 = arith.constant 0 : index
    %c1_84 = arith.constant 1 : index
    %c2_85 = arith.constant 2 : index
    %c0_86 = arith.constant 0 : index
    %57 = vector.load %arg9[%c0_83, %c1_84, %c2_85, %c0_86] : memref<2x10x10x4xbf16, #tpu.memory_space<vmem>>, vector<2x8x8x4xbf16>
    %58 = vector.shape_cast %57 : vector<2x8x8x4xbf16> to vector<128x4xbf16>
    %c5 = arith.constant 5 : index
    %c0_87 = arith.constant 0 : index
    %c0_88 = arith.constant 0 : index
    %59 = vector.load %arg2[%c5, %c0_87, %c0_88] : memref<9x4x8xbf16, #tpu.memory_space<vmem>>, vector<1x4x8xbf16>
    %60 = vector.shape_cast %59 : vector<1x4x8xbf16> to vector<4x8xbf16>
    %cst_89 = arith.constant dense<0.000000e+00> : vector<128x8xf32>
    %61 = tpu.matmul %58, %60, %cst_89 {dimension_numbers = #tpu.dot_dimension_numbers<[1], [0], [0], [1], [0, 0, 1, 1], [], []>} : vector<128x4xbf16>, vector<4x8xbf16>, vector<128x8xf32> -> vector<128x8xf32>
    %62 = arith.addf %56, %61 : vector<128x8xf32>
    %c0_90 = arith.constant 0 : index
    %c2_91 = arith.constant 2 : index
    %c0_92 = arith.constant 0 : index
    %c0_93 = arith.constant 0 : index
    %63 = vector.load %arg9[%c0_90, %c2_91, %c0_92, %c0_93] : memref<2x10x10x4xbf16, #tpu.memory_space<vmem>>, vector<2x8x8x4xbf16>
    %64 = vector.shape_cast %63 : vector<2x8x8x4xbf16> to vector<128x4xbf16>
    %c6 = arith.constant 6 : index
    %c0_94 = arith.constant 0 : index
    %c0_95 = arith.constant 0 : index
    %65 = vector.load %arg2[%c6, %c0_94, %c0_95] : memref<9x4x8xbf16, #tpu.memory_space<vmem>>, vector<1x4x8xbf16>
    %66 = vector.shape_cast %65 : vector<1x4x8xbf16> to vector<4x8xbf16>
    %cst_96 = arith.constant dense<0.000000e+00> : vector<128x8xf32>
    %67 = tpu.matmul %64, %66, %cst_96 {dimension_numbers = #tpu.dot_dimension_numbers<[1], [0], [0], [1], [0, 0, 1, 1], [], []>} : vector<128x4xbf16>, vector<4x8xbf16>, vector<128x8xf32> -> vector<128x8xf32>
    %68 = arith.addf %62, %67 : vector<128x8xf32>
    %c0_97 = arith.constant 0 : index
    %c2_98 = arith.constant 2 : index
    %c1_99 = arith.constant 1 : index
    %c0_100 = arith.constant 0 : index
    %69 = vector.load %arg9[%c0_97, %c2_98, %c1_99, %c0_100] : memref<2x10x10x4xbf16, #tpu.memory_space<vmem>>, vector<2x8x8x4xbf16>
    %70 = vector.shape_cast %69 : vector<2x8x8x4xbf16> to vector<128x4xbf16>
    %c7 = arith.constant 7 : index
    %c0_101 = arith.constant 0 : index
    %c0_102 = arith.constant 0 : index
    %71 = vector.load %arg2[%c7, %c0_101, %c0_102] : memref<9x4x8xbf16, #tpu.memory_space<vmem>>, vector<1x4x8xbf16>
    %72 = vector.shape_cast %71 : vector<1x4x8xbf16> to vector<4x8xbf16>
    %cst_103 = arith.constant dense<0.000000e+00> : vector<128x8xf32>
    %73 = tpu.matmul %70, %72, %cst_103 {dimension_numbers = #tpu.dot_dimension_numbers<[1], [0], [0], [1], [0, 0, 1, 1], [], []>} : vector<128x4xbf16>, vector<4x8xbf16>, vector<128x8xf32> -> vector<128x8xf32>
    %74 = arith.addf %68, %73 : vector<128x8xf32>
    %c0_104 = arith.constant 0 : index
    %c2_105 = arith.constant 2 : index
    %c2_106 = arith.constant 2 : index
    %c0_107 = arith.constant 0 : index
    %75 = vector.load %arg9[%c0_104, %c2_105, %c2_106, %c0_107] : memref<2x10x10x4xbf16, #tpu.memory_space<vmem>>, vector<2x8x8x4xbf16>
    %76 = vector.shape_cast %75 : vector<2x8x8x4xbf16> to vector<128x4xbf16>
    %c8 = arith.constant 8 : index
    %c0_108 = arith.constant 0 : index
    %c0_109 = arith.constant 0 : index
    %77 = vector.load %arg2[%c8, %c0_108, %c0_109] : memref<9x4x8xbf16, #tpu.memory_space<vmem>>, vector<1x4x8xbf16>
    %78 = vector.shape_cast %77 : vector<1x4x8xbf16> to vector<4x8xbf16>
    %cst_110 = arith.constant dense<0.000000e+00> : vector<128x8xf32>
    %79 = tpu.matmul %76, %78, %cst_110 {dimension_numbers = #tpu.dot_dimension_numbers<[1], [0], [0], [1], [0, 0, 1, 1], [], []>} : vector<128x4xbf16>, vector<4x8xbf16>, vector<128x8xf32> -> vector<128x8xf32>
    %80 = arith.addf %74, %79 : vector<128x8xf32>
    %c0_111 = arith.constant 0 : index
    %c0_112 = arith.constant 0 : index
    %81 = vector.load %arg3[%c0_111, %c0_112] : memref<1x8xf32, #tpu.memory_space<vmem>>, vector<1x8xf32>
    %82 = vector.broadcast %81 : vector<1x8xf32> to vector<128x8xf32>
    %83 = arith.mulf %80, %82 : vector<128x8xf32>
    %c0_113 = arith.constant 0 : index
    %c0_114 = arith.constant 0 : index
    %84 = vector.load %arg4[%c0_113, %c0_114] : memref<1x8xf32, #tpu.memory_space<vmem>>, vector<1x8xf32>
    %85 = vector.broadcast %84 : vector<1x8xf32> to vector<128x8xf32>
    %86 = arith.addf %83, %85 : vector<128x8xf32>
    %cst_115 = arith.constant 0.000000e+00 : f32
    %87 = vector.broadcast %cst_115 : f32 to vector<128x8xf32>
    %88 = arith.maximumf %86, %87 : vector<128x8xf32>
    %89 = arith.truncf %88 : vector<128x8xf32> to vector<128x8xbf16>
    %90 = vector.shape_cast %89 : vector<128x8xbf16> to vector<2x8x8x8xbf16>
    %c0_116 = arith.constant 0 : index
    %c1_117 = arith.constant 1 : index
    %c1_118 = arith.constant 1 : index
    %c0_119 = arith.constant 0 : index
    %91 = vector.load %arg10[%c0_116, %c1_117, %c1_118, %c0_119] : memref<2x10x10x8xbf16, #tpu.memory_space<vmem>>, vector<2x8x8x8xbf16>
    tpu.vector_store %arg10[%c0_116, %c1_117, %c1_118, %c0_119], %90 {strides = array<i32>} : memref<2x10x10x8xbf16, #tpu.memory_space<vmem>>, vector<2x8x8x8xbf16>,
    %cst_120 = arith.constant 0.000000e+00 : f32
    %92 = vector.broadcast %cst_120 : f32 to vector<128x8xf32>
    %c0_121 = arith.constant 0 : index
    %c0_122 = arith.constant 0 : index
    %c0_123 = arith.constant 0 : index
    %c0_124 = arith.constant 0 : index
    %93 = vector.load %arg10[%c0_121, %c0_122, %c0_123, %c0_124] : memref<2x10x10x8xbf16, #tpu.memory_space<vmem>>, vector<2x8x8x8xbf16>
    %94 = vector.shape_cast %93 : vector<2x8x8x8xbf16> to vector<128x8xbf16>
    %c0_125 = arith.constant 0 : index
    %c0_126 = arith.constant 0 : index
    %c0_127 = arith.constant 0 : index
    %95 = vector.load %arg5[%c0_125, %c0_126, %c0_127] : memref<9x8x8xbf16, #tpu.memory_space<vmem>>, vector<1x8x8xbf16>
    %96 = vector.shape_cast %95 : vector<1x8x8xbf16> to vector<8x8xbf16>
    %cst_128 = arith.constant dense<0.000000e+00> : vector<128x8xf32>
    %97 = tpu.matmul %94, %96, %cst_128 {dimension_numbers = #tpu.dot_dimension_numbers<[1], [0], [0], [1], [0, 0, 1, 1], [], []>} : vector<128x8xbf16>, vector<8x8xbf16>, vector<128x8xf32> -> vector<128x8xf32>
    %98 = arith.addf %92, %97 : vector<128x8xf32>
    %c0_129 = arith.constant 0 : index
    %c0_130 = arith.constant 0 : index
    %c1_131 = arith.constant 1 : index
    %c0_132 = arith.constant 0 : index
    %99 = vector.load %arg10[%c0_129, %c0_130, %c1_131, %c0_132] : memref<2x10x10x8xbf16, #tpu.memory_space<vmem>>, vector<2x8x8x8xbf16>
    %100 = vector.shape_cast %99 : vector<2x8x8x8xbf16> to vector<128x8xbf16>
    %c1_133 = arith.constant 1 : index
    %c0_134 = arith.constant 0 : index
    %c0_135 = arith.constant 0 : index
    %101 = vector.load %arg5[%c1_133, %c0_134, %c0_135] : memref<9x8x8xbf16, #tpu.memory_space<vmem>>, vector<1x8x8xbf16>
    %102 = vector.shape_cast %101 : vector<1x8x8xbf16> to vector<8x8xbf16>
    %cst_136 = arith.constant dense<0.000000e+00> : vector<128x8xf32>
    %103 = tpu.matmul %100, %102, %cst_136 {dimension_numbers = #tpu.dot_dimension_numbers<[1], [0], [0], [1], [0, 0, 1, 1], [], []>} : vector<128x8xbf16>, vector<8x8xbf16>, vector<128x8xf32> -> vector<128x8xf32>
    %104 = arith.addf %98, %103 : vector<128x8xf32>
    %c0_137 = arith.constant 0 : index
    %c0_138 = arith.constant 0 : index
    %c2_139 = arith.constant 2 : index
    %c0_140 = arith.constant 0 : index
    %105 = vector.load %arg10[%c0_137, %c0_138, %c2_139, %c0_140] : memref<2x10x10x8xbf16, #tpu.memory_space<vmem>>, vector<2x8x8x8xbf16>
    %106 = vector.shape_cast %105 : vector<2x8x8x8xbf16> to vector<128x8xbf16>
    %c2_141 = arith.constant 2 : index
    %c0_142 = arith.constant 0 : index
    %c0_143 = arith.constant 0 : index
    %107 = vector.load %arg5[%c2_141, %c0_142, %c0_143] : memref<9x8x8xbf16, #tpu.memory_space<vmem>>, vector<1x8x8xbf16>
    %108 = vector.shape_cast %107 : vector<1x8x8xbf16> to vector<8x8xbf16>
    %cst_144 = arith.constant dense<0.000000e+00> : vector<128x8xf32>
    %109 = tpu.matmul %106, %108, %cst_144 {dimension_numbers = #tpu.dot_dimension_numbers<[1], [0], [0], [1], [0, 0, 1, 1], [], []>} : vector<128x8xbf16>, vector<8x8xbf16>, vector<128x8xf32> -> vector<128x8xf32>
    %110 = arith.addf %104, %109 : vector<128x8xf32>
    %c0_145 = arith.constant 0 : index
    %c1_146 = arith.constant 1 : index
    %c0_147 = arith.constant 0 : index
    %c0_148 = arith.constant 0 : index
    %111 = vector.load %arg10[%c0_145, %c1_146, %c0_147, %c0_148] : memref<2x10x10x8xbf16, #tpu.memory_space<vmem>>, vector<2x8x8x8xbf16>
    %112 = vector.shape_cast %111 : vector<2x8x8x8xbf16> to vector<128x8xbf16>
    %c3_149 = arith.constant 3 : index
    %c0_150 = arith.constant 0 : index
    %c0_151 = arith.constant 0 : index
    %113 = vector.load %arg5[%c3_149, %c0_150, %c0_151] : memref<9x8x8xbf16, #tpu.memory_space<vmem>>, vector<1x8x8xbf16>
    %114 = vector.shape_cast %113 : vector<1x8x8xbf16> to vector<8x8xbf16>
    %cst_152 = arith.constant dense<0.000000e+00> : vector<128x8xf32>
    %115 = tpu.matmul %112, %114, %cst_152 {dimension_numbers = #tpu.dot_dimension_numbers<[1], [0], [0], [1], [0, 0, 1, 1], [], []>} : vector<128x8xbf16>, vector<8x8xbf16>, vector<128x8xf32> -> vector<128x8xf32>
    %116 = arith.addf %110, %115 : vector<128x8xf32>
    %c0_153 = arith.constant 0 : index
    %c1_154 = arith.constant 1 : index
    %c1_155 = arith.constant 1 : index
    %c0_156 = arith.constant 0 : index
    %117 = vector.load %arg10[%c0_153, %c1_154, %c1_155, %c0_156] : memref<2x10x10x8xbf16, #tpu.memory_space<vmem>>, vector<2x8x8x8xbf16>
    %118 = vector.shape_cast %117 : vector<2x8x8x8xbf16> to vector<128x8xbf16>
    %c4_157 = arith.constant 4 : index
    %c0_158 = arith.constant 0 : index
    %c0_159 = arith.constant 0 : index
    %119 = vector.load %arg5[%c4_157, %c0_158, %c0_159] : memref<9x8x8xbf16, #tpu.memory_space<vmem>>, vector<1x8x8xbf16>
    %120 = vector.shape_cast %119 : vector<1x8x8xbf16> to vector<8x8xbf16>
    %cst_160 = arith.constant dense<0.000000e+00> : vector<128x8xf32>
    %121 = tpu.matmul %118, %120, %cst_160 {dimension_numbers = #tpu.dot_dimension_numbers<[1], [0], [0], [1], [0, 0, 1, 1], [], []>} : vector<128x8xbf16>, vector<8x8xbf16>, vector<128x8xf32> -> vector<128x8xf32>
    %122 = arith.addf %116, %121 : vector<128x8xf32>
    %c0_161 = arith.constant 0 : index
    %c1_162 = arith.constant 1 : index
    %c2_163 = arith.constant 2 : index
    %c0_164 = arith.constant 0 : index
    %123 = vector.load %arg10[%c0_161, %c1_162, %c2_163, %c0_164] : memref<2x10x10x8xbf16, #tpu.memory_space<vmem>>, vector<2x8x8x8xbf16>
    %124 = vector.shape_cast %123 : vector<2x8x8x8xbf16> to vector<128x8xbf16>
    %c5_165 = arith.constant 5 : index
    %c0_166 = arith.constant 0 : index
    %c0_167 = arith.constant 0 : index
    %125 = vector.load %arg5[%c5_165, %c0_166, %c0_167] : memref<9x8x8xbf16, #tpu.memory_space<vmem>>, vector<1x8x8xbf16>
    %126 = vector.shape_cast %125 : vector<1x8x8xbf16> to vector<8x8xbf16>
    %cst_168 = arith.constant dense<0.000000e+00> : vector<128x8xf32>
    %127 = tpu.matmul %124, %126, %cst_168 {dimension_numbers = #tpu.dot_dimension_numbers<[1], [0], [0], [1], [0, 0, 1, 1], [], []>} : vector<128x8xbf16>, vector<8x8xbf16>, vector<128x8xf32> -> vector<128x8xf32>
    %128 = arith.addf %122, %127 : vector<128x8xf32>
    %c0_169 = arith.constant 0 : index
    %c2_170 = arith.constant 2 : index
    %c0_171 = arith.constant 0 : index
    %c0_172 = arith.constant 0 : index
    %129 = vector.load %arg10[%c0_169, %c2_170, %c0_171, %c0_172] : memref<2x10x10x8xbf16, #tpu.memory_space<vmem>>, vector<2x8x8x8xbf16>
    %130 = vector.shape_cast %129 : vector<2x8x8x8xbf16> to vector<128x8xbf16>
    %c6_173 = arith.constant 6 : index
    %c0_174 = arith.constant 0 : index
    %c0_175 = arith.constant 0 : index
    %131 = vector.load %arg5[%c6_173, %c0_174, %c0_175] : memref<9x8x8xbf16, #tpu.memory_space<vmem>>, vector<1x8x8xbf16>
    %132 = vector.shape_cast %131 : vector<1x8x8xbf16> to vector<8x8xbf16>
    %cst_176 = arith.constant dense<0.000000e+00> : vector<128x8xf32>
    %133 = tpu.matmul %130, %132, %cst_176 {dimension_numbers = #tpu.dot_dimension_numbers<[1], [0], [0], [1], [0, 0, 1, 1], [], []>} : vector<128x8xbf16>, vector<8x8xbf16>, vector<128x8xf32> -> vector<128x8xf32>
    %134 = arith.addf %128, %133 : vector<128x8xf32>
    %c0_177 = arith.constant 0 : index
    %c2_178 = arith.constant 2 : index
    %c1_179 = arith.constant 1 : index
    %c0_180 = arith.constant 0 : index
    %135 = vector.load %arg10[%c0_177, %c2_178, %c1_179, %c0_180] : memref<2x10x10x8xbf16, #tpu.memory_space<vmem>>, vector<2x8x8x8xbf16>
    %136 = vector.shape_cast %135 : vector<2x8x8x8xbf16> to vector<128x8xbf16>
    %c7_181 = arith.constant 7 : index
    %c0_182 = arith.constant 0 : index
    %c0_183 = arith.constant 0 : index
    %137 = vector.load %arg5[%c7_181, %c0_182, %c0_183] : memref<9x8x8xbf16, #tpu.memory_space<vmem>>, vector<1x8x8xbf16>
    %138 = vector.shape_cast %137 : vector<1x8x8xbf16> to vector<8x8xbf16>
    %cst_184 = arith.constant dense<0.000000e+00> : vector<128x8xf32>
    %139 = tpu.matmul %136, %138, %cst_184 {dimension_numbers = #tpu.dot_dimension_numbers<[1], [0], [0], [1], [0, 0, 1, 1], [], []>} : vector<128x8xbf16>, vector<8x8xbf16>, vector<128x8xf32> -> vector<128x8xf32>
    %140 = arith.addf %134, %139 : vector<128x8xf32>
    %c0_185 = arith.constant 0 : index
    %c2_186 = arith.constant 2 : index
    %c2_187 = arith.constant 2 : index
    %c0_188 = arith.constant 0 : index
    %141 = vector.load %arg10[%c0_185, %c2_186, %c2_187, %c0_188] : memref<2x10x10x8xbf16, #tpu.memory_space<vmem>>, vector<2x8x8x8xbf16>
    %142 = vector.shape_cast %141 : vector<2x8x8x8xbf16> to vector<128x8xbf16>
    %c8_189 = arith.constant 8 : index
    %c0_190 = arith.constant 0 : index
    %c0_191 = arith.constant 0 : index
    %143 = vector.load %arg5[%c8_189, %c0_190, %c0_191] : memref<9x8x8xbf16, #tpu.memory_space<vmem>>, vector<1x8x8xbf16>
    %144 = vector.shape_cast %143 : vector<1x8x8xbf16> to vector<8x8xbf16>
    %cst_192 = arith.constant dense<0.000000e+00> : vector<128x8xf32>
    %145 = tpu.matmul %142, %144, %cst_192 {dimension_numbers = #tpu.dot_dimension_numbers<[1], [0], [0], [1], [0, 0, 1, 1], [], []>} : vector<128x8xbf16>, vector<8x8xbf16>, vector<128x8xf32> -> vector<128x8xf32>
    %146 = arith.addf %140, %145 : vector<128x8xf32>
    %c0_193 = arith.constant 0 : index
    %c0_194 = arith.constant 0 : index
    %147 = vector.load %arg6[%c0_193, %c0_194] : memref<1x8xf32, #tpu.memory_space<vmem>>, vector<1x8xf32>
    %148 = vector.broadcast %147 : vector<1x8xf32> to vector<128x8xf32>
    %149 = arith.mulf %146, %148 : vector<128x8xf32>
    %c0_195 = arith.constant 0 : index
    %c0_196 = arith.constant 0 : index
    %150 = vector.load %arg7[%c0_195, %c0_196] : memref<1x8xf32, #tpu.memory_space<vmem>>, vector<1x8xf32>
    %151 = vector.broadcast %150 : vector<1x8xf32> to vector<128x8xf32>
    %152 = arith.addf %149, %151 : vector<128x8xf32>
    %cst_197 = arith.constant 0.000000e+00 : f32
    %153 = vector.broadcast %cst_197 : f32 to vector<128x8xf32>
    %154 = arith.maximumf %152, %153 : vector<128x8xf32>
    %155 = vector.shape_cast %154 : vector<128x8xf32> to vector<2x8x64xf32>
    %c0_198 = arith.constant 0 : index
    %c0_199 = arith.constant 0 : index
    %c0_200 = arith.constant 0 : index
    %156 = vector.load %arg8[%c0_198, %c0_199, %c0_200] : memref<2x8x64xf32, #tpu.memory_space<vmem>>, vector<2x8x64xf32>
    tpu.vector_store %arg8[%c0_198, %c0_199, %c0_200], %155 {strides = array<i32>} : memref<2x8x64xf32, #tpu.memory_space<vmem>>, vector<2x8x64xf32>,
    return
  }
  func.func @transform_0(%arg0: i32) -> (i32, i32, i32, i32, i32) {
    %c0_i32 = arith.constant 0 : i32
    %c0_i32_0 = arith.constant 0 : i32
    %c0_i32_1 = arith.constant 0 : i32
    %c0_i32_2 = arith.constant 0 : i32
    %c0_i32_3 = arith.constant 0 : i32
    return %arg0, %c0_i32, %c0_i32_0, %c0_i32_1, %c0_i32_2 : i32, i32, i32, i32, i32
  }
  func.func @transform_1(%arg0: i32) -> (i32, i32, i32) {
    %c0_i32 = arith.constant 0 : i32
    %c0_i32_0 = arith.constant 0 : i32
    %c0_i32_1 = arith.constant 0 : i32
    %c0_i32_2 = arith.constant 0 : i32
    return %c0_i32, %c0_i32_0, %c0_i32_1 : i32, i32, i32
  }
  func.func @transform_2(%arg0: i32) -> (i32, i32) {
    %c0_i32 = arith.constant 0 : i32
    %c0_i32_0 = arith.constant 0 : i32
    %c0_i32_1 = arith.constant 0 : i32
    return %c0_i32, %c0_i32_0 : i32, i32
  }
  func.func @transform_3(%arg0: i32) -> (i32, i32) {
    %c0_i32 = arith.constant 0 : i32
    %c0_i32_0 = arith.constant 0 : i32
    %c0_i32_1 = arith.constant 0 : i32
    return %c0_i32, %c0_i32_0 : i32, i32
  }
  func.func @transform_4(%arg0: i32) -> (i32, i32, i32) {
    %c0_i32 = arith.constant 0 : i32
    %c0_i32_0 = arith.constant 0 : i32
    %c0_i32_1 = arith.constant 0 : i32
    %c0_i32_2 = arith.constant 0 : i32
    return %c0_i32, %c0_i32_0, %c0_i32_1 : i32, i32, i32
  }
  func.func @transform_5(%arg0: i32) -> (i32, i32) {
    %c0_i32 = arith.constant 0 : i32
    %c0_i32_0 = arith.constant 0 : i32
    %c0_i32_1 = arith.constant 0 : i32
    return %c0_i32, %c0_i32_0 : i32, i32
  }
  func.func @transform_6(%arg0: i32) -> (i32, i32) {
    %c0_i32 = arith.constant 0 : i32
    %c0_i32_0 = arith.constant 0 : i32
    %c0_i32_1 = arith.constant 0 : i32
    return %c0_i32, %c0_i32_0 : i32, i32
  }
  func.func @transform_7(%arg0: i32) -> (i32, i32, i32) {
    %c0_i32 = arith.constant 0 : i32
    %c0_i32_0 = arith.constant 0 : i32
    %c0_i32_1 = arith.constant 0 : i32
    return %arg0, %c0_i32, %c0_i32_0 : i32, i32, i32
  }
}

module attributes {stable_mosaic.version = 11 : i64} {
  func.func @_down_kernel(%arg0: i32, %arg1: memref<2x8x2x8x8xbf16, #tpu.memory_space<vmem>>, %arg2: memref<9x4x8xbf16, #tpu.memory_space<vmem>>, %arg3: memref<1x8xf32, #tpu.memory_space<vmem>>, %arg4: memref<1x8xf32, #tpu.memory_space<vmem>>, %arg5: memref<9x8x8xbf16, #tpu.memory_space<vmem>>, %arg6: memref<1x8xf32, #tpu.memory_space<vmem>>, %arg7: memref<1x8xf32, #tpu.memory_space<vmem>>, %arg8: memref<2x8x8x8xf32, #tpu.memory_space<vmem>>, %arg9: memref<2x10x10x4xbf16, #tpu.memory_space<vmem>>, %arg10: memref<2x10x10x8xbf16, #tpu.memory_space<vmem>>) attributes {dimension_semantics = [#tpu.dimension_semantics<parallel>], iteration_bounds = array<i64: 1>, scalar_prefetch = 0 : i64, scratch_operands = 2 : i64, tpu.core_type = #tpu.core_type<tc>, window_params = [{transform_indices = @transform_0, window_bounds = array<i64: 2, 8, 2, 8, 8>}, {pipeline_mode = #tpu.pipeline_mode<synchronous>, transform_indices = @transform_1, window_bounds = array<i64: 9, 4, 8>}, {pipeline_mode = #tpu.pipeline_mode<synchronous>, transform_indices = @transform_2, window_bounds = array<i64: 1, 8>}, {pipeline_mode = #tpu.pipeline_mode<synchronous>, transform_indices = @transform_3, window_bounds = array<i64: 1, 8>}, {pipeline_mode = #tpu.pipeline_mode<synchronous>, transform_indices = @transform_4, window_bounds = array<i64: 9, 8, 8>}, {pipeline_mode = #tpu.pipeline_mode<synchronous>, transform_indices = @transform_5, window_bounds = array<i64: 1, 8>}, {pipeline_mode = #tpu.pipeline_mode<synchronous>, transform_indices = @transform_6, window_bounds = array<i64: 1, 8>}, {transform_indices = @transform_7, window_bounds = array<i64: 2, 8, 8, 8>}]} {
    %cst = arith.constant 0.000000e+00 : bf16
    %0 = vector.broadcast %cst : bf16 to vector<2x1x10x4xbf16>
    %c0 = arith.constant 0 : index
    %c0_0 = arith.constant 0 : index
    %c0_1 = arith.constant 0 : index
    %c0_2 = arith.constant 0 : index
    %1 = vector.load %arg9[%c0, %c0_0, %c0_1, %c0_2] : memref<2x10x10x4xbf16, #tpu.memory_space<vmem>>, vector<2x1x10x4xbf16>
    tpu.vector_store %arg9[%c0, %c0_0, %c0_1, %c0_2], %0 {strides = array<i32>} : memref<2x10x10x4xbf16, #tpu.memory_space<vmem>>, vector<2x1x10x4xbf16>,
    %cst_3 = arith.constant 0.000000e+00 : bf16
    %2 = vector.broadcast %cst_3 : bf16 to vector<2x1x10x4xbf16>
    %c0_4 = arith.constant 0 : index
    %c9 = arith.constant 9 : index
    %c0_5 = arith.constant 0 : index
    %c0_6 = arith.constant 0 : index
    %3 = vector.load %arg9[%c0_4, %c9, %c0_5, %c0_6] : memref<2x10x10x4xbf16, #tpu.memory_space<vmem>>, vector<2x1x10x4xbf16>
    tpu.vector_store %arg9[%c0_4, %c9, %c0_5, %c0_6], %2 {strides = array<i32>} : memref<2x10x10x4xbf16, #tpu.memory_space<vmem>>, vector<2x1x10x4xbf16>,
    %cst_7 = arith.constant 0.000000e+00 : bf16
    %4 = vector.broadcast %cst_7 : bf16 to vector<2x10x1x4xbf16>
    %c0_8 = arith.constant 0 : index
    %c0_9 = arith.constant 0 : index
    %c0_10 = arith.constant 0 : index
    %c0_11 = arith.constant 0 : index
    %5 = vector.load %arg9[%c0_8, %c0_9, %c0_10, %c0_11] : memref<2x10x10x4xbf16, #tpu.memory_space<vmem>>, vector<2x10x1x4xbf16>
    tpu.vector_store %arg9[%c0_8, %c0_9, %c0_10, %c0_11], %4 {strides = array<i32>} : memref<2x10x10x4xbf16, #tpu.memory_space<vmem>>, vector<2x10x1x4xbf16>,
    %cst_12 = arith.constant 0.000000e+00 : bf16
    %6 = vector.broadcast %cst_12 : bf16 to vector<2x10x1x4xbf16>
    %c0_13 = arith.constant 0 : index
    %c0_14 = arith.constant 0 : index
    %c9_15 = arith.constant 9 : index
    %c0_16 = arith.constant 0 : index
    %7 = vector.load %arg9[%c0_13, %c0_14, %c9_15, %c0_16] : memref<2x10x10x4xbf16, #tpu.memory_space<vmem>>, vector<2x10x1x4xbf16>
    tpu.vector_store %arg9[%c0_13, %c0_14, %c9_15, %c0_16], %6 {strides = array<i32>} : memref<2x10x10x4xbf16, #tpu.memory_space<vmem>>, vector<2x10x1x4xbf16>,
    %cst_17 = arith.constant 0.000000e+00 : bf16
    %8 = vector.broadcast %cst_17 : bf16 to vector<2x1x10x8xbf16>
    %c0_18 = arith.constant 0 : index
    %c0_19 = arith.constant 0 : index
    %c0_20 = arith.constant 0 : index
    %c0_21 = arith.constant 0 : index
    %9 = vector.load %arg10[%c0_18, %c0_19, %c0_20, %c0_21] : memref<2x10x10x8xbf16, #tpu.memory_space<vmem>>, vector<2x1x10x8xbf16>
    tpu.vector_store %arg10[%c0_18, %c0_19, %c0_20, %c0_21], %8 {strides = array<i32>} : memref<2x10x10x8xbf16, #tpu.memory_space<vmem>>, vector<2x1x10x8xbf16>,
    %cst_22 = arith.constant 0.000000e+00 : bf16
    %10 = vector.broadcast %cst_22 : bf16 to vector<2x1x10x8xbf16>
    %c0_23 = arith.constant 0 : index
    %c9_24 = arith.constant 9 : index
    %c0_25 = arith.constant 0 : index
    %c0_26 = arith.constant 0 : index
    %11 = vector.load %arg10[%c0_23, %c9_24, %c0_25, %c0_26] : memref<2x10x10x8xbf16, #tpu.memory_space<vmem>>, vector<2x1x10x8xbf16>
    tpu.vector_store %arg10[%c0_23, %c9_24, %c0_25, %c0_26], %10 {strides = array<i32>} : memref<2x10x10x8xbf16, #tpu.memory_space<vmem>>, vector<2x1x10x8xbf16>,
    %cst_27 = arith.constant 0.000000e+00 : bf16
    %12 = vector.broadcast %cst_27 : bf16 to vector<2x10x1x8xbf16>
    %c0_28 = arith.constant 0 : index
    %c0_29 = arith.constant 0 : index
    %c0_30 = arith.constant 0 : index
    %c0_31 = arith.constant 0 : index
    %13 = vector.load %arg10[%c0_28, %c0_29, %c0_30, %c0_31] : memref<2x10x10x8xbf16, #tpu.memory_space<vmem>>, vector<2x10x1x8xbf16>
    tpu.vector_store %arg10[%c0_28, %c0_29, %c0_30, %c0_31], %12 {strides = array<i32>} : memref<2x10x10x8xbf16, #tpu.memory_space<vmem>>, vector<2x10x1x8xbf16>,
    %cst_32 = arith.constant 0.000000e+00 : bf16
    %14 = vector.broadcast %cst_32 : bf16 to vector<2x10x1x8xbf16>
    %c0_33 = arith.constant 0 : index
    %c0_34 = arith.constant 0 : index
    %c9_35 = arith.constant 9 : index
    %c0_36 = arith.constant 0 : index
    %15 = vector.load %arg10[%c0_33, %c0_34, %c9_35, %c0_36] : memref<2x10x10x8xbf16, #tpu.memory_space<vmem>>, vector<2x10x1x8xbf16>
    tpu.vector_store %arg10[%c0_33, %c0_34, %c9_35, %c0_36], %14 {strides = array<i32>} : memref<2x10x10x8xbf16, #tpu.memory_space<vmem>>, vector<2x10x1x8xbf16>,
    %c0_37 = arith.constant 0 : index
    %c0_38 = arith.constant 0 : index
    %c0_39 = arith.constant 0 : index
    %c0_40 = arith.constant 0 : index
    %c0_41 = arith.constant 0 : index
    %16 = vector.load %arg1[%c0_37, %c0_38, %c0_39, %c0_40, %c0_41] : memref<2x8x2x8x8xbf16, #tpu.memory_space<vmem>>, vector<2x8x2x8x8xbf16>
    %17 = vector.extract_strided_slice %16 {offsets = [0, 0, 0, 0, 0], sizes = [2, 8, 2, 8, 4], strides = [1, 1, 1, 1, 1]} : vector<2x8x2x8x8xbf16> to vector<2x8x2x8x4xbf16>
    %18 = vector.extract_strided_slice %16 {offsets = [0, 0, 0, 0, 4], sizes = [2, 8, 2, 8, 4], strides = [1, 1, 1, 1, 1]} : vector<2x8x2x8x8xbf16> to vector<2x8x2x8x4xbf16>
    %19 = arith.maximumf %17, %18 : vector<2x8x2x8x4xbf16>
    %20 = vector.extract_strided_slice %19 {offsets = [0, 0, 0, 0, 0], sizes = [2, 8, 1, 8, 4], strides = [1, 1, 1, 1, 1]} : vector<2x8x2x8x4xbf16> to vector<2x8x1x8x4xbf16>
    %21 = vector.shape_cast %20 : vector<2x8x1x8x4xbf16> to vector<2x8x8x4xbf16>
    %22 = vector.extract_strided_slice %19 {offsets = [0, 0, 1, 0, 0], sizes = [2, 8, 1, 8, 4], strides = [1, 1, 1, 1, 1]} : vector<2x8x2x8x4xbf16> to vector<2x8x1x8x4xbf16>
    %23 = vector.shape_cast %22 : vector<2x8x1x8x4xbf16> to vector<2x8x8x4xbf16>
    %24 = arith.maximumf %21, %23 : vector<2x8x8x4xbf16>
    %c0_42 = arith.constant 0 : index
    %c1 = arith.constant 1 : index
    %c1_43 = arith.constant 1 : index
    %c0_44 = arith.constant 0 : index
    %25 = vector.load %arg9[%c0_42, %c1, %c1_43, %c0_44] : memref<2x10x10x4xbf16, #tpu.memory_space<vmem>>, vector<2x8x8x4xbf16>
    tpu.vector_store %arg9[%c0_42, %c1, %c1_43, %c0_44], %24 {strides = array<i32>} : memref<2x10x10x4xbf16, #tpu.memory_space<vmem>>, vector<2x8x8x4xbf16>,
    %cst_45 = arith.constant 0.000000e+00 : f32
    %26 = vector.broadcast %cst_45 : f32 to vector<128x8xf32>
    %c0_46 = arith.constant 0 : index
    %c0_47 = arith.constant 0 : index
    %c0_48 = arith.constant 0 : index
    %c0_49 = arith.constant 0 : index
    %27 = vector.load %arg9[%c0_46, %c0_47, %c0_48, %c0_49] : memref<2x10x10x4xbf16, #tpu.memory_space<vmem>>, vector<2x8x8x4xbf16>
    %28 = vector.shape_cast %27 : vector<2x8x8x4xbf16> to vector<128x4xbf16>
    %c0_50 = arith.constant 0 : index
    %c0_51 = arith.constant 0 : index
    %c0_52 = arith.constant 0 : index
    %29 = vector.load %arg2[%c0_50, %c0_51, %c0_52] : memref<9x4x8xbf16, #tpu.memory_space<vmem>>, vector<1x4x8xbf16>
    %30 = vector.shape_cast %29 : vector<1x4x8xbf16> to vector<4x8xbf16>
    %cst_53 = arith.constant dense<0.000000e+00> : vector<128x8xf32>
    %31 = tpu.matmul %28, %30, %cst_53 {dimension_numbers = #tpu.dot_dimension_numbers<[1], [0], [0], [1], [0, 0, 1, 1], [], []>} : vector<128x4xbf16>, vector<4x8xbf16>, vector<128x8xf32> -> vector<128x8xf32>
    %32 = arith.addf %26, %31 : vector<128x8xf32>
    %c0_54 = arith.constant 0 : index
    %c0_55 = arith.constant 0 : index
    %c1_56 = arith.constant 1 : index
    %c0_57 = arith.constant 0 : index
    %33 = vector.load %arg9[%c0_54, %c0_55, %c1_56, %c0_57] : memref<2x10x10x4xbf16, #tpu.memory_space<vmem>>, vector<2x8x8x4xbf16>
    %34 = vector.shape_cast %33 : vector<2x8x8x4xbf16> to vector<128x4xbf16>
    %c1_58 = arith.constant 1 : index
    %c0_59 = arith.constant 0 : index
    %c0_60 = arith.constant 0 : index
    %35 = vector.load %arg2[%c1_58, %c0_59, %c0_60] : memref<9x4x8xbf16, #tpu.memory_space<vmem>>, vector<1x4x8xbf16>
    %36 = vector.shape_cast %35 : vector<1x4x8xbf16> to vector<4x8xbf16>
    %cst_61 = arith.constant dense<0.000000e+00> : vector<128x8xf32>
    %37 = tpu.matmul %34, %36, %cst_61 {dimension_numbers = #tpu.dot_dimension_numbers<[1], [0], [0], [1], [0, 0, 1, 1], [], []>} : vector<128x4xbf16>, vector<4x8xbf16>, vector<128x8xf32> -> vector<128x8xf32>
    %38 = arith.addf %32, %37 : vector<128x8xf32>
    %c0_62 = arith.constant 0 : index
    %c0_63 = arith.constant 0 : index
    %c2 = arith.constant 2 : index
    %c0_64 = arith.constant 0 : index
    %39 = vector.load %arg9[%c0_62, %c0_63, %c2, %c0_64] : memref<2x10x10x4xbf16, #tpu.memory_space<vmem>>, vector<2x8x8x4xbf16>
    %40 = vector.shape_cast %39 : vector<2x8x8x4xbf16> to vector<128x4xbf16>
    %c2_65 = arith.constant 2 : index
    %c0_66 = arith.constant 0 : index
    %c0_67 = arith.constant 0 : index
    %41 = vector.load %arg2[%c2_65, %c0_66, %c0_67] : memref<9x4x8xbf16, #tpu.memory_space<vmem>>, vector<1x4x8xbf16>
    %42 = vector.shape_cast %41 : vector<1x4x8xbf16> to vector<4x8xbf16>
    %cst_68 = arith.constant dense<0.000000e+00> : vector<128x8xf32>
    %43 = tpu.matmul %40, %42, %cst_68 {dimension_numbers = #tpu.dot_dimension_numbers<[1], [0], [0], [1], [0, 0, 1, 1], [], []>} : vector<128x4xbf16>, vector<4x8xbf16>, vector<128x8xf32> -> vector<128x8xf32>
    %44 = arith.addf %38, %43 : vector<128x8xf32>
    %c0_69 = arith.constant 0 : index
    %c1_70 = arith.constant 1 : index
    %c0_71 = arith.constant 0 : index
    %c0_72 = arith.constant 0 : index
    %45 = vector.load %arg9[%c0_69, %c1_70, %c0_71, %c0_72] : memref<2x10x10x4xbf16, #tpu.memory_space<vmem>>, vector<2x8x8x4xbf16>
    %46 = vector.shape_cast %45 : vector<2x8x8x4xbf16> to vector<128x4xbf16>
    %c3 = arith.constant 3 : index
    %c0_73 = arith.constant 0 : index
    %c0_74 = arith.constant 0 : index
    %47 = vector.load %arg2[%c3, %c0_73, %c0_74] : memref<9x4x8xbf16, #tpu.memory_space<vmem>>, vector<1x4x8xbf16>
    %48 = vector.shape_cast %47 : vector<1x4x8xbf16> to vector<4x8xbf16>
    %cst_75 = arith.constant dense<0.000000e+00> : vector<128x8xf32>
    %49 = tpu.matmul %46, %48, %cst_75 {dimension_numbers = #tpu.dot_dimension_numbers<[1], [0], [0], [1], [0, 0, 1, 1], [], []>} : vector<128x4xbf16>, vector<4x8xbf16>, vector<128x8xf32> -> vector<128x8xf32>
    %50 = arith.addf %44, %49 : vector<128x8xf32>
    %c0_76 = arith.constant 0 : index
    %c1_77 = arith.constant 1 : index
    %c1_78 = arith.constant 1 : index
    %c0_79 = arith.constant 0 : index
    %51 = vector.load %arg9[%c0_76, %c1_77, %c1_78, %c0_79] : memref<2x10x10x4xbf16, #tpu.memory_space<vmem>>, vector<2x8x8x4xbf16>
    %52 = vector.shape_cast %51 : vector<2x8x8x4xbf16> to vector<128x4xbf16>
    %c4 = arith.constant 4 : index
    %c0_80 = arith.constant 0 : index
    %c0_81 = arith.constant 0 : index
    %53 = vector.load %arg2[%c4, %c0_80, %c0_81] : memref<9x4x8xbf16, #tpu.memory_space<vmem>>, vector<1x4x8xbf16>
    %54 = vector.shape_cast %53 : vector<1x4x8xbf16> to vector<4x8xbf16>
    %cst_82 = arith.constant dense<0.000000e+00> : vector<128x8xf32>
    %55 = tpu.matmul %52, %54, %cst_82 {dimension_numbers = #tpu.dot_dimension_numbers<[1], [0], [0], [1], [0, 0, 1, 1], [], []>} : vector<128x4xbf16>, vector<4x8xbf16>, vector<128x8xf32> -> vector<128x8xf32>
    %56 = arith.addf %50, %55 : vector<128x8xf32>
    %c0_83 = arith.constant 0 : index
    %c1_84 = arith.constant 1 : index
    %c2_85 = arith.constant 2 : index
    %c0_86 = arith.constant 0 : index
    %57 = vector.load %arg9[%c0_83, %c1_84, %c2_85, %c0_86] : memref<2x10x10x4xbf16, #tpu.memory_space<vmem>>, vector<2x8x8x4xbf16>
    %58 = vector.shape_cast %57 : vector<2x8x8x4xbf16> to vector<128x4xbf16>
    %c5 = arith.constant 5 : index
    %c0_87 = arith.constant 0 : index
    %c0_88 = arith.constant 0 : index
    %59 = vector.load %arg2[%c5, %c0_87, %c0_88] : memref<9x4x8xbf16, #tpu.memory_space<vmem>>, vector<1x4x8xbf16>
    %60 = vector.shape_cast %59 : vector<1x4x8xbf16> to vector<4x8xbf16>
    %cst_89 = arith.constant dense<0.000000e+00> : vector<128x8xf32>
    %61 = tpu.matmul %58, %60, %cst_89 {dimension_numbers = #tpu.dot_dimension_numbers<[1], [0], [0], [1], [0, 0, 1, 1], [], []>} : vector<128x4xbf16>, vector<4x8xbf16>, vector<128x8xf32> -> vector<128x8xf32>
    %62 = arith.addf %56, %61 : vector<128x8xf32>
    %c0_90 = arith.constant 0 : index
    %c2_91 = arith.constant 2 : index
    %c0_92 = arith.constant 0 : index
    %c0_93 = arith.constant 0 : index
    %63 = vector.load %arg9[%c0_90, %c2_91, %c0_92, %c0_93] : memref<2x10x10x4xbf16, #tpu.memory_space<vmem>>, vector<2x8x8x4xbf16>
    %64 = vector.shape_cast %63 : vector<2x8x8x4xbf16> to vector<128x4xbf16>
    %c6 = arith.constant 6 : index
    %c0_94 = arith.constant 0 : index
    %c0_95 = arith.constant 0 : index
    %65 = vector.load %arg2[%c6, %c0_94, %c0_95] : memref<9x4x8xbf16, #tpu.memory_space<vmem>>, vector<1x4x8xbf16>
    %66 = vector.shape_cast %65 : vector<1x4x8xbf16> to vector<4x8xbf16>
    %cst_96 = arith.constant dense<0.000000e+00> : vector<128x8xf32>
    %67 = tpu.matmul %64, %66, %cst_96 {dimension_numbers = #tpu.dot_dimension_numbers<[1], [0], [0], [1], [0, 0, 1, 1], [], []>} : vector<128x4xbf16>, vector<4x8xbf16>, vector<128x8xf32> -> vector<128x8xf32>
    %68 = arith.addf %62, %67 : vector<128x8xf32>
    %c0_97 = arith.constant 0 : index
    %c2_98 = arith.constant 2 : index
    %c1_99 = arith.constant 1 : index
    %c0_100 = arith.constant 0 : index
    %69 = vector.load %arg9[%c0_97, %c2_98, %c1_99, %c0_100] : memref<2x10x10x4xbf16, #tpu.memory_space<vmem>>, vector<2x8x8x4xbf16>
    %70 = vector.shape_cast %69 : vector<2x8x8x4xbf16> to vector<128x4xbf16>
    %c7 = arith.constant 7 : index
    %c0_101 = arith.constant 0 : index
    %c0_102 = arith.constant 0 : index
    %71 = vector.load %arg2[%c7, %c0_101, %c0_102] : memref<9x4x8xbf16, #tpu.memory_space<vmem>>, vector<1x4x8xbf16>
    %72 = vector.shape_cast %71 : vector<1x4x8xbf16> to vector<4x8xbf16>
    %cst_103 = arith.constant dense<0.000000e+00> : vector<128x8xf32>
    %73 = tpu.matmul %70, %72, %cst_103 {dimension_numbers = #tpu.dot_dimension_numbers<[1], [0], [0], [1], [0, 0, 1, 1], [], []>} : vector<128x4xbf16>, vector<4x8xbf16>, vector<128x8xf32> -> vector<128x8xf32>
    %74 = arith.addf %68, %73 : vector<128x8xf32>
    %c0_104 = arith.constant 0 : index
    %c2_105 = arith.constant 2 : index
    %c2_106 = arith.constant 2 : index
    %c0_107 = arith.constant 0 : index
    %75 = vector.load %arg9[%c0_104, %c2_105, %c2_106, %c0_107] : memref<2x10x10x4xbf16, #tpu.memory_space<vmem>>, vector<2x8x8x4xbf16>
    %76 = vector.shape_cast %75 : vector<2x8x8x4xbf16> to vector<128x4xbf16>
    %c8 = arith.constant 8 : index
    %c0_108 = arith.constant 0 : index
    %c0_109 = arith.constant 0 : index
    %77 = vector.load %arg2[%c8, %c0_108, %c0_109] : memref<9x4x8xbf16, #tpu.memory_space<vmem>>, vector<1x4x8xbf16>
    %78 = vector.shape_cast %77 : vector<1x4x8xbf16> to vector<4x8xbf16>
    %cst_110 = arith.constant dense<0.000000e+00> : vector<128x8xf32>
    %79 = tpu.matmul %76, %78, %cst_110 {dimension_numbers = #tpu.dot_dimension_numbers<[1], [0], [0], [1], [0, 0, 1, 1], [], []>} : vector<128x4xbf16>, vector<4x8xbf16>, vector<128x8xf32> -> vector<128x8xf32>
    %80 = arith.addf %74, %79 : vector<128x8xf32>
    %c0_111 = arith.constant 0 : index
    %c0_112 = arith.constant 0 : index
    %81 = vector.load %arg3[%c0_111, %c0_112] : memref<1x8xf32, #tpu.memory_space<vmem>>, vector<1x8xf32>
    %82 = vector.broadcast %81 : vector<1x8xf32> to vector<128x8xf32>
    %83 = arith.mulf %80, %82 : vector<128x8xf32>
    %c0_113 = arith.constant 0 : index
    %c0_114 = arith.constant 0 : index
    %84 = vector.load %arg4[%c0_113, %c0_114] : memref<1x8xf32, #tpu.memory_space<vmem>>, vector<1x8xf32>
    %85 = vector.broadcast %84 : vector<1x8xf32> to vector<128x8xf32>
    %86 = arith.addf %83, %85 : vector<128x8xf32>
    %cst_115 = arith.constant 0.000000e+00 : f32
    %87 = vector.broadcast %cst_115 : f32 to vector<128x8xf32>
    %88 = arith.maximumf %86, %87 : vector<128x8xf32>
    %89 = arith.truncf %88 : vector<128x8xf32> to vector<128x8xbf16>
    %90 = vector.shape_cast %89 : vector<128x8xbf16> to vector<2x8x8x8xbf16>
    %c0_116 = arith.constant 0 : index
    %c1_117 = arith.constant 1 : index
    %c1_118 = arith.constant 1 : index
    %c0_119 = arith.constant 0 : index
    %91 = vector.load %arg10[%c0_116, %c1_117, %c1_118, %c0_119] : memref<2x10x10x8xbf16, #tpu.memory_space<vmem>>, vector<2x8x8x8xbf16>
    tpu.vector_store %arg10[%c0_116, %c1_117, %c1_118, %c0_119], %90 {strides = array<i32>} : memref<2x10x10x8xbf16, #tpu.memory_space<vmem>>, vector<2x8x8x8xbf16>,
    %cst_120 = arith.constant 0.000000e+00 : f32
    %92 = vector.broadcast %cst_120 : f32 to vector<128x8xf32>
    %c0_121 = arith.constant 0 : index
    %c0_122 = arith.constant 0 : index
    %c0_123 = arith.constant 0 : index
    %c0_124 = arith.constant 0 : index
    %93 = vector.load %arg10[%c0_121, %c0_122, %c0_123, %c0_124] : memref<2x10x10x8xbf16, #tpu.memory_space<vmem>>, vector<2x8x8x8xbf16>
    %94 = vector.shape_cast %93 : vector<2x8x8x8xbf16> to vector<128x8xbf16>
    %c0_125 = arith.constant 0 : index
    %c0_126 = arith.constant 0 : index
    %c0_127 = arith.constant 0 : index
    %95 = vector.load %arg5[%c0_125, %c0_126, %c0_127] : memref<9x8x8xbf16, #tpu.memory_space<vmem>>, vector<1x8x8xbf16>
    %96 = vector.shape_cast %95 : vector<1x8x8xbf16> to vector<8x8xbf16>
    %cst_128 = arith.constant dense<0.000000e+00> : vector<128x8xf32>
    %97 = tpu.matmul %94, %96, %cst_128 {dimension_numbers = #tpu.dot_dimension_numbers<[1], [0], [0], [1], [0, 0, 1, 1], [], []>} : vector<128x8xbf16>, vector<8x8xbf16>, vector<128x8xf32> -> vector<128x8xf32>
    %98 = arith.addf %92, %97 : vector<128x8xf32>
    %c0_129 = arith.constant 0 : index
    %c0_130 = arith.constant 0 : index
    %c1_131 = arith.constant 1 : index
    %c0_132 = arith.constant 0 : index
    %99 = vector.load %arg10[%c0_129, %c0_130, %c1_131, %c0_132] : memref<2x10x10x8xbf16, #tpu.memory_space<vmem>>, vector<2x8x8x8xbf16>
    %100 = vector.shape_cast %99 : vector<2x8x8x8xbf16> to vector<128x8xbf16>
    %c1_133 = arith.constant 1 : index
    %c0_134 = arith.constant 0 : index
    %c0_135 = arith.constant 0 : index
    %101 = vector.load %arg5[%c1_133, %c0_134, %c0_135] : memref<9x8x8xbf16, #tpu.memory_space<vmem>>, vector<1x8x8xbf16>
    %102 = vector.shape_cast %101 : vector<1x8x8xbf16> to vector<8x8xbf16>
    %cst_136 = arith.constant dense<0.000000e+00> : vector<128x8xf32>
    %103 = tpu.matmul %100, %102, %cst_136 {dimension_numbers = #tpu.dot_dimension_numbers<[1], [0], [0], [1], [0, 0, 1, 1], [], []>} : vector<128x8xbf16>, vector<8x8xbf16>, vector<128x8xf32> -> vector<128x8xf32>
    %104 = arith.addf %98, %103 : vector<128x8xf32>
    %c0_137 = arith.constant 0 : index
    %c0_138 = arith.constant 0 : index
    %c2_139 = arith.constant 2 : index
    %c0_140 = arith.constant 0 : index
    %105 = vector.load %arg10[%c0_137, %c0_138, %c2_139, %c0_140] : memref<2x10x10x8xbf16, #tpu.memory_space<vmem>>, vector<2x8x8x8xbf16>
    %106 = vector.shape_cast %105 : vector<2x8x8x8xbf16> to vector<128x8xbf16>
    %c2_141 = arith.constant 2 : index
    %c0_142 = arith.constant 0 : index
    %c0_143 = arith.constant 0 : index
    %107 = vector.load %arg5[%c2_141, %c0_142, %c0_143] : memref<9x8x8xbf16, #tpu.memory_space<vmem>>, vector<1x8x8xbf16>
    %108 = vector.shape_cast %107 : vector<1x8x8xbf16> to vector<8x8xbf16>
    %cst_144 = arith.constant dense<0.000000e+00> : vector<128x8xf32>
    %109 = tpu.matmul %106, %108, %cst_144 {dimension_numbers = #tpu.dot_dimension_numbers<[1], [0], [0], [1], [0, 0, 1, 1], [], []>} : vector<128x8xbf16>, vector<8x8xbf16>, vector<128x8xf32> -> vector<128x8xf32>
    %110 = arith.addf %104, %109 : vector<128x8xf32>
    %c0_145 = arith.constant 0 : index
    %c1_146 = arith.constant 1 : index
    %c0_147 = arith.constant 0 : index
    %c0_148 = arith.constant 0 : index
    %111 = vector.load %arg10[%c0_145, %c1_146, %c0_147, %c0_148] : memref<2x10x10x8xbf16, #tpu.memory_space<vmem>>, vector<2x8x8x8xbf16>
    %112 = vector.shape_cast %111 : vector<2x8x8x8xbf16> to vector<128x8xbf16>
    %c3_149 = arith.constant 3 : index
    %c0_150 = arith.constant 0 : index
    %c0_151 = arith.constant 0 : index
    %113 = vector.load %arg5[%c3_149, %c0_150, %c0_151] : memref<9x8x8xbf16, #tpu.memory_space<vmem>>, vector<1x8x8xbf16>
    %114 = vector.shape_cast %113 : vector<1x8x8xbf16> to vector<8x8xbf16>
    %cst_152 = arith.constant dense<0.000000e+00> : vector<128x8xf32>
    %115 = tpu.matmul %112, %114, %cst_152 {dimension_numbers = #tpu.dot_dimension_numbers<[1], [0], [0], [1], [0, 0, 1, 1], [], []>} : vector<128x8xbf16>, vector<8x8xbf16>, vector<128x8xf32> -> vector<128x8xf32>
    %116 = arith.addf %110, %115 : vector<128x8xf32>
    %c0_153 = arith.constant 0 : index
    %c1_154 = arith.constant 1 : index
    %c1_155 = arith.constant 1 : index
    %c0_156 = arith.constant 0 : index
    %117 = vector.load %arg10[%c0_153, %c1_154, %c1_155, %c0_156] : memref<2x10x10x8xbf16, #tpu.memory_space<vmem>>, vector<2x8x8x8xbf16>
    %118 = vector.shape_cast %117 : vector<2x8x8x8xbf16> to vector<128x8xbf16>
    %c4_157 = arith.constant 4 : index
    %c0_158 = arith.constant 0 : index
    %c0_159 = arith.constant 0 : index
    %119 = vector.load %arg5[%c4_157, %c0_158, %c0_159] : memref<9x8x8xbf16, #tpu.memory_space<vmem>>, vector<1x8x8xbf16>
    %120 = vector.shape_cast %119 : vector<1x8x8xbf16> to vector<8x8xbf16>
    %cst_160 = arith.constant dense<0.000000e+00> : vector<128x8xf32>
    %121 = tpu.matmul %118, %120, %cst_160 {dimension_numbers = #tpu.dot_dimension_numbers<[1], [0], [0], [1], [0, 0, 1, 1], [], []>} : vector<128x8xbf16>, vector<8x8xbf16>, vector<128x8xf32> -> vector<128x8xf32>
    %122 = arith.addf %116, %121 : vector<128x8xf32>
    %c0_161 = arith.constant 0 : index
    %c1_162 = arith.constant 1 : index
    %c2_163 = arith.constant 2 : index
    %c0_164 = arith.constant 0 : index
    %123 = vector.load %arg10[%c0_161, %c1_162, %c2_163, %c0_164] : memref<2x10x10x8xbf16, #tpu.memory_space<vmem>>, vector<2x8x8x8xbf16>
    %124 = vector.shape_cast %123 : vector<2x8x8x8xbf16> to vector<128x8xbf16>
    %c5_165 = arith.constant 5 : index
    %c0_166 = arith.constant 0 : index
    %c0_167 = arith.constant 0 : index
    %125 = vector.load %arg5[%c5_165, %c0_166, %c0_167] : memref<9x8x8xbf16, #tpu.memory_space<vmem>>, vector<1x8x8xbf16>
    %126 = vector.shape_cast %125 : vector<1x8x8xbf16> to vector<8x8xbf16>
    %cst_168 = arith.constant dense<0.000000e+00> : vector<128x8xf32>
    %127 = tpu.matmul %124, %126, %cst_168 {dimension_numbers = #tpu.dot_dimension_numbers<[1], [0], [0], [1], [0, 0, 1, 1], [], []>} : vector<128x8xbf16>, vector<8x8xbf16>, vector<128x8xf32> -> vector<128x8xf32>
    %128 = arith.addf %122, %127 : vector<128x8xf32>
    %c0_169 = arith.constant 0 : index
    %c2_170 = arith.constant 2 : index
    %c0_171 = arith.constant 0 : index
    %c0_172 = arith.constant 0 : index
    %129 = vector.load %arg10[%c0_169, %c2_170, %c0_171, %c0_172] : memref<2x10x10x8xbf16, #tpu.memory_space<vmem>>, vector<2x8x8x8xbf16>
    %130 = vector.shape_cast %129 : vector<2x8x8x8xbf16> to vector<128x8xbf16>
    %c6_173 = arith.constant 6 : index
    %c0_174 = arith.constant 0 : index
    %c0_175 = arith.constant 0 : index
    %131 = vector.load %arg5[%c6_173, %c0_174, %c0_175] : memref<9x8x8xbf16, #tpu.memory_space<vmem>>, vector<1x8x8xbf16>
    %132 = vector.shape_cast %131 : vector<1x8x8xbf16> to vector<8x8xbf16>
    %cst_176 = arith.constant dense<0.000000e+00> : vector<128x8xf32>
    %133 = tpu.matmul %130, %132, %cst_176 {dimension_numbers = #tpu.dot_dimension_numbers<[1], [0], [0], [1], [0, 0, 1, 1], [], []>} : vector<128x8xbf16>, vector<8x8xbf16>, vector<128x8xf32> -> vector<128x8xf32>
    %134 = arith.addf %128, %133 : vector<128x8xf32>
    %c0_177 = arith.constant 0 : index
    %c2_178 = arith.constant 2 : index
    %c1_179 = arith.constant 1 : index
    %c0_180 = arith.constant 0 : index
    %135 = vector.load %arg10[%c0_177, %c2_178, %c1_179, %c0_180] : memref<2x10x10x8xbf16, #tpu.memory_space<vmem>>, vector<2x8x8x8xbf16>
    %136 = vector.shape_cast %135 : vector<2x8x8x8xbf16> to vector<128x8xbf16>
    %c7_181 = arith.constant 7 : index
    %c0_182 = arith.constant 0 : index
    %c0_183 = arith.constant 0 : index
    %137 = vector.load %arg5[%c7_181, %c0_182, %c0_183] : memref<9x8x8xbf16, #tpu.memory_space<vmem>>, vector<1x8x8xbf16>
    %138 = vector.shape_cast %137 : vector<1x8x8xbf16> to vector<8x8xbf16>
    %cst_184 = arith.constant dense<0.000000e+00> : vector<128x8xf32>
    %139 = tpu.matmul %136, %138, %cst_184 {dimension_numbers = #tpu.dot_dimension_numbers<[1], [0], [0], [1], [0, 0, 1, 1], [], []>} : vector<128x8xbf16>, vector<8x8xbf16>, vector<128x8xf32> -> vector<128x8xf32>
    %140 = arith.addf %134, %139 : vector<128x8xf32>
    %c0_185 = arith.constant 0 : index
    %c2_186 = arith.constant 2 : index
    %c2_187 = arith.constant 2 : index
    %c0_188 = arith.constant 0 : index
    %141 = vector.load %arg10[%c0_185, %c2_186, %c2_187, %c0_188] : memref<2x10x10x8xbf16, #tpu.memory_space<vmem>>, vector<2x8x8x8xbf16>
    %142 = vector.shape_cast %141 : vector<2x8x8x8xbf16> to vector<128x8xbf16>
    %c8_189 = arith.constant 8 : index
    %c0_190 = arith.constant 0 : index
    %c0_191 = arith.constant 0 : index
    %143 = vector.load %arg5[%c8_189, %c0_190, %c0_191] : memref<9x8x8xbf16, #tpu.memory_space<vmem>>, vector<1x8x8xbf16>
    %144 = vector.shape_cast %143 : vector<1x8x8xbf16> to vector<8x8xbf16>
    %cst_192 = arith.constant dense<0.000000e+00> : vector<128x8xf32>
    %145 = tpu.matmul %142, %144, %cst_192 {dimension_numbers = #tpu.dot_dimension_numbers<[1], [0], [0], [1], [0, 0, 1, 1], [], []>} : vector<128x8xbf16>, vector<8x8xbf16>, vector<128x8xf32> -> vector<128x8xf32>
    %146 = arith.addf %140, %145 : vector<128x8xf32>
    %c0_193 = arith.constant 0 : index
    %c0_194 = arith.constant 0 : index
    %147 = vector.load %arg6[%c0_193, %c0_194] : memref<1x8xf32, #tpu.memory_space<vmem>>, vector<1x8xf32>
    %148 = vector.broadcast %147 : vector<1x8xf32> to vector<128x8xf32>
    %149 = arith.mulf %146, %148 : vector<128x8xf32>
    %c0_195 = arith.constant 0 : index
    %c0_196 = arith.constant 0 : index
    %150 = vector.load %arg7[%c0_195, %c0_196] : memref<1x8xf32, #tpu.memory_space<vmem>>, vector<1x8xf32>
    %151 = vector.broadcast %150 : vector<1x8xf32> to vector<128x8xf32>
    %152 = arith.addf %149, %151 : vector<128x8xf32>
    %cst_197 = arith.constant 0.000000e+00 : f32
    %153 = vector.broadcast %cst_197 : f32 to vector<128x8xf32>
    %154 = arith.maximumf %152, %153 : vector<128x8xf32>
    %155 = vector.shape_cast %154 : vector<128x8xf32> to vector<2x8x8x8xf32>
    %c0_198 = arith.constant 0 : index
    %c0_199 = arith.constant 0 : index
    %c0_200 = arith.constant 0 : index
    %c0_201 = arith.constant 0 : index
    %156 = vector.load %arg8[%c0_198, %c0_199, %c0_200, %c0_201] : memref<2x8x8x8xf32, #tpu.memory_space<vmem>>, vector<2x8x8x8xf32>
    tpu.vector_store %arg8[%c0_198, %c0_199, %c0_200, %c0_201], %155 {strides = array<i32>} : memref<2x8x8x8xf32, #tpu.memory_space<vmem>>, vector<2x8x8x8xf32>,
    return
  }
  func.func @transform_0(%arg0: i32) -> (i32, i32, i32, i32, i32) {
    %c0_i32 = arith.constant 0 : i32
    %c0_i32_0 = arith.constant 0 : i32
    %c0_i32_1 = arith.constant 0 : i32
    %c0_i32_2 = arith.constant 0 : i32
    %c0_i32_3 = arith.constant 0 : i32
    return %arg0, %c0_i32, %c0_i32_0, %c0_i32_1, %c0_i32_2 : i32, i32, i32, i32, i32
  }
  func.func @transform_1(%arg0: i32) -> (i32, i32, i32) {
    %c0_i32 = arith.constant 0 : i32
    %c0_i32_0 = arith.constant 0 : i32
    %c0_i32_1 = arith.constant 0 : i32
    %c0_i32_2 = arith.constant 0 : i32
    return %c0_i32, %c0_i32_0, %c0_i32_1 : i32, i32, i32
  }
  func.func @transform_2(%arg0: i32) -> (i32, i32) {
    %c0_i32 = arith.constant 0 : i32
    %c0_i32_0 = arith.constant 0 : i32
    %c0_i32_1 = arith.constant 0 : i32
    return %c0_i32, %c0_i32_0 : i32, i32
  }
  func.func @transform_3(%arg0: i32) -> (i32, i32) {
    %c0_i32 = arith.constant 0 : i32
    %c0_i32_0 = arith.constant 0 : i32
    %c0_i32_1 = arith.constant 0 : i32
    return %c0_i32, %c0_i32_0 : i32, i32
  }
  func.func @transform_4(%arg0: i32) -> (i32, i32, i32) {
    %c0_i32 = arith.constant 0 : i32
    %c0_i32_0 = arith.constant 0 : i32
    %c0_i32_1 = arith.constant 0 : i32
    %c0_i32_2 = arith.constant 0 : i32
    return %c0_i32, %c0_i32_0, %c0_i32_1 : i32, i32, i32
  }
  func.func @transform_5(%arg0: i32) -> (i32, i32) {
    %c0_i32 = arith.constant 0 : i32
    %c0_i32_0 = arith.constant 0 : i32
    %c0_i32_1 = arith.constant 0 : i32
    return %c0_i32, %c0_i32_0 : i32, i32
  }
  func.func @transform_6(%arg0: i32) -> (i32, i32) {
    %c0_i32 = arith.constant 0 : i32
    %c0_i32_0 = arith.constant 0 : i32
    %c0_i32_1 = arith.constant 0 : i32
    return %c0_i32, %c0_i32_0 : i32, i32
  }
  func.func @transform_7(%arg0: i32) -> (i32, i32, i32, i32) {
    %c0_i32 = arith.constant 0 : i32
    %c0_i32_0 = arith.constant 0 : i32
    %c0_i32_1 = arith.constant 0 : i32
    %c0_i32_2 = arith.constant 0 : i32
    return %arg0, %c0_i32, %c0_i32_0, %c0_i32_1 : i32, i32, i32, i32
  }
}

</mosaic_0001>

<bundles_post_ra>
// kernel: tpu_custom_call.1
= control target key start
LH: loop header
LB: loop body
LE: loop exit
PB: predicated region body
PF: predicated region fallthrough
CT: control target
= control target key end

     0   :  { %12 = vsyncpa [#allocation5], 0  ;;  %s9855_s0 = inlined_call_operand.hbm [shape: bf16[2,8,2,8,8], index: 0, kind: input, shape index: {}]   ;;  %s9856_s1 = inlined_call_operand.vmem [shape: bf16[9,4,8], index: 1, kind: input, shape index: {}]   ;;  %s9857_s2 = inlined_call_operand.vmem [shape: f32[1,8], index: 2, kind: input, shape index: {}]   ;;  %s9858_s3 = inlined_call_operand.vmem [shape: f32[1,8], index: 3, kind: input, shape index: {}]   ;;  %s9859_s4 = inlined_call_operand.vmem [shape: bf16[9,8,8], index: 4, kind: input, shape index: {}]   ;;  %s9860_s5 = inlined_call_operand.vmem [shape: f32[1,8], index: 5, kind: input, shape index: {}]   ;;  %s9861_s6 = inlined_call_operand.vmem [shape: f32[1,8], index: 6, kind: input, shape index: {}]   ;;  %s9862_s7 = inlined_call_operand.hbm [shape: f32[2,8,8,8], index: 7, kind: output, shape index: {}]  }
   0x1   :  { %13 = vsyncpa [#allocation6], 0  ;;  %s7847_s24 = smov [#allocation4]   ;;  %s7799_s28 = scalar_lea.hbm %s9855_s0, 2048 }
   0x2   :  { %s19_s25 = sshll.u32 %s7847_s24, 4  ;;  %p7800_p0 = scmp.ne.s32.totalorder %s9855_s0, %s7799_s28  ;;  %s20_s25 = int_to_ptr.vmem [resolvable:$true] %s19_s25 }
   0x3   :  { %p7803_p1 = scmp.lt.u32.totalorder %s7799_s28, %s9855_s0 }
   0x5   :  { %p7805_p2 = pnand %p7803_p1, %p7800_p0 }
   0x7   :  { %7808 = shalt.err (!%p7805_p2)
}
   0x8   :  { %s7809_s10 = scalar_lea.vmem %s20_s25, 2048  ;;  %p7814_p4 = scmp.lt.s32.totalorder %s20_s25, %s20_s25 }
   0x9   :  { %p7810_p3 = scmp.ne.s32.totalorder %s20_s25, %s7809_s10  ;;  %p7815_p5 = scmp.lt.s32.totalorder %s7809_s10, %s7809_s10 }
   0xb   :  { %p7816_p6 = por %p7815_p5, %p7814_p4 }
   0xd   :  { %p7817_p7 = pnand %p7816_p6, %p7810_p3 }
   0xf   :  { %7820 = shalt.err (!%p7817_p7)
}
  0x10   :  { %s7848_s11 = smov 64   ;;  %s7849_s12 = smov 4  }
  0x11   :  { %25 = dma.hbm_to_vmem [thread:$0]  %s9855_s0, 2048, %s20_s25, [#allocation5], %s7848_s11, %s7848_s11, %s7849_s12  }
  0x12   :  { %7843 = dma.done.wait [#allocation5], 2048  }
  0x13   :  { %7844 = vsyncadd [#allocation5], 4294965248  ;;  %vm42_vm0 = vcmask 27648   ;;  %vm44_vm1 = vcmask 24576   ;;  %v7850_v0 = vmov 0   ;;  %s7851_s0 = smov 124  }
  0x14   :  { %43 = vst.msk [vmem:[#allocation2] sm:$0xf] %vm42_vm0, %v7850_v0  ;;  %46 = vst.msk [vmem:[#allocation2 + $0x50] sm:$0xf] %vm42_vm0, %v7850_v0  ;;  %v7923_v1 = vld [vmem:[#allocation4 + $0x8] sm:$0xf] }
  0x15   :  { %45 = vst.msk [vmem:[#allocation2 + $0x4] sm:$0x1] %vm44_vm1, %v7850_v0  ;;  %47 = vst.msk [vmem:[#allocation2 + $0x54] sm:$0x1] %vm44_vm1, %v7850_v0  ;;  %v7925_v2 = vld [vmem:[#allocation4] sm:$0xf]  ;;  %380 = vrot.lane.b32.xlu1 %v7923_v1, %s7851_s0 }
  0x16   :  { %49 = vst.msk [vmem:[#allocation2 + $0x48] sm:$0xf] %vm42_vm0, %v7850_v0  ;;  %51 = vst.msk [vmem:[#allocation2 + $0x98] sm:$0xf] %vm42_vm0, %v7850_v0  ;;  %376 = vrot.lane.b32.xlu0 %v7925_v2, %s7851_s0  ;;  %v7931_v3 = vld [vmem:[#allocation4 + $0xc] sm:$0xf] }
  0x17   :  { %50 = vst.msk [vmem:[#allocation2 + $0x4c] sm:$0x1] %vm44_vm1, %v7850_v0  ;;  %52 = vst.msk [vmem:[#allocation2 + $0x9c] sm:$0x1] %vm44_vm1, %v7850_v0  ;;  %v7933_v4 = vld [vmem:[#allocation4 + $0x4] sm:$0xf] }
  0x18   :  { %vm54_vm2 = vsmask.f32 256  ;;  %v7939_v5 = vld [vmem:[#allocation4 + $0x14] sm:$0xf]  ;;  %v7941_v6 = vld [vmem:[#allocation4 + $0x10] sm:$0xf] }
  0x19   :  { %382 = vrot.lane.b32.xlu1 %v7931_v3, %s7851_s0  ;;  %vm116_vm3 = vsmask.f32 7938  ;;  %vm7945_vm4 = vmand %vm44_vm1, %vm54_vm2  ;;  %v7959_v9 = vld [vmem:[#allocation4 + $0x1c] sm:$0xf]  ;;  %v7961_v10 = vld [vmem:[#allocation4 + $0x18] sm:$0xf] }
  0x1a   :  { %378 = vrot.lane.b32.xlu0 %v7933_v4, %s7851_s0  ;;  %vm7955_vm5 = vmand %vm44_vm1, %vm116_vm3  ;;  %v62_v11 = vld [vmem:[#allocation2 + $0x10] sm:$0x1]  ;;  %v124_v13 = vld [vmem:[#allocation2 + $0x14] sm:$0x1]  ;;  %vm1090_vm6 = vcmask 1041408   ;;  %vm1065_vm11 = vcmask 31744  }
  0x1b   :  { %v63_v12 = vsel %vm7945_vm4, 0, %v62_v11  ;;  %v59_v14 = vld [vmem:[#allocation2 + $0x8] sm:$0x1]  ;;  %v7965_v15 = vld [vmem:[#allocation4 + $0x24] sm:$0xf]  ;;  %v125_v17 = vsel %vm7955_vm5, 0, %v124_v13  ;;  %vm8161_vm8 = vmand %vm42_vm0, %vm116_vm3 }
  0x1c   :  { %v7967_v16 = vld [vmem:[#allocation4 + $0x20] sm:$0xf]  ;;  %64 = vst [vmem:[#allocation2 + $0x10] sm:$0x1] %v63_v12  ;;  %v60_v18 = vsel %vm7945_vm4, 0, %v59_v14  ;;  %vm1403_vm12 = vcmask 1042432  }
  0x1d   :  { %386 = vrot.lane.b32.xlu1 %v7939_v5, %s7851_s0  ;;  %v121_v19 = vld [vmem:[#allocation2 + $0xc] sm:$0x1]  ;;  %v65_v20 = vld [vmem:[#allocation2 + $0x18] sm:$0x1]  ;;  %126 = vst [vmem:[#allocation2 + $0x14] sm:$0x1] %v125_v17 }
  0x1e   :  { %384 = vrot.lane.b32.xlu0 %v7941_v6, %s7851_s0  ;;  %61 = vst [vmem:[#allocation2 + $0x8] sm:$0x1] %v60_v18  ;;  %v122_v21 = vsel %vm7955_vm5, 0, %v121_v19  ;;  %v66_v22 = vsel %vm7945_vm4, 0, %v65_v20  ;;  %v127_v23 = vld [vmem:[#allocation2 + $0x1c] sm:$0x1] }
  0x1f   :  { %v68_v24 = vld [vmem:[#allocation2 + $0x20] sm:$0x1]  ;;  %123 = vst [vmem:[#allocation2 + $0xc] sm:$0x1] %v122_v21  ;;  %67 = vst [vmem:[#allocation2 + $0x18] sm:$0x1] %v66_v22 }
  0x20   :  { %v128_v25 = vsel %vm7955_vm5, 0, %v127_v23  ;;  %v69_v26 = vsel %vm7945_vm4, 0, %v68_v24  ;;  %v130_v27 = vld [vmem:[#allocation2 + $0x24] sm:$0x1]  ;;  %v71_v28 = vld [vmem:[#allocation2 + $0x28] sm:$0x1] }
  0x21   :  { %390 = vrot.lane.b32.xlu1 %v7959_v9, %s7851_s0  ;;  %129 = vst [vmem:[#allocation2 + $0x1c] sm:$0x1] %v128_v25  ;;  %70 = vst [vmem:[#allocation2 + $0x20] sm:$0x1] %v69_v26  ;;  %v131_v29 = vsel %vm7955_vm5, 0, %v130_v27  ;;  %v72_v30 = vsel %vm7945_vm4, 0, %v71_v28 }
  0x22   :  { %388 = vrot.lane.b32.xlu0 %v7961_v10, %s7851_s0  ;;  %v133_v31 = vld [vmem:[#allocation2 + $0x2c] sm:$0x1]  ;;  %v74_v32 = vld [vmem:[#allocation2 + $0x30] sm:$0x1]  ;;  %v7991_v34 = vld [vmem:[#allocation4 + $0x28] sm:$0xf] }
  0x23   :  { %v7989_v33 = vld [vmem:[#allocation4 + $0x2c] sm:$0xf]  ;;  %132 = vst [vmem:[#allocation2 + $0x24] sm:$0x1] %v131_v29  ;;  %73 = vst [vmem:[#allocation2 + $0x28] sm:$0x1] %v72_v30 }
  0x24   :  { %v134_v35 = vsel %vm7955_vm5, 0, %v133_v31  ;;  %v75_v36 = vsel %vm7945_vm4, 0, %v74_v32  ;;  %v136_v37 = vld [vmem:[#allocation2 + $0x34] sm:$0x1]  ;;  %v77_v38 = vld [vmem:[#allocation2 + $0x38] sm:$0x1] }
  0x25   :  { %394 = vrot.lane.b32.xlu1 %v7965_v15, %s7851_s0  ;;  %135 = vst [vmem:[#allocation2 + $0x2c] sm:$0x1] %v134_v35  ;;  %76 = vst [vmem:[#allocation2 + $0x30] sm:$0x1] %v75_v36  ;;  %v137_v39 = vsel %vm7955_vm5, 0, %v136_v37  ;;  %v78_v40 = vsel %vm7945_vm4, 0, %v77_v38 }
  0x26   :  { %392 = vrot.lane.b32.xlu0 %v7967_v16, %s7851_s0  ;;  %v139_v41 = vld [vmem:[#allocation2 + $0x3c] sm:$0x1]  ;;  %v89_v42 = vld [vmem:[#allocation2 + $0x58] sm:$0x1]  ;;  %138 = vst [vmem:[#allocation2 + $0x34] sm:$0x1] %v137_v39 }
  0x27   :  { %79 = vst [vmem:[#allocation2 + $0x38] sm:$0x1] %v78_v40  ;;  %v140_v43 = vsel %vm7955_vm5, 0, %v139_v41  ;;  %v90_v44 = vsel %vm7945_vm4, 0, %v89_v42  ;;  %v151_v45 = vld [vmem:[#allocation2 + $0x5c] sm:$0x1] }
  0x28   :  { %v56_v46 = vld [vmem:[#allocation2] sm:$0x1]  ;;  %141 = vst [vmem:[#allocation2 + $0x3c] sm:$0x1] %v140_v43  ;;  %91 = vst [vmem:[#allocation2 + $0x58] sm:$0x1] %v90_v44 }
  0x29   :  { %v152_v47 = vsel %vm7955_vm5, 0, %v151_v45  ;;  %v57_v48 = vsel %vm7945_vm4, 0, %v56_v46  ;;  %v118_v49 = vld [vmem:[#allocation2 + $0x4] sm:$0x1]  ;;  %398 = vrot.lane.b32.xlu1 %v7989_v33, %s7851_s0  ;;  %v92_v51 = vld [vmem:[#allocation2 + $0x60] sm:$0x1] }
  0x2a   :  { %153 = vst [vmem:[#allocation2 + $0x5c] sm:$0x1] %v152_v47  ;;  %58 = vst [vmem:[#allocation2] sm:$0x1] %v57_v48  ;;  %v119_v50 = vsel %vm7955_vm5, 0, %v118_v49  ;;  %396 = vrot.lane.b32.xlu0 %v7991_v34, %s7851_s0  ;;  %v93_v54 = vsel %vm7945_vm4, 0, %v92_v51 }
  0x2b   :  { %120 = vst [vmem:[#allocation2 + $0x4] sm:$0x1] %v119_v50  ;;  %v8019_v52 = vld [vmem:[#allocation4 + $0x34] sm:$0xf]  ;;  %v8021_v53 = vld [vmem:[#allocation4 + $0x30] sm:$0xf] }
  0x2c   :  { %94 = vst [vmem:[#allocation2 + $0x60] sm:$0x1] %v93_v54  ;;  %v154_v55 = vld [vmem:[#allocation2 + $0x64] sm:$0x1]  ;;  %v6545_v57 = vld [vmem:[%s9856_s1 + $0x2] sm:$0x3] }
  0x2d   :  { %v155_v56 = vsel %vm7955_vm5, 0, %v154_v55  ;;  %402 = vrot.lane.b32.xlu1 %v8019_v52, %s7851_s0  ;;  %v8034_v58 = vld [vmem:[#allocation4 + $0x44] sm:$0xf]  ;;  %v8036_v59 = vld [vmem:[#allocation4 + $0x40] sm:$0xf]  ;;  %7723 = vmatprep.subr.msk.bf16.mxu0 %vm1090_vm6, %v6545_v57  ;;  %v1092_v60 = vsel %vm1090_vm6, %v6545_v57, 0 }
  0x2e   :  { %400 = vrot.lane.b32.xlu0 %v8021_v53, %s7851_s0  ;;  %156 = vst [vmem:[#allocation2 + $0x64] sm:$0x1] %v155_v56  ;;  %v95_v61 = vld [vmem:[#allocation2 + $0x68] sm:$0x1]  ;;  %v157_v62 = vld [vmem:[#allocation2 + $0x6c] sm:$0x1]  ;;  %7144 = vmatpush3.bf16.msra.mxu0 %v1092_v60 }
  0x2f   :  { %v8044_v63 = vld [vmem:[#allocation4 + $0x4c] sm:$0xf]  ;;  %v8046_v11 = vld [vmem:[#allocation4 + $0x48] sm:$0xf]  ;;  %v96_v12 = vsel %vm7945_vm4, 0, %v95_v61  ;;  %v158_v13 = vsel %vm7955_vm5, 0, %v157_v62 }
  0x30   :  { %97 = vst [vmem:[#allocation2 + $0x68] sm:$0x1] %v96_v12  ;;  %159 = vst [vmem:[#allocation2 + $0x6c] sm:$0x1] %v158_v13  ;;  %v8056_v14 = vld [vmem:[#allocation4 + $0x54] sm:$0xf] }
  0x31   :  { %410 = vrot.lane.b32.xlu1 %v8034_v58, %s7851_s0  ;;  %v8058_v17 = vld [vmem:[#allocation4 + $0x50] sm:$0xf]  ;;  %v160_v19 = vld [vmem:[#allocation2 + $0x74] sm:$0x1]  ;;  %v8068_v22 = vld [vmem:[#allocation4 + $0x5c] sm:$0xf] }
  0x32   :  { %408 = vrot.lane.b32.xlu0 %v8036_v59, %s7851_s0  ;;  %v98_v18 = vld [vmem:[#allocation2 + $0x70] sm:$0x1]  ;;  %v161_v21 = vsel %vm7955_vm5, 0, %v160_v19  ;;  %v8070_v23 = vld [vmem:[#allocation4 + $0x58] sm:$0xf]  ;;  %vm1404_vm13 = vcmask 1046532  }
  0x33   :  { %v99_v20 = vsel %vm7945_vm4, 0, %v98_v18  ;;  %162 = vst [vmem:[#allocation2 + $0x74] sm:$0x1] %v161_v21  ;;  %v8072_v24 = vld [vmem:[#allocation4 + $0x64] sm:$0xf]  ;;  %vm8385_vm14 = vmor %vm1403_vm12, %vm1404_vm13  ;;  %vm178_vm15 = vcmask 60416  }
  0x34   :  { %100 = vst [vmem:[#allocation2 + $0x70] sm:$0x1] %v99_v20  ;;  %v8078_v25 = vld [vmem:[#allocation4 + $0x60] sm:$0xf]  ;;  %v101_v26 = vld [vmem:[#allocation2 + $0x78] sm:$0x1] }
  0x35   :  { %414 = vrot.lane.b32.xlu1 %v8044_v63, %s7851_s0  ;;  %v163_v27 = vld [vmem:[#allocation2 + $0x7c] sm:$0x1]  ;;  %v102_v28 = vsel %vm7945_vm4, 0, %v101_v26  ;;  %v86_v30 = vld [vmem:[#allocation2 + $0x50] sm:$0x1]  ;;  %vm180_vm0 = vcmask 57344  }
  0x36   :  { %412 = vrot.lane.b32.xlu0 %v8046_v11, %s7851_s0  ;;  %v164_v29 = vsel %vm7955_vm5, 0, %v163_v27  ;;  %v148_v31 = vld [vmem:[#allocation2 + $0x54] sm:$0x1]  ;;  %103 = vst [vmem:[#allocation2 + $0x78] sm:$0x1] %v102_v28  ;;  %v87_v32 = vsel %vm7945_vm4, 0, %v86_v30  ;;  %vm8688_vm1 = vmand %vm180_vm0, %vm54_vm2 }
  0x37   :  { %165 = vst [vmem:[#allocation2 + $0x7c] sm:$0x1] %v164_v29  ;;  %v149_v35 = vsel %vm7955_vm5, 0, %v148_v31  ;;  %88 = vst [vmem:[#allocation2 + $0x50] sm:$0x1] %v87_v32 }
  0x38   :  { %150 = vst [vmem:[#allocation2 + $0x54] sm:$0x1] %v149_v35  ;;  %v8092_v36 = vld [vmem:[#allocation4 + $0x6c] sm:$0xf]  ;;  %v8094_v37 = vld [vmem:[#allocation4 + $0x68] sm:$0xf]  ;;  %vm8713_vm2 = vmand %vm180_vm0, %vm116_vm3 }
  0x39   :  { %418 = vrot.lane.b32.xlu1 %v8056_v14, %s7851_s0  ;;  %v104_v38 = vld [vmem:[#allocation2 + $0x80] sm:$0x1]  ;;  %v166_v39 = vld [vmem:[#allocation2 + $0x84] sm:$0x1]  ;;  %v8104_v42 = vld [vmem:[#allocation4 + $0x74] sm:$0xf] }
  0x3a   :  { %416 = vrot.lane.b32.xlu0 %v8058_v17, %s7851_s0  ;;  %v105_v40 = vsel %vm7945_vm4, 0, %v104_v38  ;;  %v167_v41 = vsel %vm7955_vm5, 0, %v166_v39  ;;  %v8106_v43 = vld [vmem:[#allocation4 + $0x70] sm:$0xf]  ;;  %v107_v44 = vld [vmem:[#allocation2 + $0x88] sm:$0x1] }
  0x3b   :  { %106 = vst [vmem:[#allocation2 + $0x80] sm:$0x1] %v105_v40  ;;  %168 = vst [vmem:[#allocation2 + $0x84] sm:$0x1] %v167_v41  ;;  %v108_v45 = vsel %vm7945_vm4, 0, %v107_v44 }
  0x3c   :  { %v169_v46 = vld [vmem:[#allocation2 + $0x8c] sm:$0x1]  ;;  %109 = vst [vmem:[#allocation2 + $0x88] sm:$0x1] %v108_v45  ;;  %v8116_v48 = vld [vmem:[#allocation4 + $0x3c] sm:$0xf] }
  0x3d   :  { %422 = vrot.lane.b32.xlu1 %v8068_v22, %s7851_s0  ;;  %v170_v47 = vsel %vm7955_vm5, 0, %v169_v46  ;;  %v8118_v49 = vld [vmem:[#allocation4 + $0x38] sm:$0xf]  ;;  %v8124_v50 = vld [vmem:[#allocation4 + $0x7c] sm:$0xf] }
  0x3e   :  { %420 = vrot.lane.b32.xlu0 %v8070_v23, %s7851_s0  ;;  %171 = vst [vmem:[#allocation2 + $0x8c] sm:$0x1] %v170_v47  ;;  %v80_v51 = vld [vmem:[#allocation2 + $0x40] sm:$0x1]  ;;  %v8126_v54 = vld [vmem:[#allocation4 + $0x78] sm:$0xf] }
  0x3f   :  { %v81_v55 = vsel %vm7945_vm4, 0, %v80_v51  ;;  %v142_v56 = vld [vmem:[#allocation2 + $0x44] sm:$0x1]  ;;  %v8135_v60 = vld [vmem:[%s9856_s1] sm:$0x3] }
  0x40   :  { %82 = vst [vmem:[#allocation2 + $0x40] sm:$0x1] %v81_v55  ;;  %v143_v57 = vsel %vm7955_vm5, 0, %v142_v56  ;;  %7724 = vmatprep.subr.msk.bf16.mxu0 %vm1090_vm6, %v8135_v60  ;;  %v110_v61 = vld [vmem:[#allocation2 + $0x90] sm:$0x1] }
  0x41   :  { %426 = vrot.lane.b32.xlu1 %v8072_v24, %s7851_s0  ;;  %144 = vst [vmem:[#allocation2 + $0x44] sm:$0x1] %v143_v57  ;;  %v172_v62 = vld [vmem:[#allocation2 + $0x94] sm:$0x1]  ;;  %v111_v12 = vsel %vm7945_vm4, 0, %v110_v61 }
  0x42   :  { %424 = vrot.lane.b32.xlu0 %v8078_v25, %s7851_s0  ;;  %v173_v13 = vsel %vm7955_vm5, 0, %v172_v62  ;;  %112 = vst [vmem:[#allocation2 + $0x90] sm:$0x1] %v111_v12  ;;  %v8147_v20 = vld [vmem:[#allocation2] sm:$0xf] }
  0x43   :  { %174 = vst [vmem:[#allocation2 + $0x94] sm:$0x1] %v173_v13  ;;  %v787_v21 = vld [vmem:[#allocation2 + $0x50] sm:$0xf]  ;;  %v816_v28 = vshrl.u32 %v8147_v20, 16  ;;  %v819_v29 = vshll.u32 %v8147_v20, 16 }
  0x44   :  { %v928_v30 = vshrl.u32 %v787_v21, 16  ;;  %v931_v31 = vshll.u32 %v787_v21, 16  ;;  %v689_v61 = vld [vmem:[#allocation2 + $0x10] sm:$0xf]  ;;  %v692_v62 = vld [vmem:[#allocation2 + $0x14] sm:$0x1] }
  0x45   :  { %430 = vrot.lane.b32.xlu1 %v8092_v36, %s7851_s0  ;;  %v818_v46 = vrot.slane %v816_v28, 4  ;;  %v821_v47 = vrot.slane %v819_v29, 5  ;;  %vm812_vm7 = vsmask.f32 3328  ;;  %v683_v21 = vld [vmem:[#allocation2 + $0x8] sm:$0xf] }
  0x46   :  { %428 = vrot.lane.b32.xlu0 %v8094_v37, %s7851_s0  ;;  %v930_v51 = vrot.slane %v928_v30, 4  ;;  %v933_v55 = vrot.slane %v931_v31, 5  ;;  %vm813_vm9 = vsmask.f32 7440  ;;  %179 = vst.msk [vmem:[#allocation3] sm:$0xf] %vm178_vm15, %v7850_v0 }
  0x47   :  { %v822_v29 = vor.u32 %v821_v47, %v818_v46  ;;  %vm8186_vm10 = vmor %vm812_vm7, %vm813_vm9  ;;  %181 = vst.msk [vmem:[#allocation3 + $0x4] sm:$0x1] %vm180_vm0, %v7850_v0 }
  0x48   :  { %v934_v30 = vor.u32 %v933_v55, %v930_v51  ;;  %182 = vst.msk [vmem:[#allocation3 + $0x50] sm:$0xf] %vm178_vm15, %v7850_v0  ;;  %185 = vst.msk [vmem:[#allocation3 + $0x48] sm:$0xf] %vm178_vm15, %v7850_v0 }
  0x49   :  { %434 = vrot.lane.b32.xlu1 %v8104_v42, %s7851_s0  ;;  %183 = vst.msk [vmem:[#allocation3 + $0x54] sm:$0x1] %vm180_vm0, %v7850_v0  ;;  %186 = vst.msk [vmem:[#allocation3 + $0x4c] sm:$0x1] %vm180_vm0, %v7850_v0 }
  0x4a   :  { %432 = vrot.lane.b32.xlu0 %v8106_v43, %s7851_s0  ;;  %187 = vst.msk [vmem:[#allocation3 + $0x98] sm:$0xf] %vm178_vm15, %v7850_v0 }
  0x4b   :  { %188 = vst.msk [vmem:[#allocation3 + $0x9c] sm:$0x1] %vm180_vm0, %v7850_v0 }
  0x4d   :  { %406 = vrot.lane.b32.xlu1 %v8116_v48, %s7851_s0 }
  0x4e   :  { %404 = vrot.lane.b32.xlu0 %v8118_v49, %s7851_s0 }
  0x51   :  { %438 = vrot.lane.b32.xlu1 %v8124_v50, %s7851_s0 }
  0x52   :  { %436 = vrot.lane.b32.xlu0 %v8126_v54, %s7851_s0 }
  0x87   :  { %v381_v18 = vpop.permute.xlu1 %380 }
  0x88   :  { %v377_v19 = vpop.permute.xlu0 %376  ;;  %v474_v32 = vmax.bf16 %v381_v18, %v7923_v1  ;;  %v8157_v18 = vld [vmem:[#allocation2 + $0x4] sm:$0x1] }
  0x89   :  { %v472_v35 = vmax.bf16 %v377_v19, %v7925_v2 }
  0x8b   :  { %v383_v26 = vpop.permute.xlu1 %382 }
  0x8c   :  { %v379_v27 = vpop.permute.xlu0 %378  ;;  %v475_v38 = vmax.bf16 %v383_v26, %v7931_v3  ;;  %v686_v26 = vld [vmem:[#allocation2 + $0xc] sm:$0x1] }
  0x8d   :  { %v473_v39 = vmax.bf16 %v379_v27, %v7933_v4 }
  0x8e   :  { %v505_v40 = vmax.bf16 %v475_v38, %v474_v32 }
  0x8f   :  { %v504_v41 = vmax.bf16 %v473_v39, %v472_v35  ;;  %v387_v44 = vpop.permute.xlu1 %386  ;;  %v8166_v39 = vld [vmem:[#allocation2 + $0x54] sm:$0x1] }
  0x90   :  { %v385_v45 = vpop.permute.xlu0 %384  ;;  %v529_v56 = vshrl.u32 %v505_v40, 16  ;;  %v477_v1 = vmax.bf16 %v387_v44, %v7939_v5  ;;  %v532_v12 = vshll.u32 %v505_v40, 16 }
  0x91   :  { %v521_v57 = vshrl.u32 %v504_v41, 16  ;;  %v476_v2 = vmax.bf16 %v385_v45, %v7941_v6  ;;  %v524_v13 = vshll.u32 %v504_v41, 16  ;;  %v825_v6 = vshll.u32 %v8157_v18, 16 }
  0x92   :  { %v531_v3 = vrot.slane %v529_v56, 7  ;;  %v937_v45 = vshll.u32 %v8166_v39, 16 }
  0x93   :  { %v523_v4 = vrot.slane %v521_v57, 7  ;;  %v506_v27 = vmax.bf16 %v477_v1, %v476_v2  ;;  %v391_v28 = vpop.permute.xlu1 %390  ;;  %v698_v2 = vld [vmem:[#allocation2 + $0x1c] sm:$0x1] }
  0x94   :  { %v389_v5 = vpop.permute.xlu0 %388  ;;  %v534_v31 = vor.u32 %v532_v12, %v531_v3  ;;  %v535_v32 = vrot.slane %v531_v3, 4  ;;  %v479_v41 = vmax.bf16 %v391_v28, %v7959_v9  ;;  %v8181_v12 = vrot.slane %v825_v6, 5 }
  0x95   :  { %v526_v35 = vor.u32 %v524_v13, %v523_v4  ;;  %v527_v38 = vrot.slane %v523_v4, 4  ;;  %v537_v40 = vshrl.u32 %v506_v27, 16  ;;  %v478_v44 = vmax.bf16 %v389_v5, %v7961_v10 }
  0x96   :  { %v690_v56 = vsel %vm8161_vm8, %v534_v31, %v689_v61  ;;  %v693_v46 = vsel %vm7945_vm4, %v535_v32, %v692_v62  ;;  %v540_v10 = vshll.u32 %v506_v27, 16  ;;  %v695_v61 = vld [vmem:[#allocation2 + $0x18] sm:$0xf]  ;;  %v8190_v5 = vrot.slane %v934_v30, 4 }
  0x97   :  { %v684_v47 = vsel %vm8161_vm8, %v526_v35, %v683_v21  ;;  %v687_v51 = vsel %vm7945_vm4, %v527_v38, %v686_v26  ;;  %691 = vst [vmem:[#allocation2 + $0x10] sm:$0xf] %v690_v56  ;;  %694 = vst [vmem:[#allocation2 + $0x14] sm:$0x1] %v693_v46  ;;  %v539_v9 = vrot.slane %v537_v40, 7  ;;  %v507_v55 = vmax.bf16 %v479_v41, %v478_v44  ;;  %v395_v57 = vpop.permute.xlu1 %394 }
  0x98   :  { %685 = vst [vmem:[#allocation2 + $0x8] sm:$0xf] %v684_v47  ;;  %688 = vst [vmem:[#allocation2 + $0xc] sm:$0x1] %v687_v51  ;;  %v393_v1 = vpop.permute.xlu0 %392  ;;  %v481_v62 = vmax.bf16 %v395_v57, %v7965_v15  ;;  %v8183_v26 = vrot.slane %v822_v29, 4  ;;  %v8192_v31 = vrot.slane %v937_v45, 5 }
  0x99   :  { %v480_v3 = vmax.bf16 %v393_v1, %v7967_v16  ;;  %v542_v4 = vor.u32 %v540_v10, %v539_v9  ;;  %v543_v13 = vrot.slane %v539_v9, 4  ;;  %v545_v21 = vshrl.u32 %v507_v55, 16  ;;  %v701_v38 = vld [vmem:[#allocation2 + $0x20] sm:$0xf]  ;;  %v704_v40 = vld [vmem:[#allocation2 + $0x24] sm:$0x1] }
  0x9a   :  { %v548_v32 = vshll.u32 %v507_v55, 16  ;;  %v828_v46 = vsel %vm8186_vm10, %v8183_v26, %v8181_v12  ;;  %v1408_v47 = vrot.slane %v8157_v18, 5  ;;  %v707_v10 = vld [vmem:[#allocation2 + $0x28] sm:$0xf] }
  0x9b   :  { %v508_v28 = vmax.bf16 %v481_v62, %v480_v3  ;;  %v696_v15 = vsel %vm8161_vm8, %v542_v4, %v695_v61  ;;  %v699_v16 = vsel %vm7945_vm4, %v543_v13, %v698_v2  ;;  %v547_v6 = vrot.slane %v545_v21, 7  ;;  %v399_v29 = vpop.permute.xlu1 %398  ;;  %v710_v61 = vld [vmem:[#allocation2 + $0x2c] sm:$0x1] }
  0x9c   :  { %v397_v35 = vpop.permute.xlu0 %396  ;;  %697 = vst [vmem:[#allocation2 + $0x18] sm:$0xf] %v696_v15  ;;  %700 = vst [vmem:[#allocation2 + $0x1c] sm:$0x1] %v699_v16  ;;  %v483_v30 = vmax.bf16 %v399_v29, %v7989_v33  ;;  %v940_v33 = vsel %vm8186_vm10, %v8190_v5, %v8192_v31 }
  0x9d   :  { %v553_v41 = vshrl.u32 %v508_v28, 16  ;;  %v482_v44 = vmax.bf16 %v397_v35, %v7991_v34  ;;  %v550_v45 = vor.u32 %v548_v32, %v547_v6  ;;  %v551_v56 = vrot.slane %v547_v6, 4 }
  0x9e   :  { %v556_v9 = vshll.u32 %v508_v28, 16  ;;  %v8219_v6 = vld [vmem:[#allocation2 + $0x10] sm:$0xf] }
  0x9f   :  { %v555_v51 = vrot.slane %v553_v41, 7  ;;  %v509_v55 = vmax.bf16 %v483_v30, %v482_v44  ;;  %v8205_v57 = vld [vmem:[#allocation2 + $0x8] sm:$0xf]  ;;  %v702_v34 = vsel %vm8161_vm8, %v550_v45, %v701_v38  ;;  %v705_v1 = vsel %vm7945_vm4, %v551_v56, %v704_v40  ;;  %v403_v2 = vpop.permute.xlu1 %402  ;;  %v8215_v3 = vld [vmem:[#allocation2 + $0xc] sm:$0x1] }
  0xa0   :  { %v401_v62 = vpop.permute.xlu0 %400  ;;  %v830_v4 = vshrl.u32 %v8205_v57, 16  ;;  %v833_v13 = vshll.u32 %v8205_v57, 16  ;;  %703 = vst [vmem:[#allocation2 + $0x20] sm:$0xf] %v702_v34  ;;  %706 = vst [vmem:[#allocation2 + $0x24] sm:$0x1] %v705_v1  ;;  %v485_v32 = vmax.bf16 %v403_v2, %v8019_v52 }
  0xa1   :  { %v558_v21 = vor.u32 %v556_v9, %v555_v51  ;;  %v559_v28 = vrot.slane %v555_v51, 4  ;;  %v561_v15 = vshrl.u32 %v509_v55, 16  ;;  %v564_v16 = vshll.u32 %v509_v55, 16  ;;  %v8228_v45 = vld [vmem:[#allocation2] sm:$0xe] }
  0xa2   :  { %v484_v29 = vmax.bf16 %v401_v62, %v8021_v53  ;;  %v832_v35 = vrot.slane %v830_v4, 4  ;;  %v835_v38 = vrot.slane %v833_v13, 5  ;;  %v839_v44 = vshll.u32 %v8215_v3, 16  ;;  %v713_v56 = vld [vmem:[#allocation2 + $0x30] sm:$0xf] }
  0xa3   :  { %v708_v40 = vsel %vm8161_vm8, %v558_v21, %v707_v10  ;;  %v711_v41 = vsel %vm7945_vm4, %v559_v28, %v710_v61  ;;  %v563_v30 = vrot.slane %v561_v15, 7  ;;  %v716_v51 = vld [vmem:[#allocation2 + $0x34] sm:$0x1]  ;;  %v411_v9 = vpop.permute.xlu1 %410  ;;  %v844_v34 = vshrl.u32 %v8219_v6, 16 }
  0xa4   :  { %709 = vst [vmem:[#allocation2 + $0x28] sm:$0xf] %v708_v40  ;;  %712 = vst [vmem:[#allocation2 + $0x2c] sm:$0x1] %v711_v41  ;;  %v510_v52 = vmax.bf16 %v485_v32, %v484_v29  ;;  %v409_v53 = vpop.permute.xlu0 %408  ;;  %v836_v55 = vor.u32 %v835_v38, %v832_v35  ;;  %v8233_v10 = vsel %vm1090_vm6, %v8135_v60, 0  ;;  %v489_v2 = vmax.bf16 %v411_v9, %v8034_v58 }
  0xa5   :  { %v566_v1 = vor.u32 %v564_v16, %v563_v30  ;;  %v567_v61 = vrot.slane %v563_v30, 4  ;;  %v488_v62 = vmax.bf16 %v409_v53, %v8036_v59  ;;  %v841_v21 = vrot.slane %v839_v44, 5  ;;  %v8237_v28 = vld [vmem:[#allocation2 + $0x14] sm:$0x1]  ;;  %v8246_v40 = vld [vmem:[#allocation2 + $0x18] sm:$0xf] }
  0xa6   :  { %v569_v4 = vshrl.u32 %v510_v52, 16  ;;  %v837_v13 = vrot.slane %v836_v55, 4  ;;  %v6578_v15 = vrot.slane %v8228_v45, 9  ;;  %v572_v29 = vshll.u32 %v510_v52, 16  ;;  %v719_v44 = vld [vmem:[#allocation2 + $0x38] sm:$0xf] }
  0xa7   :  { %v714_v32 = vsel %vm8161_vm8, %v566_v1, %v713_v56  ;;  %v717_v60 = vsel %vm7945_vm4, %v567_v61, %v716_v51  ;;  %v512_v16 = vmax.bf16 %v489_v2, %v488_v62  ;;  %v415_v35 = vpop.permute.xlu1 %414  ;;  %v846_v41 = vrot.slane %v844_v34, 4  ;;  %v722_v56 = vld [vmem:[#allocation2 + $0x3c] sm:$0x1]  ;;  %v731_v61 = vld [vmem:[#allocation2 + $0x58] sm:$0xf] }
  0xa8   :  { %715 = vst [vmem:[#allocation2 + $0x30] sm:$0xf] %v714_v32  ;;  %718 = vst [vmem:[#allocation2 + $0x34] sm:$0x1] %v717_v60  ;;  %v571_v58 = vrot.slane %v569_v4, 7  ;;  %v413_v59 = vpop.permute.xlu0 %412  ;;  %v842_v38 = vsel %vm8186_vm10, %v837_v13, %v841_v21  ;;  %v847_v30 = vshll.u32 %v8219_v6, 16  ;;  %v491_v51 = vmax.bf16 %v415_v35, %v8044_v63 }
  0xa9   :  { %v585_v9 = vshrl.u32 %v512_v16, 16  ;;  %v490_v52 = vmax.bf16 %v413_v59, %v8046_v11  ;;  %v853_v53 = vshll.u32 %v8237_v28, 16  ;;  %v6546_v34 = vcombine.low %v828_v46, %v842_v38  ;;  %v734_v13 = vld [vmem:[#allocation2 + $0x5c] sm:$0x1]  ;;  %v8266_v46 = vld [vmem:[#allocation2 + $0x50] sm:$0xe] }
  0xaa   :  { %v574_v55 = vor.u32 %v572_v29, %v571_v58  ;;  %v575_v1 = vrot.slane %v571_v58, 4  ;;  %v849_v2 = vrot.slane %v847_v30, 5  ;;  %v588_v4 = vshll.u32 %v512_v16, 16  ;;  %v8263_v58 = vld [vmem:[#allocation2 + $0x1c] sm:$0x1] }
  0xab   :  { %v587_v62 = vrot.slane %v585_v9, 7  ;;  %v513_v21 = vmax.bf16 %v491_v51, %v490_v52  ;;  %v858_v63 = vshrl.u32 %v8246_v40, 16  ;;  %7145 = vmatprep.mubr.msk.bf16.mxu0 %vm1065_vm11, %v6546_v34  ;;  %v419_v60 = vpop.permute.xlu1 %418  ;;  %v861_v26 = vshll.u32 %v8246_v40, 16 }
  0xac   :  { %v720_v11 = vsel %vm8161_vm8, %v574_v55, %v719_v44  ;;  %v723_v32 = vsel %vm7945_vm4, %v575_v1, %v722_v56  ;;  %v417_v29 = vpop.permute.xlu0 %416  ;;  %v850_v12 = vor.u32 %v849_v2, %v846_v41  ;;  %v493_v30 = vmax.bf16 %v419_v60, %v8056_v14  ;;  %v737_v55 = vld [vmem:[#allocation2 + $0x60] sm:$0xf]  ;;  %v740_v1 = vld [vmem:[#allocation2 + $0x64] sm:$0x1] }
  0xad   :  { %721 = vst [vmem:[#allocation2 + $0x38] sm:$0xf] %v720_v11  ;;  %724 = vst [vmem:[#allocation2 + $0x3c] sm:$0x1] %v723_v32  ;;  %v590_v16 = vor.u32 %v588_v4, %v587_v62  ;;  %v591_v35 = vrot.slane %v587_v62, 4  ;;  %v593_v59 = vshrl.u32 %v513_v21, 16  ;;  %v492_v44 = vmax.bf16 %v417_v29, %v8058_v17 }
  0xae   :  { %v596_v38 = vshll.u32 %v513_v21, 16  ;;  %v851_v56 = vrot.slane %v850_v12, 4  ;;  %v860_v9 = vrot.slane %v858_v63, 4  ;;  %v863_v34 = vrot.slane %v861_v26, 5  ;;  %v8276_v32 = vld [vmem:[#allocation2 + $0x20] sm:$0xf] }
  0xaf   :  { %v732_v51 = vsel %vm8161_vm8, %v590_v16, %v731_v61  ;;  %v735_v41 = vsel %vm7945_vm4, %v591_v35, %v734_v13  ;;  %v595_v52 = vrot.slane %v593_v59, 7  ;;  %v514_v2 = vmax.bf16 %v493_v30, %v492_v44  ;;  %v423_v4 = vpop.permute.xlu1 %422  ;;  %v743_v35 = vld [vmem:[#allocation2 + $0x68] sm:$0xf] }
  0xb0   :  { %733 = vst [vmem:[#allocation2 + $0x58] sm:$0xf] %v732_v51  ;;  %736 = vst [vmem:[#allocation2 + $0x5c] sm:$0x1] %v735_v41  ;;  %v855_v62 = vrot.slane %v853_v53, 5  ;;  %v867_v14 = vshll.u32 %v8263_v58, 16  ;;  %v421_v17 = vpop.permute.xlu0 %420  ;;  %v864_v61 = vor.u32 %v863_v34, %v860_v9  ;;  %v495_v53 = vmax.bf16 %v423_v4, %v8068_v22 }
  0xb1   :  { %v6586_v21 = vrot.slane %v8266_v46, 9  ;;  %v598_v63 = vor.u32 %v596_v38, %v595_v52  ;;  %v599_v11 = vrot.slane %v595_v52, 4  ;;  %v1440_v13 = vrot.slane %v8166_v39, 5  ;;  %v746_v52 = vld [vmem:[#allocation2 + $0x6c] sm:$0x1] }
  0xb2   :  { %v601_v60 = vshrl.u32 %v514_v2, 16  ;;  %v856_v29 = vsel %vm8186_vm10, %v851_v56, %v855_v62  ;;  %v869_v12 = vrot.slane %v867_v14, 5  ;;  %v865_v59 = vrot.slane %v864_v61, 4  ;;  %v8287_v56 = vld [vmem:[#allocation2 + $0x24] sm:$0x1] }
  0xb3   :  { %v738_v26 = vsel %vm8161_vm8, %v598_v63, %v737_v55  ;;  %v741_v16 = vsel %vm7945_vm4, %v599_v11, %v740_v1  ;;  %v494_v38 = vmax.bf16 %v421_v17, %v8070_v23  ;;  %v604_v44 = vshll.u32 %v514_v2, 16  ;;  %v427_v9 = vpop.permute.xlu1 %426  ;;  %v8295_v62 = vld [vmem:[#allocation2 + $0x28] sm:$0xf]  ;;  %v8300_v63 = vld [vmem:[%s9856_s1 + $0x4] sm:$0x3] }
  0xb4   :  { %739 = vst [vmem:[#allocation2 + $0x60] sm:$0xf] %v738_v26  ;;  %742 = vst [vmem:[#allocation2 + $0x64] sm:$0x1] %v741_v16  ;;  %v603_v30 = vrot.slane %v601_v60, 7  ;;  %v425_v51 = vpop.permute.xlu0 %424  ;;  %v872_v22 = vshrl.u32 %v8276_v32, 16  ;;  %v870_v55 = vsel %vm8186_vm10, %v865_v59, %v869_v12  ;;  %v497_v34 = vmax.bf16 %v427_v9, %v8072_v24 }
  0xb5   :  { %v875_v41 = vshll.u32 %v8276_v32, 16  ;;  %v515_v1 = vmax.bf16 %v495_v53, %v494_v38  ;;  %v496_v23 = vmax.bf16 %v425_v51, %v8078_v25  ;;  %v6547_v4 = vcombine.low %v856_v29, %v870_v55  ;;  %v8302_v60 = vld [vmem:[#allocation2 + $0x2c] sm:$0x1]  ;;  %v749_v26 = vld [vmem:[#allocation2 + $0x70] sm:$0xf] }
  0xb6   :  { %v606_v2 = vor.u32 %v604_v44, %v603_v30  ;;  %v607_v14 = vrot.slane %v603_v30, 4  ;;  %v874_v17 = vrot.slane %v872_v22, 4  ;;  %v881_v24 = vshll.u32 %v8287_v56, 16  ;;  %v8311_v30 = vld [vmem:[#allocation2 + $0x30] sm:$0xf] }
  0xb7   :  { %v609_v11 = vshrl.u32 %v515_v1, 16  ;;  %v516_v61 = vmax.bf16 %v497_v34, %v496_v23  ;;  %v877_v12 = vrot.slane %v875_v41, 5  ;;  %7146 = vmatmul.mubr.msk.bf16.vlgmr.msra.gmra.mrb[0].mxu0 %vm1065_vm11, %v6547_v4  ;;  %v612_v29 = vshll.u32 %v515_v1, 16  ;;  %v431_v59 = vpop.permute.xlu1 %430 }
  0xb8   :  { %v744_v25 = vsel %vm8161_vm8, %v606_v2, %v743_v35  ;;  %v747_v53 = vsel %vm7945_vm4, %v607_v14, %v746_v52  ;;  %v886_v16 = vshrl.u32 %v8295_v62, 16  ;;  %v429_v38 = vpop.permute.xlu0 %428  ;;  %7162 = vmatpush3.bf16.msra.mxu0 %v8233_v10  ;;  %v752_v35 = vld [vmem:[#allocation2 + $0x74] sm:$0x1]  ;;  %v889_v52 = vshll.u32 %v8295_v62, 16  ;;  %v755_v14 = vld [vmem:[#allocation2 + $0x78] sm:$0xf] }
  0xb9   :  { %745 = vst [vmem:[#allocation2 + $0x68] sm:$0xf] %v744_v25  ;;  %748 = vst [vmem:[#allocation2 + $0x6c] sm:$0x1] %v747_v53  ;;  %v611_v44 = vrot.slane %v609_v11, 7  ;;  %v617_v9 = vshrl.u32 %v516_v61, 16  ;;  %v878_v22 = vor.u32 %v877_v12, %v874_v17  ;;  %v499_v1 = vmax.bf16 %v431_v59, %v8092_v36  ;;  %7725 = vmatprep.subr.msk.bf16.mxu0 %vm1090_vm6, %v8300_v63 }
  0xba   :  { %v620_v51 = vshll.u32 %v516_v61, 16  ;;  %v888_v41 = vrot.slane %v886_v16, 4  ;;  %v895_v55 = vshll.u32 %v8302_v60, 16  ;;  %v758_v11 = vld [vmem:[#allocation2 + $0x7c] sm:$0x1]  ;;  %v883_v17 = vrot.slane %v881_v24, 5 }
  0xbb   :  { %v614_v34 = vor.u32 %v612_v29, %v611_v44  ;;  %v615_v23 = vrot.slane %v611_v44, 4  ;;  %v619_v2 = vrot.slane %v617_v9, 7  ;;  %v879_v4 = vrot.slane %v878_v22, 4  ;;  %v435_v12 = vpop.permute.xlu1 %434 }
  0xbc   :  { %v891_v61 = vrot.slane %v889_v52, 5  ;;  %v498_v10 = vmax.bf16 %v429_v38, %v8094_v37  ;;  %v433_v25 = vpop.permute.xlu0 %432  ;;  %v900_v53 = vshrl.u32 %v8311_v30, 16  ;;  %v897_v9 = vrot.slane %v895_v55, 5  ;;  %v8326_v37 = vld [vmem:[#allocation2 + $0x38] sm:$0xf] }
  0xbd   :  { %v750_v36 = vsel %vm8161_vm8, %v614_v34, %v749_v26  ;;  %v753_v16 = vsel %vm7945_vm4, %v615_v23, %v752_v35  ;;  %v622_v29 = vor.u32 %v620_v51, %v619_v2  ;;  %v623_v59 = vrot.slane %v619_v2, 4  ;;  %v8328_v38 = vld [vmem:[#allocation2 + $0x34] sm:$0x1]  ;;  %v761_v23 = vld [vmem:[#allocation2 + $0x80] sm:$0xf] }
  0xbe   :  { %751 = vst [vmem:[#allocation2 + $0x70] sm:$0xf] %v750_v36  ;;  %754 = vst [vmem:[#allocation2 + $0x74] sm:$0x1] %v753_v16  ;;  %v892_v44 = vor.u32 %v891_v61, %v888_v41  ;;  %v517_v24 = vmax.bf16 %v499_v1, %v498_v10  ;;  %v501_v22 = vmax.bf16 %v435_v12, %v8104_v42  ;;  %v8337_v42 = vld [vmem:[#allocation2 + $0x3c] sm:$0x1] }
  0xbf   :  { %v756_v52 = vsel %vm8161_vm8, %v622_v29, %v755_v14  ;;  %v759_v26 = vsel %vm7945_vm4, %v623_v59, %v758_v11  ;;  %v884_v51 = vsel %vm8186_vm10, %v879_v4, %v883_v17  ;;  %v500_v35 = vmax.bf16 %v433_v25, %v8106_v43  ;;  %v764_v10 = vld [vmem:[#allocation2 + $0x84] sm:$0x1]  ;;  %v407_v25 = vpop.permute.xlu1 %406 }
  0xc0   :  { %757 = vst [vmem:[#allocation2 + $0x78] sm:$0xf] %v756_v52  ;;  %760 = vst [vmem:[#allocation2 + $0x7c] sm:$0x1] %v759_v26  ;;  %v893_v41 = vrot.slane %v892_v44, 4  ;;  %v625_v55 = vshrl.u32 %v517_v24, 16  ;;  %v405_v36 = vpop.permute.xlu0 %404  ;;  %v8415_v5 = vsel %vm8385_vm14, %v6578_v15, %v1408_v47  ;;  %v8423_v31 = vsel %vm8385_vm14, %v6586_v21, %v1440_v13 }
  0xc1   :  { %v902_v1 = vrot.slane %v900_v53, 4  ;;  %v903_v34 = vshll.u32 %v8311_v30, 16  ;;  %v518_v2 = vmax.bf16 %v501_v22, %v500_v35  ;;  %v909_v14 = vshll.u32 %v8328_v38, 16  ;;  %v8346_v35 = vld [vmem:[#allocation2 + $0x58] sm:$0xf] }
  0xc2   :  { %v914_v11 = vshrl.u32 %v8326_v37, 16  ;;  %v917_v61 = vshll.u32 %v8326_v37, 16  ;;  %v898_v43 = vsel %vm8186_vm10, %v893_v41, %v897_v9  ;;  %v627_v4 = vrot.slane %v625_v55, 7 }
  0xc3   :  { %v628_v17 = vshll.u32 %v517_v24, 16  ;;  %v905_v12 = vrot.slane %v903_v34, 5  ;;  %v6548_v53 = vcombine.low %v884_v51, %v898_v43  ;;  %v633_v16 = vshrl.u32 %v518_v2, 16  ;;  %v8350_v51 = vld [vmem:[#allocation2 + $0x5c] sm:$0x1] }
  0xc4   :  { %v636_v29 = vshll.u32 %v518_v2, 16  ;;  %v923_v59 = vshll.u32 %v8337_v42, 16  ;;  %v631_v22 = vrot.slane %v627_v4, 4  ;;  %v916_v26 = vrot.slane %v914_v11, 4  ;;  %v767_v2 = vld [vmem:[#allocation2 + $0x88] sm:$0xf] }
  0xc5   :  { %v630_v44 = vor.u32 %v628_v17, %v627_v4  ;;  %v906_v52 = vor.u32 %v905_v12, %v902_v1  ;;  %7149 = vmatprep.mubr.msk.bf16.mxu0 %vm1065_vm11, %v6548_v53  ;;  %v635_v9 = vrot.slane %v633_v16, 7  ;;  %v911_v24 = vrot.slane %v909_v14, 5  ;;  %v770_v11 = vld [vmem:[#allocation2 + $0x8c] sm:$0x1]  ;;  %v8358_v12 = vld [vmem:[#allocation2 + $0x60] sm:$0xf]  ;;  %v439_v16 = vpop.permute.xlu1 %438 }
  0xc6   :  { %v919_v41 = vrot.slane %v917_v61, 5  ;;  %v487_v55 = vmax.bf16 %v407_v25, %v8116_v48  ;;  %v765_v1 = vsel %vm7945_vm4, %v631_v22, %v764_v10  ;;  %v486_v4 = vmax.bf16 %v405_v36, %v8118_v49 }
  0xc7   :  { %v762_v34 = vsel %vm8161_vm8, %v630_v44, %v761_v23  ;;  %v907_v43 = vrot.slane %v906_v52, 4  ;;  %766 = vst [vmem:[#allocation2 + $0x84] sm:$0x1] %v765_v1  ;;  %v638_v17 = vor.u32 %v636_v29, %v635_v9  ;;  %v639_v14 = vrot.slane %v635_v9, 4  ;;  %v437_v44 = vpop.permute.xlu0 %436  ;;  %v8433_v13 = vld [vmem:[#allocation2 + $0x7c] sm:$0x1] }
  0xc8   :  { %763 = vst [vmem:[#allocation2 + $0x80] sm:$0xf] %v762_v34  ;;  %v920_v61 = vor.u32 %v919_v41, %v916_v26  ;;  %v942_v48 = vshrl.u32 %v8346_v35, 16  ;;  %v925_v25 = vrot.slane %v923_v59, 5  ;;  %v511_v53 = vmax.bf16 %v487_v55, %v486_v4  ;;  %v8368_v41 = vld [vmem:[#allocation2 + $0x68] sm:$0xf] }
  0xc9   :  { %v945_v23 = vshll.u32 %v8346_v35, 16  ;;  %v951_v10 = vshll.u32 %v8350_v51, 16  ;;  %v768_v49 = vsel %vm8161_vm8, %v638_v17, %v767_v2  ;;  %v771_v36 = vsel %vm7945_vm4, %v639_v14, %v770_v11  ;;  %v725_v17 = vld [vmem:[#allocation2 + $0x40] sm:$0xf] }
  0xca   :  { %v921_v29 = vrot.slane %v920_v61, 4  ;;  %v944_v22 = vrot.slane %v942_v48, 4  ;;  %769 = vst [vmem:[#allocation2 + $0x88] sm:$0xf] %v768_v49  ;;  %772 = vst [vmem:[#allocation2 + $0x8c] sm:$0x1] %v771_v36  ;;  %v912_v59 = vsel %vm8186_vm10, %v907_v43, %v911_v24  ;;  %v503_v34 = vmax.bf16 %v439_v16, %v8124_v50 }
  0xcb   :  { %v577_v52 = vshrl.u32 %v511_v53, 16  ;;  %v580_v26 = vshll.u32 %v511_v53, 16  ;;  %v947_v9 = vrot.slane %v945_v23, 5  ;;  %v502_v1 = vmax.bf16 %v437_v44, %v8126_v54  ;;  %v8375_v61 = vld [vmem:[#allocation2 + $0x64] sm:$0x1] }
  0xcc   :  { %v926_v55 = vsel %vm8186_vm10, %v921_v29, %v925_v25  ;;  %v956_v2 = vshrl.u32 %v8358_v12, 16  ;;  %v959_v24 = vshll.u32 %v8358_v12, 16  ;;  %v728_v43 = vld [vmem:[#allocation2 + $0x44] sm:$0x1]  ;;  %v953_v48 = vrot.slane %v951_v10, 5 }
  0xcd   :  { %v6549_v11 = vcombine.low %v912_v59, %v926_v55  ;;  %v579_v4 = vrot.slane %v577_v52, 7  ;;  %v948_v14 = vor.u32 %v947_v9, %v944_v22  ;;  %v519_v53 = vmax.bf16 %v503_v34, %v502_v1  ;;  %v8381_v22 = vld [vmem:[#allocation2 + $0x70] sm:$0xf]  ;;  %v8395_v55 = vld [vmem:[#allocation2 + $0x6c] sm:$0x1] }
  0xce   :  { %v958_v23 = vrot.slane %v956_v2, 4  ;;  %v970_v25 = vshrl.u32 %v8368_v41, 16  ;;  %v961_v44 = vrot.slane %v959_v24, 5  ;;  %v965_v29 = vshll.u32 %v8375_v61, 16  ;;  %v773_v9 = vld [vmem:[#allocation2 + $0x90] sm:$0xf] }
  0xcf   :  { %7150 = vmatmul.mubr.msk.bf16.gmra.mrb[4].mxu0 %vm1065_vm11, %v6549_v11  ;;  %v582_v50 = vor.u32 %v580_v26, %v579_v4  ;;  %v583_v54 = vrot.slane %v579_v4, 4  ;;  %v949_v16 = vrot.slane %v948_v14, 4  ;;  %v641_v49 = vshrl.u32 %v519_v53, 16  ;;  %v776_v11 = vld [vmem:[#allocation2 + $0x94] sm:$0x1] }
  0xd0   :  { %v644_v36 = vshll.u32 %v519_v53, 16  ;;  %v962_v34 = vor.u32 %v961_v44, %v958_v23  ;;  %v972_v4 = vrot.slane %v970_v25, 4  ;;  %v8403_v14 = vld [vmem:[#allocation2 + $0x78] sm:$0xf]  ;;  %v8405_v24 = vld [vmem:[#allocation2 + $0x74] sm:$0x1] }
  0xd1   :  { %v726_v59 = vsel %vm8161_vm8, %v582_v50, %v725_v17  ;;  %v729_v52 = vsel %vm7945_vm4, %v583_v54, %v728_v43  ;;  %v954_v26 = vsel %vm8186_vm10, %v949_v16, %v953_v48  ;;  %v643_v2 = vrot.slane %v641_v49, 7  ;;  %v8427_v45 = vld [vmem:[#allocation2 + $0x80] sm:$0xf]  ;;  %v8436_v16 = vld [vmem:[#allocation2 + $0x84] sm:$0x1] }
  0xd2   :  { %727 = vst [vmem:[#allocation2 + $0x40] sm:$0xf] %v726_v59  ;;  %730 = vst [vmem:[#allocation2 + $0x44] sm:$0x1] %v729_v52  ;;  %v6550_v1 = vcombine.low %v940_v33, %v954_v26  ;;  %v973_v17 = vshll.u32 %v8368_v41, 16  ;;  %v984_v43 = vshrl.u32 %v8381_v22, 16 }
  0xd3   :  { %v987_v48 = vshll.u32 %v8381_v22, 16  ;;  %v646_v33 = vor.u32 %v644_v36, %v643_v2  ;;  %v647_v53 = vrot.slane %v643_v2, 4  ;;  %v979_v18 = vshll.u32 %v8395_v55, 16 }
  0xd4   :  { %7153 = vmatprep.mubr.msk.bf16.mxu0 %vm1065_vm11, %v6550_v1  ;;  %v975_v23 = vrot.slane %v973_v17, 5  ;;  %v963_v25 = vrot.slane %v962_v34, 4  ;;  %v967_v47 = vrot.slane %v965_v29, 5  ;;  %v986_v15 = vrot.slane %v984_v43, 4  ;;  %v8440_v29 = vld [vmem:[#allocation2 + $0x88] sm:$0xf] }
  0xd5   :  { %v989_v50 = vrot.slane %v987_v48, 5  ;;  %v774_v39 = vsel %vm8161_vm8, %v646_v33, %v773_v9  ;;  %v777_v46 = vsel %vm7945_vm4, %v647_v53, %v776_v11  ;;  %v998_v54 = vshrl.u32 %v8403_v14, 16  ;;  %v8443_v9 = vld [vmem:[#allocation2 + $0x8c] sm:$0x1] }
  0xd6   :  { %v976_v21 = vor.u32 %v975_v23, %v972_v4  ;;  %775 = vst [vmem:[#allocation2 + $0x90] sm:$0xf] %v774_v39  ;;  %778 = vst [vmem:[#allocation2 + $0x94] sm:$0x1] %v777_v46  ;;  %v993_v49 = vshll.u32 %v8405_v24, 16  ;;  %v1001_v36 = vshll.u32 %v8403_v14, 16  ;;  %v968_v1 = vsel %vm8186_vm10, %v963_v25, %v967_v47 }
  0xd7   :  { %v990_v44 = vor.u32 %v989_v50, %v986_v15  ;;  %v1012_v19 = vshrl.u32 %v8427_v45, 16  ;;  %v981_v52 = vrot.slane %v979_v18, 5  ;;  %v1000_v26 = vrot.slane %v998_v54, 4  ;;  %v1356_v50 = vld [vmem:[#allocation2 + $0x8] sm:$0xe] }
  0xd8   :  { %v977_v59 = vrot.slane %v976_v21, 4  ;;  %v1015_v34 = vshll.u32 %v8427_v45, 16  ;;  %v1003_v2 = vrot.slane %v1001_v36, 5  ;;  %v1007_v11 = vshll.u32 %v8433_v13, 16  ;;  %v1357_v21 = vld [vmem:[#allocation2 + $0x10] sm:$0xe] }
  0xd9   :  { %v1014_v4 = vrot.slane %v1012_v19, 4  ;;  %v1021_v48 = vshll.u32 %v8436_v16, 16  ;;  %v1026_v33 = vshrl.u32 %v8440_v29, 16  ;;  %v991_v23 = vrot.slane %v990_v44, 4  ;;  %v1358_v54 = vld [vmem:[#allocation2 + $0x18] sm:$0xe] }
  0xda   :  { %v982_v17 = vsel %vm8186_vm10, %v977_v59, %v981_v52  ;;  %v1017_v43 = vrot.slane %v1015_v34, 5  ;;  %v1004_v18 = vor.u32 %v1003_v2, %v1000_v26  ;;  %v1029_v15 = vshll.u32 %v8440_v29, 16  ;;  %v1359_v34 = vld [vmem:[#allocation2 + $0x20] sm:$0xe] }
  0xdb   :  { %v6551_v53 = vcombine.low %v968_v1, %v982_v17  ;;  %v1412_v25 = vrot.slane %v8215_v3, 5  ;;  %v1028_v39 = vrot.slane %v1026_v33, 4  ;;  %v1035_v46 = vshll.u32 %v8443_v9, 16 }
  0xdc   :  { %v1018_v47 = vor.u32 %v1017_v43, %v1014_v4  ;;  %v995_v36 = vrot.slane %v993_v49, 5  ;;  %v1005_v19 = vrot.slane %v1004_v18, 4  ;;  %v1009_v59 = vrot.slane %v1007_v11, 5  ;;  %v1360_v43 = vld [vmem:[#allocation2 + $0x28] sm:$0xe] }
  0xdd   :  { %7154 = vmatmul.mubr.msk.bf16.gmra.mrb[8].mxu0 %vm1065_vm11, %v6551_v53  ;;  %v1031_v52 = vrot.slane %v1029_v15, 5  ;;  %v1416_v44 = vrot.slane %v8237_v28, 5  ;;  %v1420_v26 = vrot.slane %v8263_v58, 5  ;;  %v1023_v2 = vrot.slane %v1021_v48, 5 }
  0xde   :  { %v1019_v1 = vrot.slane %v1018_v47, 4  ;;  %v996_v3 = vsel %vm8186_vm10, %v991_v23, %v995_v36  ;;  %v1010_v4 = vsel %vm8186_vm10, %v1005_v19, %v1009_v59  ;;  %v6562_v49 = vcombine.low %v8147_v20, %v8205_v57  ;;  %v1361_v47 = vld [vmem:[#allocation2 + $0x30] sm:$0xe]  ;;  %v1362_v36 = vld [vmem:[#allocation2 + $0x38] sm:$0xe] }
  0xdf   :  { %v1032_v17 = vor.u32 %v1031_v52, %v1028_v39  ;;  %v6552_v11 = vcombine.low %v996_v3, %v1010_v4  ;;  %v1037_v28 = vrot.slane %v1035_v46, 5  ;;  %v6579_v53 = vrot.slane %v1356_v50, 9  ;;  %v1365_v19 = vld [vmem:[#allocation2 + $0x60] sm:$0xe] }
  0xe0   :  { %v1024_v33 = vsel %vm8186_vm10, %v1019_v1, %v1023_v2  ;;  %v6580_v18 = vrot.slane %v1357_v21, 9  ;;  %v6581_v48 = vrot.slane %v1358_v54, 9  ;;  %v6582_v15 = vrot.slane %v1359_v34, 9  ;;  %v1366_v34 = vld [vmem:[#allocation2 + $0x68] sm:$0xe] }
  0xe1   :  { %v1033_v58 = vrot.slane %v1032_v17, 4  ;;  %7157 = vmatprep.mubr.msk.bf16.mxu0 %vm1065_vm11, %v6552_v11  ;;  %v8470_v23 = vsel %vm8385_vm14, %v6579_v53, %v1412_v25  ;;  %v1424_v20 = vrot.slane %v8287_v56, 5  ;;  %v6583_v57 = vrot.slane %v1360_v43, 9  ;;  %v1364_v25 = vld [vmem:[#allocation2 + $0x58] sm:$0xe] }
  0xe2   :  { %v1428_v39 = vrot.slane %v8302_v60, 5  ;;  %v6595_v46 = vcombine.low %v8415_v5, %v8470_v23  ;;  %v1417_v21 = vsel %vm8385_vm14, %v6580_v18, %v1416_v44  ;;  %v1421_v54 = vsel %vm8385_vm14, %v6581_v48, %v1420_v26  ;;  %v1369_v53 = vld [vmem:[#allocation2 + $0x80] sm:$0xe] }
  0xe3   :  { %v1038_v50 = vsel %vm8186_vm10, %v1033_v58, %v1037_v28  ;;  %v6596_v56 = vcombine.low %v1417_v21, %v1421_v54  ;;  %v1425_v60 = vsel %vm8385_vm14, %v6582_v15, %v1424_v20  ;;  %v6584_v2 = vrot.slane %v1361_v47, 9  ;;  %v1370_v58 = vld [vmem:[#allocation2 + $0x88] sm:$0xe]  ;;  %v83_v54 = vld [vmem:[#allocation2 + $0x48] sm:$0x1] }
  0xe4   :  { %v6553_v59 = vcombine.low %v1024_v33, %v1038_v50  ;;  %v1429_v52 = vsel %vm8385_vm14, %v6583_v57, %v1428_v39  ;;  %v1432_v5 = vrot.slane %v8328_v38, 5  ;;  %v6585_v3 = vrot.slane %v1362_v36, 9  ;;  %v6611_v39 = vld [vmem:[%s9856_s1 + $0x6] sm:$0x3] }
  0xe5   :  { %v6597_v1 = vcombine.low %v1425_v60, %v1429_v52  ;;  %v1436_v44 = vrot.slane %v8337_v42, 5  ;;  %v6587_v26 = vrot.slane %v1364_v25, 9  ;;  %v1444_v4 = vrot.slane %v8350_v51, 5  ;;  %v113_v25 = vld [vmem:[#allocation2 + $0x98] sm:$0x1] }
  0xe6   :  { %7158 = vmatmul.mubr.msk.bf16.gmra.mrb[12].mxu0 %vm1065_vm11, %v6553_v59  ;;  %v6588_v17 = vrot.slane %v1365_v19, 9  ;;  %v1448_v43 = vrot.slane %v8375_v61, 5  ;;  %v6589_v11 = vrot.slane %v1366_v34, 9  ;;  %v1452_v33 = vrot.slane %v8395_v55, 5  ;;  %v7756_v19 = vld [vmem:[#allocation2 + $0x8] ss:$8 sps:$4 sm:$0xff]  }
  0xe7   :  { %7163 = vmatprep.mubr.msk.bf16.mxu0 %vm1065_vm11, %v6562_v49  ;;  %v1433_v28 = vsel %vm8385_vm14, %v6584_v2, %v1432_v5  ;;  %v1437_v38 = vsel %vm8385_vm14, %v6585_v3, %v1436_v44  ;;  %v1445_v42 = vsel %vm8385_vm14, %v6587_v26, %v1444_v4  ;;  %v6592_v48 = vrot.slane %v1369_v53, 9  ;;  %v7757_v59 = vld [vmem:[#allocation2 + $0x18] ss:$8 sps:$4 sm:$0xff]   ;;  %v1836_v52 = vld [vmem:[#allocation2 + $0x10] sm:$0xf] }
  0xe8   :  { %v6598_v51 = vcombine.low %v1433_v28, %v1437_v38  ;;  %v6599_v18 = vcombine.low %v8423_v31, %v1445_v42  ;;  %v1449_v61 = vsel %vm8385_vm14, %v6588_v17, %v1448_v43  ;;  %v1453_v55 = vsel %vm8385_vm14, %v6589_v11, %v1452_v33  ;;  %v145_v34 = vld [vmem:[#allocation2 + $0x4c] sm:$0x1]  ;;  %v8564_v2 = vld [vmem:[%s9856_s1 + $0xa] sm:$0x3]  ;;  %v1838_v4 = vld [vmem:[#allocation2 + $0x18] sm:$0xf] }
  0xe9   :  { %v6600_v49 = vcombine.low %v1449_v61, %v1453_v55  ;;  %v1464_v15 = vrot.slane %v8436_v16, 5  ;;  %v6593_v47 = vrot.slane %v1370_v58, 9  ;;  %v1468_v23 = vrot.slane %v8443_v9, 5  ;;  %v1840_v17 = vld [vmem:[#allocation2 + $0x20] sm:$0xf] }
  0xea   :  { %v6563_v20 = vcombine.low %v8219_v6, %v8246_v40  ;;  %v1521_v57 = vsel %vm1090_vm6, %v8300_v63, 0  ;;  %v6564_v31 = vcombine.low %v8276_v32, %v8295_v62  ;;  %v6565_v6 = vcombine.low %v8311_v30, %v8326_v37  ;;  %v7796_v40 = vld [vmem:[#allocation2 + $0x50] sm:$0xf]  ;;  %v8572_v43 = vld [vmem:[#allocation2 + $0xc] sm:$0x1] }
  0xeb   :  { %v1465_v36 = vsel %vm8385_vm14, %v6592_v48, %v1464_v15  ;;  %v1469_v16 = vsel %vm8385_vm14, %v6593_v47, %v1468_v23  ;;  %v6566_v32 = vcombine.low %v7796_v40, %v8346_v35  ;;  %v6567_v62 = vcombine.low %v8358_v12, %v8368_v41  ;;  %v6628_v35 = vld [vmem:[%s9856_s1 + $0x8] sm:$0x3]  ;;  %v1368_v12 = vld [vmem:[#allocation2 + $0x78] sm:$0xe]  ;;  %v1367_v41 = vld [vmem:[#allocation2 + $0x70] sm:$0xe] }
  0xec   :  { %v6602_v9 = vcombine.low %v1465_v36, %v1469_v16  ;;  %v6568_v63 = vcombine.low %v8381_v22, %v8403_v14  ;;  %v6569_v30 = vcombine.low %v8427_v45, %v8440_v29  ;;  %v1719_v37 = vsel %vm1090_vm6, %v6611_v39, 0  ;;  %v7759_v42 = vld [vmem:[#allocation2 + $0x38] ss:$8 sps:$4 sm:$0xff]   ;;  %v1842_v55 = vld [vmem:[#allocation2 + $0x28] sm:$0xf] }
  0xed   :  { %v6591_v22 = vrot.slane %v1368_v12, 9  ;;  %v1460_v14 = vrot.slane %v8433_v13, 5  ;;  %v6590_v45 = vrot.slane %v1367_v41, 9  ;;  %v1456_v29 = vrot.slane %v8405_v24, 5  ;;  %v7760_v61 = vld [vmem:[#allocation2 + $0x58] ss:$8 sps:$4 sm:$0xff]  }
  0xee   :  { %7164 = vmatmul.mubr.msk.bf16.vlgmr.msra.gmra.mrb[0].mxu0 %vm1065_vm11, %v6563_v20  ;;  %v84_v13 = vsel %vm7945_vm4, 0, %v83_v54  ;;  %v114_v24 = vsel %vm7945_vm4, 0, %v113_v25  ;;  %v2141_v60 = vsel %vm1090_vm6, %v6628_v35, 0  ;;  %v1881_v3 = vshrl.u32 %v1836_v52, 16  ;;  %v8576_v48 = vld [vmem:[#allocation2 + $0x14] sm:$0x1] }
  0xef   :  { %7180 = vmatpush3.bf16.msra.mxu0 %v1521_v57  ;;  %7167 = vmatprep.mubr.msk.bf16.mxu0 %vm1065_vm11, %v6564_v31  ;;  %v1461_v50 = vsel %vm8385_vm14, %v6591_v22, %v1460_v14  ;;  %85 = vst [vmem:[#allocation2 + $0x48] sm:$0x1] %v84_v13  ;;  %115 = vst [vmem:[#allocation2 + $0x98] sm:$0x1] %v114_v24  ;;  %v146_v44 = vsel %vm7955_vm5, 0, %v145_v34  ;;  %v1884_v26 = vshll.u32 %v1836_v52, 16 }
  0xf0   :  { %7726 = vmatprep.subr.msk.bf16.mxu0 %vm1090_vm6, %v6611_v39  ;;  %147 = vst [vmem:[#allocation2 + $0x4c] sm:$0x1] %v146_v44  ;;  %v1883_v28 = vrot.slane %v1881_v3, 4  ;;  %v1895_v38 = vshrl.u32 %v1838_v4, 16  ;;  %v1898_v58 = vshll.u32 %v1838_v4, 16  ;;  %v1876_v47 = vshll.u32 %v8572_v43, 16 }
  0xf1   :  { %v1886_v53 = vrot.slane %v1884_v26, 5  ;;  %v8579_v23 = vld [vmem:[#allocation2 + $0x1c] sm:$0x1]  ;;  %v8581_v31 = vld [vmem:[#allocation2 + $0x24] sm:$0x1]  ;;  %vm4110_vm4 = vcmask 1043456  }
  0xf2   :  { %v1897_v20 = vrot.slane %v1895_v38, 4  ;;  %v1900_v39 = vrot.slane %v1898_v58, 5  ;;  %v7761_v12 = vld [vmem:[#allocation2 + $0x68] ss:$8 sps:$4 sm:$0xff]   ;;  %v1878_v41 = vrot.slane %v1876_v47, 5 }
  0xf3   :  { %v1887_v57 = vor.u32 %v1886_v53, %v1883_v28  ;;  %v1850_v4 = vld [vmem:[#allocation2 + $0x58] sm:$0xf] }
  0xf4   :  { %v1901_v14 = vor.u32 %v1900_v39, %v1897_v20 }
  0xf5   :  { %v1888_v22 = vrot.slane %v1887_v57, 4  ;;  %v2419_v57 = vsel %vm1090_vm6, %v8564_v2, 0 }
  0xf6   :  { %7168 = vmatmul.mubr.msk.bf16.gmra.mrb[4].mxu0 %vm1065_vm11, %v6565_v6  ;;  %v1926_v6 = vshll.u32 %v1842_v55, 16  ;;  %v1902_v3 = vrot.slane %v1901_v14, 4  ;;  %v1860_v14 = vld [vmem:[#allocation2 + $0x80] sm:$0xf] }
  0xf7   :  { %7171 = vmatprep.mubr.msk.bf16.mxu0 %vm1065_vm11, %v6566_v32 }
  0xf8   :  { %v1928_v54 = vrot.slane %v1926_v6, 5 }
  0xfe   :  { %7172 = vmatmul.mubr.msk.bf16.gmra.mrb[8].mxu0 %vm1065_vm11, %v6567_v62  ;;  %v1890_v62 = vshll.u32 %v8576_v48, 16 }
  0xff   :  { %7175 = vmatprep.mubr.msk.bf16.mxu0 %vm1065_vm11, %v6568_v63  ;;  %v1904_v63 = vshll.u32 %v8579_v23, 16 }
 0x100   :  { %v1892_v24 = vrot.slane %v1890_v62, 5 }
 0x106   :  { %7176 = vmatmul.mubr.msk.bf16.gmra.mrb[12].mxu0 %vm1065_vm11, %v6569_v30 }
 0x107   :  { %7181 = vmatprep.mubr.msk.bf16.mxu0 %vm1065_vm11, %v6595_v46  ;;  %v1457_v46 = vsel %vm8385_vm14, %v6590_v45, %v1456_v29  ;;  %v1848_v29 = vld [vmem:[#allocation2 + $0x40] sm:$0xf] }
 0x108   :  { %v6601_v21 = vcombine.low %v1457_v46, %v1461_v50  ;;  %v7762_v50 = vld [vmem:[#allocation2 + $0x78] ss:$8 sps:$4 sm:$0xff]   ;;  %v8588_v46 = vld [vmem:[#allocation2 + $0x34] sm:$0x1]  ;;  %v1965_v34 = vshrl.u32 %v1848_v29, 16 }
 0x109   :  { %v1946_v38 = vshll.u32 %v8588_v46, 16 }
 0x10b   :  { %v1948_v62 = vrot.slane %v1946_v38, 5 }
 0x10e   :  { %7182 = vmatmul.mubr.msk.bf16.vlgmr.msra.gmra.mrb[0].mxu0 %vm1065_vm11, %v6596_v56  ;;  %v1834_v56 = vld [vmem:[#allocation2 + $0x8] sm:$0xf] }
 0x10f   :  { %7198 = vmatpush3.bf16.msra.mxu0 %v1719_v37  ;;  %7185 = vmatprep.mubr.msk.bf16.mxu0 %vm1065_vm11, %v6597_v1  ;;  %v7758_v1 = vld [vmem:[#allocation2 + $0x28] ss:$8 sps:$4 sm:$0xff]   ;;  %v1867_v7 = vshrl.u32 %v1834_v56, 16  ;;  %v1870_v5 = vshll.u32 %v1834_v56, 16  ;;  %v1918_v37 = vshll.u32 %v8581_v31, 16 }
 0x110   :  { %7727 = vmatprep.subr.msk.bf16.mxu0 %vm1090_vm6, %v6628_v35  ;;  %v8586_v35 = vld [vmem:[#allocation2 + $0x2c] sm:$0x1]  ;;  %v1852_v56 = vld [vmem:[#allocation2 + $0x60] sm:$0xf] }
 0x111   :  { %v1869_v11 = vrot.slane %v1867_v7, 4  ;;  %v1872_v33 = vrot.slane %v1870_v5, 5  ;;  %v1920_v52 = vrot.slane %v1918_v37, 5  ;;  %v175_v7 = vld [vmem:[#allocation2 + $0x9c] sm:$0x1]  ;;  %v1893_v5 = vsel %vm8186_vm10, %v1888_v22, %v1892_v24 }
 0x112   :  { %v1932_v26 = vshll.u32 %v8586_v35, 16  ;;  %v1996_v53 = vshll.u32 %v1852_v56, 16  ;;  %v176_v58 = vsel %vm7955_vm5, 0, %v175_v7  ;;  %vm9059_vm5 = vmand %vm178_vm15, %vm116_vm3  ;;  %vm4085_vm3 = vcmask 64512  }
 0x113   :  { %v1873_v15 = vor.u32 %v1872_v33, %v1869_v11  ;;  %177 = vst [vmem:[#allocation2 + $0x9c] sm:$0x1] %v176_v58 }
 0x114   :  { %v1934_v39 = vrot.slane %v1932_v26, 5  ;;  %v1998_v37 = vrot.slane %v1996_v53, 5  ;;  %v8627_v53 = vld [vmem:[%s9856_s1 + $0xc] sm:$0x3] }
 0x115   :  { %v1874_v30 = vrot.slane %v1873_v15, 4  ;;  %v7763_v15 = vld [vmem:[#allocation2 + $0x88] ss:$8 sps:$4 sm:$0xff]  }
 0x116   :  { %7186 = vmatmul.mubr.msk.bf16.gmra.mrb[4].mxu0 %vm1065_vm11, %v6598_v51  ;;  %v1909_v51 = vshrl.u32 %v1840_v17, 16 }
 0x117   :  { %7189 = vmatprep.mubr.msk.bf16.mxu0 %vm1065_vm11, %v6599_v18  ;;  %v1912_v18 = vshll.u32 %v1840_v17, 16 }
 0x118   :  { %v1911_v36 = vrot.slane %v1909_v51, 4  ;;  %v8600_v51 = vld [vmem:[#allocation2 + $0x3c] sm:$0x1] }
 0x119   :  { %v1914_v16 = vrot.slane %v1912_v18, 5  ;;  %v1967_v18 = vrot.slane %v1965_v34, 4  ;;  %v2049_v34 = vshrl.u32 %v1860_v14, 16 }
 0x11b   :  { %v1915_v45 = vor.u32 %v1914_v16, %v1911_v36  ;;  %v1854_v36 = vld [vmem:[#allocation2 + $0x68] sm:$0xf] }
 0x11d   :  { %v1916_v44 = vrot.slane %v1915_v45, 4 }
 0x11e   :  { %7190 = vmatmul.mubr.msk.bf16.gmra.mrb[8].mxu0 %vm1065_vm11, %v6600_v49  ;;  %v1844_v49 = vld [vmem:[#allocation2 + $0x30] sm:$0xf] }
 0x11f   :  { %7193 = vmatprep.mubr.msk.bf16.mxu0 %vm1065_vm11, %v6601_v21  ;;  %v1937_v40 = vshrl.u32 %v1844_v49, 16  ;;  %v1940_v32 = vshll.u32 %v1844_v49, 16  ;;  %v1982_v49 = vshll.u32 %v1850_v4, 16  ;;  %v1921_v20 = vsel %vm8186_vm10, %v1916_v44, %v1920_v52 }
 0x120   :  { %v2010_v52 = vshll.u32 %v1854_v36, 16 }
 0x121   :  { %v1939_v25 = vrot.slane %v1937_v40, 4  ;;  %v1942_v13 = vrot.slane %v1940_v32, 5  ;;  %v1856_v40 = vld [vmem:[#allocation2 + $0x70] sm:$0xf]  ;;  %v1984_v22 = vrot.slane %v1982_v49, 5 }
 0x122   :  { %v1864_v49 = vld [vmem:[#allocation2 + $0x90] sm:$0xf] }
 0x123   :  { %v1943_v11 = vor.u32 %v1942_v13, %v1939_v25 }
 0x125   :  { %v1944_v8 = vrot.slane %v1943_v11, 4 }
 0x126   :  { %7194 = vmatmul.mubr.msk.bf16.gmra.mrb[12].mxu0 %vm1065_vm11, %v6602_v9  ;;  %v1923_v9 = vshrl.u32 %v1842_v55, 16  ;;  %v1979_v55 = vshrl.u32 %v1850_v4, 16 }
 0x127   :  { %7199 = vmatprep.mubr.msk.bf16.mxu0 %vm1065_vm11, %v7756_v19  ;;  %v1906_v19 = vrot.slane %v1904_v63, 5  ;;  %v8609_v63 = vld [vmem:[#allocation2 + $0x44] sm:$0x1]  ;;  %v1949_v13 = vsel %vm8186_vm10, %v1944_v8, %v1948_v62 }
 0x128   :  { %v1925_v21 = vrot.slane %v1923_v9, 4  ;;  %v8641_v62 = vld [vmem:[#allocation2 + $0x84] sm:$0x1] }
 0x129   :  { %v1907_v32 = vsel %vm8186_vm10, %v1902_v3, %v1906_v19  ;;  %v2007_v19 = vshrl.u32 %v1854_v36, 16 }
 0x12a   :  { %v1929_v17 = vor.u32 %v1928_v54, %v1925_v21  ;;  %v6630_v45 = vcombine.low %v1907_v32, %v1921_v20  ;;  %v2021_v21 = vshrl.u32 %v1856_v40, 16  ;;  %v2024_v54 = vshll.u32 %v1856_v40, 16  ;;  %v1862_v40 = vld [vmem:[#allocation2 + $0x88] sm:$0xf] }
 0x12c   :  { %v1930_v16 = vrot.slane %v1929_v17, 4  ;;  %v2023_v26 = vrot.slane %v2021_v21, 4  ;;  %v2026_v4 = vrot.slane %v2024_v54, 5  ;;  %v2063_v21 = vshrl.u32 %v1862_v40, 16 }
 0x12d   :  { %v2066_v54 = vshll.u32 %v1862_v40, 16 }
 0x12e   :  { %7200 = vmatmul.mubr.msk.bf16.vlgmr.msra.gmra.mrb[0].mxu0 %vm1065_vm11, %v7757_v59  ;;  %v1846_v59 = vld [vmem:[#allocation2 + $0x38] sm:$0xf]  ;;  %v1935_v25 = vsel %vm8186_vm10, %v1930_v16, %v1934_v39  ;;  %v8631_v39 = vld [vmem:[#allocation2 + $0x74] sm:$0x1]  ;;  %v8635_v16 = vld [vmem:[#allocation2 + $0x6c] sm:$0x1]  ;;  %v2027_v8 = vor.u32 %v2026_v4, %v2023_v26 }
 0x12f   :  { %7216 = vmatpush3.bf16.msra.mxu0 %v2141_v60  ;;  %7203 = vmatprep.mubr.msk.bf16.mxu0 %vm1065_vm11, %v7758_v1  ;;  %v1879_v60 = vsel %vm8186_vm10, %v1874_v30, %v1878_v41  ;;  %v1968_v1 = vshll.u32 %v1848_v29, 16  ;;  %v1951_v33 = vshrl.u32 %v1846_v59, 16  ;;  %v1954_v28 = vshll.u32 %v1846_v59, 16  ;;  %v1858_v59 = vld [vmem:[#allocation2 + $0x78] sm:$0xf] }
 0x130   :  { %7728 = vmatprep.subr.msk.bf16.mxu0 %vm1090_vm6, %v8564_v2  ;;  %v6629_v47 = vcombine.low %v1879_v60, %v1893_v5  ;;  %v1981_v41 = vrot.slane %v1979_v55, 4  ;;  %v1960_v29 = vshll.u32 %v8600_v51, 16  ;;  %v2035_v17 = vshrl.u32 %v1858_v59, 16 }
 0x131   :  { %v1953_v9 = vrot.slane %v1951_v33, 4  ;;  %v1956_v6 = vrot.slane %v1954_v28, 5  ;;  %v2038_v11 = vshll.u32 %v1858_v59, 16  ;;  %v6631_v33 = vcombine.low %v1935_v25, %v1949_v13 }
 0x132   :  { %v1985_v3 = vor.u32 %v1984_v22, %v1981_v41  ;;  %v2030_v41 = vshll.u32 %v8631_v39, 16  ;;  %v2028_v13 = vrot.slane %v2027_v8, 4  ;;  %v2068_v26 = vrot.slane %v2066_v54, 5  ;;  %v2258_v54 = vld [vmem:[#allocation2 + $0x18] sm:$0xe] }
 0x133   :  { %v1957_v24 = vor.u32 %v1956_v6, %v1953_v9  ;;  %v2037_v9 = vrot.slane %v2035_v17, 4  ;;  %v2040_v6 = vrot.slane %v2038_v11, 5 }
 0x135   :  { %v1958_v28 = vrot.slane %v1957_v24, 4  ;;  %v2041_v24 = vor.u32 %v2040_v6, %v2037_v9  ;;  %v2306_v9 = vrot.slane %v8572_v43, 5 }
 0x136   :  { %7204 = vmatmul.mubr.msk.bf16.gmra.mrb[4].mxu0 %vm1065_vm11, %v7759_v42  ;;  %v1993_v42 = vshrl.u32 %v1852_v56, 16  ;;  %v8620_v56 = vld [vmem:[#allocation2 + $0x5c] sm:$0x1] }
 0x137   :  { %7207 = vmatprep.mubr.msk.bf16.mxu0 %vm1065_vm11, %v7760_v61  ;;  %v1970_v61 = vrot.slane %v1968_v1, 5  ;;  %v2052_v1 = vshll.u32 %v1860_v14, 16  ;;  %v1988_v38 = vshll.u32 %v8620_v56, 16  ;;  %v2042_v11 = vrot.slane %v2041_v24, 4  ;;  %v2260_v24 = vld [vmem:[#allocation2 + $0x28] sm:$0xe] }
 0x138   :  { %v1995_v30 = vrot.slane %v1993_v42, 4  ;;  %v2009_v42 = vrot.slane %v2007_v19, 4  ;;  %v2058_v19 = vshll.u32 %v8641_v62, 16 }
 0x139   :  { %v1971_v2 = vor.u32 %v1970_v61, %v1967_v18  ;;  %v2012_v18 = vrot.slane %v2010_v52, 5  ;;  %v2051_v61 = vrot.slane %v2049_v34, 4  ;;  %v2054_v55 = vrot.slane %v2052_v1, 5 }
 0x13a   :  { %v1999_v60 = vor.u32 %v1998_v37, %v1995_v30  ;;  %v1990_v32 = vrot.slane %v1988_v38, 5  ;;  %v2077_v30 = vshrl.u32 %v1864_v49, 16  ;;  %v2080_v37 = vshll.u32 %v1864_v49, 16 }
 0x13b   :  { %v1972_v7 = vrot.slane %v1971_v2, 4  ;;  %v2055_v22 = vor.u32 %v2054_v55, %v2051_v61  ;;  %v2032_v1 = vrot.slane %v2030_v41, 5 }
 0x13c   :  { %v2000_v58 = vrot.slane %v1999_v60, 4  ;;  %v2079_v60 = vrot.slane %v2077_v30, 4  ;;  %v2082_v52 = vrot.slane %v2080_v37, 5  ;;  %v2310_v30 = vrot.slane %v8576_v48, 5 }
 0x13d   :  { %v2033_v17 = vsel %vm8186_vm10, %v2028_v13, %v2032_v1  ;;  %v2318_v13 = vrot.slane %v8581_v31, 5  ;;  %v2314_v1 = vrot.slane %v8579_v23, 5  ;;  %v6649_v23 = vrot.slane %v2260_v24, 9 }
 0x13e   :  { %7208 = vmatmul.mubr.msk.bf16.gmra.mrb[8].mxu0 %vm1065_vm11, %v7761_v12  ;;  %v1974_v12 = vshll.u32 %v8609_v63, 16  ;;  %v2083_v38 = vor.u32 %v2082_v52, %v2079_v60  ;;  %v200_v60 = vld [vmem:[#allocation3 + $0x18] sm:$0x1]  ;;  %v261_v52 = vld [vmem:[#allocation3 + $0x1c] sm:$0x1]  ;;  %v2322_v31 = vrot.slane %v8586_v35, 5 }
 0x13f   :  { %7211 = vmatprep.mubr.msk.bf16.mxu0 %vm1065_vm11, %v7762_v50  ;;  %v8614_v50 = vld [vmem:[#allocation2 + $0x64] sm:$0x1]  ;;  %v2263_v35 = vld [vmem:[#allocation2 + $0x40] sm:$0xe] }
 0x140   :  { %v1976_v5 = vrot.slane %v1974_v12, 5  ;;  %v2002_v44 = vshll.u32 %v8614_v50, 16  ;;  %v2013_v12 = vor.u32 %v2012_v18, %v2009_v42  ;;  %v2257_v18 = vld [vmem:[#allocation2 + $0x10] sm:$0xe] }
 0x141   :  { %v6646_v6 = vrot.slane %v2257_v18, 9  ;;  %v6652_v18 = vrot.slane %v2263_v35, 9  ;;  %v2737_v35 = vld [vmem:[#allocation2 + $0x20] sm:$0xf] }
 0x142   :  { %v2004_v20 = vrot.slane %v2002_v44, 5  ;;  %v1977_v36 = vsel %vm8186_vm10, %v1972_v7, %v1976_v5  ;;  %v2014_v34 = vrot.slane %v2013_v12, 4  ;;  %v2056_v5 = vrot.slane %v2055_v22, 4  ;;  %v2259_v22 = vld [vmem:[#allocation2 + $0x20] sm:$0xe] }
 0x143   :  { %v2065_v44 = vrot.slane %v2063_v21, 4  ;;  %v2311_v43 = vsel %vm8385_vm14, %v6646_v6, %v2310_v30  ;;  %v2267_v6 = vld [vmem:[#allocation2 + $0x70] sm:$0xe] }
 0x144   :  { %v2005_v2 = vsel %vm8186_vm10, %v2000_v58, %v2004_v20  ;;  %v2256_v58 = vld [vmem:[#allocation2 + $0x8] sm:$0xe] }
 0x145   :  { %v6645_v8 = vrot.slane %v2256_v58, 9 }
 0x146   :  { %7212 = vmatmul.mubr.msk.bf16.gmra.mrb[12].mxu0 %vm1065_vm11, %v7763_v15  ;;  %v1962_v15 = vrot.slane %v1960_v29, 5  ;;  %v8647_v29 = vld [vmem:[#allocation2 + $0x7c] sm:$0x1] }
 0x147   :  { %7217 = vmatprep.mubr.msk.bf16.mxu0 %vm1065_vm11, %v6629_v47  ;;  %v1986_v47 = vrot.slane %v1985_v3, 4  ;;  %v2044_v7 = vshll.u32 %v8647_v29, 16  ;;  %v8655_v3 = vld [vmem:[#allocation2 + $0x8c] sm:$0x1]  ;;  %v2307_v41 = vsel %vm8385_vm14, %v6645_v8, %v2306_v9  ;;  %v2338_v8 = vrot.slane %v8620_v56, 5 }
 0x148   :  { %v2072_v20 = vshll.u32 %v8655_v3, 16  ;;  %v6662_v21 = vcombine.low %v2307_v41, %v2311_v43  ;;  %v6656_v56 = vrot.slane %v2267_v6, 9  ;;  %v2358_v41 = vrot.slane %v8641_v62, 5  ;;  %v8788_v6 = vld [vmem:[#allocation2 + $0x24] sm:$0x1] }
 0x149   :  { %v1991_v25 = vsel %vm8186_vm10, %v1986_v47, %v1990_v32  ;;  %v2046_v55 = vrot.slane %v2044_v7, 5  ;;  %v2069_v47 = vor.u32 %v2068_v26, %v2065_v44  ;;  %v262_v26 = vsel %vm8713_vm2, 0, %v261_v52 }
 0x14a   :  { %v6633_v59 = vcombine.low %v1991_v25, %v2005_v2  ;;  %v2074_v2 = vrot.slane %v2072_v20, 5  ;;  %v6648_v25 = vrot.slane %v2259_v22, 9  ;;  %263 = vst [vmem:[#allocation3 + $0x1c] sm:$0x1] %v262_v26  ;;  %v2330_v20 = vrot.slane %v8600_v51, 5 }
 0x14b   :  { %v2070_v37 = vrot.slane %v2069_v47, 4  ;;  %v2342_v47 = vrot.slane %v8614_v50, 5  ;;  %v2346_v22 = vrot.slane %v8635_v16, 5 }
 0x14c   :  { %v2319_v44 = vsel %vm8385_vm14, %v6648_v25, %v2318_v13  ;;  %v2270_v13 = vld [vmem:[#allocation2 + $0x88] sm:$0xe] }
 0x14d   :  { %v2075_v48 = vsel %vm8186_vm10, %v2070_v37, %v2074_v2  ;;  %v2350_v37 = vrot.slane %v8631_v39, 5  ;;  %v2268_v2 = vld [vmem:[#allocation2 + $0x78] sm:$0xe] }
 0x14e   :  { %7218 = vmatmul.mubr.msk.bf16.vlgmr.msra.gmra.mrb[0].mxu0 %vm1065_vm11, %v6630_v45  ;;  %v2016_v45 = vshll.u32 %v8635_v16, 16 }
 0x14f   :  { %7234 = vmatpush3.bf16.msra.mxu0 %v2419_v57  ;;  %7221 = vmatprep.mubr.msk.bf16.mxu0 %vm1065_vm11, %v6631_v33  ;;  %v1963_v57 = vsel %vm8186_vm10, %v1958_v28, %v1962_v15  ;;  %v2060_v33 = vrot.slane %v2058_v19, 5  ;;  %v8659_v28 = vld [vmem:[#allocation2 + $0x94] sm:$0x1] }
 0x150   :  { %7729 = vmatprep.subr.msk.bf16.mxu0 %vm1090_vm6, %v8627_v53  ;;  %v6632_v14 = vcombine.low %v1963_v57, %v1977_v36  ;;  %v2018_v4 = vrot.slane %v2016_v45, 5  ;;  %v2086_v42 = vshll.u32 %v8659_v28, 16  ;;  %v2047_v36 = vsel %vm8186_vm10, %v2042_v11, %v2046_v55  ;;  %v2264_v55 = vld [vmem:[#allocation2 + $0x58] sm:$0xe] }
 0x151   :  { %v2061_v49 = vsel %vm8186_vm10, %v2056_v5, %v2060_v33  ;;  %v2084_v57 = vrot.slane %v2083_v38, 4  ;;  %v2618_v33 = vsel %vm1090_vm6, %v8627_v53, 0  ;;  %v2323_v38 = vsel %vm8385_vm14, %v6649_v23, %v2322_v31  ;;  %v2735_v31 = vld [vmem:[#allocation2 + $0x18] sm:$0xf] }
 0x152   :  { %v2019_v61 = vsel %vm8186_vm10, %v2014_v34, %v2018_v4  ;;  %v6635_v40 = vcombine.low %v2047_v36, %v2061_v49  ;;  %v2088_v32 = vrot.slane %v2086_v42, 5  ;;  %v6647_v34 = vrot.slane %v2258_v54, 9  ;;  %v2262_v42 = vld [vmem:[#allocation2 + $0x38] sm:$0xe]  ;;  %v6695_v49 = vld [vmem:[%s9856_s1 + $0xe] sm:$0x3] }
 0x153   :  { %v6634_v15 = vcombine.low %v2019_v61, %v2033_v17  ;;  %v2265_v17 = vld [vmem:[#allocation2 + $0x60] sm:$0xe]  ;;  %v2334_v61 = vrot.slane %v8609_v63, 5  ;;  %v6651_v53 = vrot.slane %v2262_v42, 9  ;;  %v6653_v36 = vrot.slane %v2264_v55, 9 }
 0x154   :  { %v2089_v12 = vsel %vm8186_vm10, %v2084_v57, %v2088_v32  ;;  %v2315_v4 = vsel %vm8385_vm14, %v6647_v34, %v2314_v1  ;;  %v2266_v32 = vld [vmem:[#allocation2 + $0x68] sm:$0xe]  ;;  %v7764_v1 = vld [vmem:[#allocation2 + $0x10] ss:$8 sps:$4 sm:$0xff]   ;;  %v3040_v23 = vsel %vm1090_vm6, %v6695_v49, 0  ;;  %v2780_v26 = vshrl.u32 %v2735_v31, 16 }
 0x155   :  { %v6636_v45 = vcombine.low %v2075_v48, %v2089_v12  ;;  %v6663_v11 = vcombine.low %v2315_v4, %v2319_v44  ;;  %v2335_v63 = vsel %vm8385_vm14, %v6652_v18, %v2334_v61  ;;  %v2331_v50 = vsel %vm8385_vm14, %v6651_v53, %v2330_v20  ;;  %v2733_v44 = vld [vmem:[#allocation2 + $0x10] sm:$0xf]  ;;  %v2739_v4 = vld [vmem:[#allocation2 + $0x28] sm:$0xf]  ;;  %v8781_v61 = vld [vmem:[#allocation2 + $0x14] sm:$0x1] }
 0x156   :  { %7222 = vmatmul.mubr.msk.bf16.gmra.mrb[4].mxu0 %vm1065_vm11, %v6632_v14  ;;  %v2261_v14 = vld [vmem:[#allocation2 + $0x30] sm:$0xe]  ;;  %v6665_v57 = vcombine.low %v2331_v50, %v2335_v63  ;;  %v2339_v51 = vsel %vm8385_vm14, %v6653_v36, %v2338_v8  ;;  %v6655_v43 = vrot.slane %v2266_v32, 9  ;;  %v2354_v48 = vrot.slane %v8647_v29, 5  ;;  %v7767_v18 = vld [vmem:[#allocation2 + $0x40] ss:$8 sps:$4 sm:$0xff]  }
 0x157   :  { %7225 = vmatprep.mubr.msk.bf16.mxu0 %vm1065_vm11, %v6633_v59  ;;  %v6650_v19 = vrot.slane %v2261_v14, 9  ;;  %v2326_v59 = vrot.slane %v8588_v46, 5  ;;  %v201_v46 = vsel %vm8688_vm1, 0, %v200_v60  ;;  %v6657_v14 = vrot.slane %v2268_v2, 9  ;;  %v8784_v53 = vld [vmem:[#allocation2 + $0x1c] sm:$0x1] }
 0x158   :  { %202 = vst [vmem:[#allocation3 + $0x18] sm:$0x1] %v201_v46  ;;  %v2347_v54 = vsel %vm8385_vm14, %v6655_v43, %v2346_v22  ;;  %v6659_v29 = vrot.slane %v2270_v13, 9  ;;  %v7766_v46 = vld [vmem:[#allocation2 + $0x30] ss:$8 sps:$4 sm:$0xff]   ;;  %v2794_v42 = vshrl.u32 %v2737_v35, 16 }
 0x159   :  { %v2327_v0 = vsel %vm8385_vm14, %v6650_v19, %v2326_v59  ;;  %v2355_v62 = vsel %vm8385_vm14, %v6657_v14, %v2354_v48  ;;  %v2366_v19 = vrot.slane %v8659_v28, 5  ;;  %v2362_v59 = vrot.slane %v8655_v3, 5  ;;  %v7765_v28 = vld [vmem:[#allocation2 + $0x20] ss:$8 sps:$4 sm:$0xff]   ;;  %v8775_v3 = vld [vmem:[%s9856_s1 + $0x10] sm:$0x3] }
 0x15a   :  { %v6664_v58 = vcombine.low %v2323_v38, %v2327_v0  ;;  %v2783_v0 = vshll.u32 %v2735_v31, 16  ;;  %v2808_v55 = vshrl.u32 %v2739_v4, 16  ;;  %v2743_v8 = vld [vmem:[#allocation2 + $0x38] sm:$0xf]  ;;  %v2775_v63 = vshll.u32 %v8781_v61, 16 }
 0x15b   :  { %v2363_v52 = vsel %vm8385_vm14, %v6659_v29, %v2362_v59  ;;  %v2796_v50 = vrot.slane %v2794_v42, 4  ;;  %v2839_v2 = vshll.u32 %v2743_v8, 16  ;;  %v2745_v43 = vld [vmem:[#allocation2 + $0x40] sm:$0xf]  ;;  %v2803_v48 = vshll.u32 %v8788_v6, 16 }
 0x15c   :  { %v2785_v38 = vrot.slane %v2783_v0, 5  ;;  %v2777_v22 = vrot.slane %v2775_v63, 5  ;;  %v2850_v59 = vshrl.u32 %v2745_v43, 16 }
 0x15d   :  { %v2841_v29 = vrot.slane %v2839_v2, 5  ;;  %v2805_v31 = vrot.slane %v2803_v48, 5  ;;  %v3318_v2 = vsel %vm1090_vm6, %v8775_v3, 0  ;;  %v8821_v48 = vld [vmem:[#allocation2 + $0x4c] sm:$0x1] }
 0x15e   :  { %7226 = vmatmul.mubr.msk.bf16.gmra.mrb[8].mxu0 %vm1065_vm11, %v6634_v15  ;;  %v6654_v15 = vrot.slane %v2265_v17, 9  ;;  %v2766_v17 = vshrl.u32 %v2733_v44, 16 }
 0x15f   :  { %7229 = vmatprep.mubr.msk.bf16.mxu0 %vm1065_vm11, %v6635_v40  ;;  %v2269_v40 = vld [vmem:[#allocation2 + $0x80] sm:$0xe] }
 0x160   :  { %v2343_v9 = vsel %vm8385_vm14, %v6654_v15, %v2342_v47  ;;  %v6658_v12 = vrot.slane %v2269_v40, 9  ;;  %v7768_v15 = vld [vmem:[#allocation2 + $0x60] ss:$8 sps:$4 sm:$0xff]   ;;  %v2741_v47 = vld [vmem:[#allocation2 + $0x30] sm:$0xf]  ;;  %v2768_v20 = vrot.slane %v2766_v17, 4 }
 0x161   :  { %v6666_v30 = vcombine.low %v2339_v51, %v2343_v9  ;;  %v2810_v51 = vrot.slane %v2808_v55, 4 }
 0x162   :  { %v2359_v39 = vsel %vm8385_vm14, %v6658_v12, %v2358_v41  ;;  %v2789_v41 = vshll.u32 %v8784_v53, 16 }
 0x163   :  { %v6668_v24 = vcombine.low %v2355_v62, %v2359_v39  ;;  %v2747_v39 = vld [vmem:[#allocation2 + $0x48] sm:$0xf] }
 0x166   :  { %7230 = vmatmul.mubr.msk.bf16.gmra.mrb[12].mxu0 %vm1065_vm11, %v6636_v45  ;;  %v2351_v45 = vsel %vm8385_vm14, %v6656_v56, %v2350_v37  ;;  %v2825_v56 = vshll.u32 %v2741_v47, 16  ;;  %v2836_v37 = vshrl.u32 %v2743_v8, 16  ;;  %v8807_v8 = vld [vmem:[#allocation2 + $0x44] sm:$0x1] }
 0x167   :  { %7235 = vmatprep.mubr.msk.bf16.mxu0 %vm1065_vm11, %v6662_v21  ;;  %v2271_v21 = vld [vmem:[#allocation2 + $0x90] sm:$0xe]  ;;  %v6667_v25 = vcombine.low %v2347_v54, %v2351_v45 }
 0x168   :  { %v6660_v16 = vrot.slane %v2271_v21, 9  ;;  %v7769_v21 = vld [vmem:[#allocation2 + $0x70] ss:$8 sps:$4 sm:$0xff]   ;;  %v2827_v13 = vrot.slane %v2825_v56, 5  ;;  %v8812_v56 = vld [vmem:[#allocation2 + $0x64] sm:$0x1] }
 0x16a   :  { %v2367_v60 = vsel %vm8385_vm14, %v6660_v16, %v2366_v19  ;;  %v7770_v16 = vld [vmem:[#allocation2 + $0x80] ss:$8 sps:$4 sm:$0xff]   ;;  %v2838_v19 = vrot.slane %v2836_v37, 4 }
 0x16b   :  { %v6669_v34 = vcombine.low %v2363_v52, %v2367_v60  ;;  %v2853_v60 = vshll.u32 %v2745_v43, 16  ;;  %v8818_v43 = vld [vmem:[#allocation2 + $0x6c] sm:$0x1] }
 0x16c   :  { %v2842_v42 = vor.u32 %v2841_v29, %v2838_v19  ;;  %v2753_v19 = vld [vmem:[#allocation2 + $0x70] sm:$0xf] }
 0x16e   :  { %7236 = vmatmul.mubr.msk.bf16.vlgmr.msra.gmra.mrb[0].mxu0 %vm1065_vm11, %v6663_v11  ;;  %v2769_v11 = vshll.u32 %v2733_v44, 16  ;;  %v2749_v44 = vld [vmem:[#allocation2 + $0x60] sm:$0xf] }
 0x16f   :  { %7252 = vmatpush3.bf16.msra.mxu0 %v2618_v33  ;;  %7239 = vmatprep.mubr.msk.bf16.mxu0 %vm1065_vm11, %v6664_v58  ;;  %v2782_v33 = vrot.slane %v2780_v26, 4  ;;  %v2797_v58 = vshll.u32 %v2737_v35, 16 }
 0x170   :  { %7730 = vmatprep.subr.msk.bf16.mxu0 %vm1090_vm6, %v6695_v49  ;;  %v2811_v49 = vshll.u32 %v2739_v4, 16  ;;  %v2771_v36 = vrot.slane %v2769_v11, 5  ;;  %v8801_v11 = vld [vmem:[#allocation2 + $0x3c] sm:$0x1] }
 0x171   :  { %v2786_v9 = vor.u32 %v2785_v38, %v2782_v33  ;;  %v2799_v40 = vrot.slane %v2797_v58, 5  ;;  %v2852_v58 = vrot.slane %v2850_v59, 4 }
 0x172   :  { %v2813_v32 = vrot.slane %v2811_v49, 5  ;;  %v2772_v12 = vor.u32 %v2771_v36, %v2768_v20  ;;  %v2845_v36 = vshll.u32 %v8801_v11, 16 }
 0x173   :  { %v2787_v14 = vrot.slane %v2786_v9, 4  ;;  %v2800_v54 = vor.u32 %v2799_v40, %v2796_v50  ;;  %v7771_v50 = vld [vmem:[#allocation2 + $0x90] ss:$8 sps:$4 sm:$0xff]  }
 0x174   :  { %v2773_v52 = vrot.slane %v2772_v12, 4  ;;  %v2843_v12 = vrot.slane %v2842_v42, 4 }
 0x175   :  { %v2801_v4 = vrot.slane %v2800_v54, 4 }
 0x176   :  { %7240 = vmatmul.mubr.msk.bf16.gmra.mrb[4].mxu0 %vm1065_vm11, %v6665_v57  ;;  %v8790_v57 = vld [vmem:[#allocation2 + $0x2c] sm:$0x1]  ;;  %v2778_v20 = vsel %vm8186_vm10, %v2773_v52, %v2777_v22  ;;  %v2755_v22 = vld [vmem:[#allocation2 + $0x78] sm:$0xf] }
 0x177   :  { %7243 = vmatprep.mubr.msk.bf16.mxu0 %vm1065_vm11, %v6666_v30  ;;  %v2822_v30 = vshrl.u32 %v2741_v47, 16  ;;  %v2817_v45 = vshll.u32 %v8790_v57, 16  ;;  %v2881_v47 = vshll.u32 %v2749_v44, 16  ;;  %v2806_v37 = vsel %vm8186_vm10, %v2801_v4, %v2805_v31 }
 0x178   :  { %v2920_v29 = vshrl.u32 %v2755_v22, 16  ;;  %v2923_v59 = vshll.u32 %v2755_v22, 16  ;;  %v2906_v4 = vshrl.u32 %v2753_v19, 16 }
 0x179   :  { %v2824_v62 = vrot.slane %v2822_v30, 4  ;;  %v2859_v30 = vshll.u32 %v8807_v8, 16 }
 0x17b   :  { %v2828_v33 = vor.u32 %v2827_v13, %v2824_v62  ;;  %v2873_v62 = vshll.u32 %v8821_v48, 16  ;;  %v2759_v13 = vld [vmem:[#allocation2 + $0x88] sm:$0xf] }
 0x17e   :  { %7244 = vmatmul.mubr.msk.bf16.gmra.mrb[8].mxu0 %vm1065_vm11, %v6667_v25  ;;  %v2814_v25 = vor.u32 %v2813_v32, %v2810_v51  ;;  %v2829_v32 = vrot.slane %v2828_v33, 4  ;;  %v2922_v33 = vrot.slane %v2920_v29, 4 }
 0x17f   :  { %7247 = vmatprep.mubr.msk.bf16.mxu0 %vm1065_vm11, %v6668_v24  ;;  %v2751_v24 = vld [vmem:[#allocation2 + $0x68] sm:$0xf] }
 0x180   :  { %v2892_v26 = vshrl.u32 %v2751_v24, 16  ;;  %v2895_v0 = vshll.u32 %v2751_v24, 16  ;;  %v2815_v17 = vrot.slane %v2814_v25, 4  ;;  %v2847_v25 = vrot.slane %v2845_v36, 5 }
 0x182   :  { %v2894_v63 = vrot.slane %v2892_v26, 4  ;;  %v2897_v9 = vrot.slane %v2895_v0, 5  ;;  %v2951_v26 = vshll.u32 %v2759_v13, 16  ;;  %v2875_v0 = vrot.slane %v2873_v62, 5 }
 0x184   :  { %v2953_v36 = vrot.slane %v2951_v26, 5 }
 0x186   :  { %7248 = vmatmul.mubr.msk.bf16.gmra.mrb[12].mxu0 %vm1065_vm11, %v6669_v34  ;;  %v2791_v34 = vrot.slane %v2789_v41, 5 }
 0x187   :  { %7253 = vmatprep.mubr.msk.bf16.mxu0 %vm1065_vm11, %v7764_v1  ;;  %v8796_v1 = vld [vmem:[#allocation2 + $0x34] sm:$0x1] }
 0x188   :  { %v2792_v35 = vsel %vm8186_vm10, %v2787_v14, %v2791_v34  ;;  %v2831_v38 = vshll.u32 %v8796_v1, 16  ;;  %v2887_v34 = vshll.u32 %v8812_v56, 16 }
 0x189   :  { %v6696_v40 = vcombine.low %v2778_v20, %v2792_v35 }
 0x18a   :  { %v2833_v14 = vrot.slane %v2831_v38, 5  ;;  %v2925_v38 = vrot.slane %v2923_v59, 5 }
 0x18c   :  { %v2834_v24 = vsel %vm8186_vm10, %v2829_v32, %v2833_v14  ;;  %v8843_v14 = vld [vmem:[#allocation2 + $0x8c] sm:$0x1] }
 0x18e   :  { %7254 = vmatmul.mubr.msk.bf16.vlgmr.msra.gmra.mrb[0].mxu0 %vm1065_vm11, %v7765_v28  ;;  %v2864_v28 = vshrl.u32 %v2747_v39, 16 }
 0x18f   :  { %7270 = vmatpush3.bf16.msra.mxu0 %v3040_v23  ;;  %7257 = vmatprep.mubr.msk.bf16.mxu0 %vm1065_vm11, %v7766_v46  ;;  %v2867_v23 = vshll.u32 %v2747_v39, 16  ;;  %v2819_v46 = vrot.slane %v2817_v45, 5 }
 0x190   :  { %7731 = vmatprep.subr.msk.bf16.mxu0 %vm1090_vm6, %v8775_v3  ;;  %v2866_v55 = vrot.slane %v2864_v28, 4  ;;  %v2898_v3 = vor.u32 %v2897_v9, %v2894_v63  ;;  %v2901_v28 = vshll.u32 %v8818_v43, 16  ;;  %v2763_v63 = vld [vmem:[#allocation2 + $0x98] sm:$0xf] }
 0x191   :  { %v2869_v49 = vrot.slane %v2867_v23, 5  ;;  %v2820_v51 = vsel %vm8186_vm10, %v2815_v17, %v2819_v46  ;;  %v2757_v23 = vld [vmem:[#allocation2 + $0x80] sm:$0xf]  ;;  %v2909_v17 = vshll.u32 %v2753_v19, 16 }
 0x192   :  { %v6697_v54 = vcombine.low %v2806_v37, %v2820_v51  ;;  %v2899_v35 = vrot.slane %v2898_v3, 4  ;;  %v2934_v42 = vshrl.u32 %v2757_v23, 16  ;;  %v2908_v51 = vrot.slane %v2906_v4, 4  ;;  %v8841_v37 = vld [vmem:[#allocation2 + $0x7c] sm:$0x1] }
 0x193   :  { %v2870_v45 = vor.u32 %v2869_v49, %v2866_v55  ;;  %v2889_v55 = vrot.slane %v2887_v34, 5  ;;  %v2761_v49 = vld [vmem:[#allocation2 + $0x90] sm:$0xf]  ;;  %v2911_v32 = vrot.slane %v2909_v17, 5 }
 0x195   :  { %v2871_v31 = vrot.slane %v2870_v45, 4  ;;  %v2965_v45 = vshll.u32 %v2761_v49, 16 }
 0x196   :  { %7258 = vmatmul.mubr.msk.bf16.gmra.mrb[4].mxu0 %vm1065_vm11, %v7767_v18  ;;  %v2855_v18 = vrot.slane %v2853_v60, 5  ;;  %v2848_v60 = vsel %vm8186_vm10, %v2843_v12, %v2847_v25  ;;  %v2926_v12 = vor.u32 %v2925_v38, %v2922_v33  ;;  %v8857_v33 = vld [vmem:[#allocation2 + $0x9c] sm:$0x1] }
 0x197   :  { %7261 = vmatprep.mubr.msk.bf16.mxu0 %vm1065_vm11, %v7768_v15  ;;  %v2878_v15 = vshrl.u32 %v2749_v44, 16  ;;  %v2948_v44 = vshrl.u32 %v2759_v13, 16  ;;  %v2876_v9 = vsel %vm8186_vm10, %v2871_v31, %v2875_v0  ;;  %v2912_v13 = vor.u32 %v2911_v32, %v2908_v51  ;;  %v8855_v0 = vld [vmem:[#allocation2 + $0x94] sm:$0x1] }
 0x198   :  { %v2856_v41 = vor.u32 %v2855_v18, %v2852_v58  ;;  %v2937_v58 = vshll.u32 %v2757_v23, 16  ;;  %v6698_v18 = vcombine.low %v2834_v24, %v2848_v60  ;;  %v2929_v24 = vshll.u32 %v8841_v37, 16 }
 0x199   :  { %v2880_v39 = vrot.slane %v2878_v15, 4  ;;  %v2950_v20 = vrot.slane %v2948_v44, 4  ;;  %v2927_v29 = vrot.slane %v2926_v12, 4  ;;  %v2957_v60 = vshll.u32 %v8843_v14, 16  ;;  %v3155_v12 = vld [vmem:[#allocation2 + $0x10] sm:$0xe] }
 0x19a   :  { %v2857_v52 = vrot.slane %v2856_v41, 4  ;;  %v2936_v41 = vrot.slane %v2934_v42, 4  ;;  %v2939_v22 = vrot.slane %v2937_v58, 5  ;;  %v2967_v34 = vrot.slane %v2965_v45, 5 }
 0x19b   :  { %v2954_v25 = vor.u32 %v2953_v36, %v2950_v20  ;;  %v2913_v44 = vrot.slane %v2912_v13, 4  ;;  %v2931_v26 = vrot.slane %v2929_v24, 5  ;;  %v2959_v17 = vrot.slane %v2957_v60, 5  ;;  %v3156_v20 = vld [vmem:[#allocation2 + $0x18] sm:$0xe] }
 0x19c   :  { %v2940_v59 = vor.u32 %v2939_v22, %v2936_v41  ;;  %v2971_v38 = vshll.u32 %v8855_v0, 16  ;;  %v6713_v41 = vrot.slane %v3156_v20, 9  ;;  %v3209_v22 = vrot.slane %v8784_v53, 5  ;;  %v3157_v13 = vld [vmem:[#allocation2 + $0x20] sm:$0xe] }
 0x19d   :  { %v2932_v42 = vsel %vm8186_vm10, %v2927_v29, %v2931_v26  ;;  %v3205_v45 = vrot.slane %v8781_v61, 5  ;;  %v3217_v61 = vrot.slane %v8790_v57, 5  ;;  %v3159_v29 = vld [vmem:[#allocation2 + $0x30] sm:$0xe]  ;;  %v3225_v60 = vrot.slane %v8801_v11, 5 }
 0x19e   :  { %7262 = vmatmul.mubr.msk.bf16.gmra.mrb[8].mxu0 %vm1065_vm11, %v7769_v21  ;;  %v2883_v21 = vrot.slane %v2881_v47, 5  ;;  %v2903_v47 = vrot.slane %v2901_v28, 5  ;;  %v2941_v4 = vrot.slane %v2940_v59, 4  ;;  %v3164_v11 = vld [vmem:[#allocation2 + $0x68] sm:$0xe] }
 0x19f   :  { %7265 = vmatprep.mubr.msk.bf16.mxu0 %vm1065_vm11, %v7770_v16  ;;  %v2861_v16 = vrot.slane %v2859_v30, 5  ;;  %v3166_v20 = vld [vmem:[#allocation2 + $0x78] sm:$0xe] }
 0x1a0   :  { %v2884_v46 = vor.u32 %v2883_v21, %v2880_v39  ;;  %v2904_v30 = vsel %vm8186_vm10, %v2899_v35, %v2903_v47  ;;  %v2976_v39 = vshrl.u32 %v2763_v63, 16  ;;  %v2979_v21 = vshll.u32 %v2763_v63, 16 }
 0x1a1   :  { %v2862_v15 = vsel %vm8186_vm10, %v2857_v52, %v2861_v16  ;;  %v8849_v16 = vld [vmem:[#allocation2 + $0x84] sm:$0x1] }
 0x1a2   :  { %v6699_v62 = vcombine.low %v2862_v15, %v2876_v9  ;;  %v2978_v28 = vrot.slane %v2976_v39, 4  ;;  %v2981_v23 = vrot.slane %v2979_v21, 5  ;;  %v2943_v31 = vshll.u32 %v8849_v16, 16 }
 0x1a3   :  { %v2973_v9 = vrot.slane %v2971_v38, 5 }
 0x1a6   :  { %7266 = vmatmul.mubr.msk.bf16.gmra.mrb[12].mxu0 %vm1065_vm11, %v7771_v50  ;;  %v2885_v50 = vrot.slane %v2884_v46, 4  ;;  %v2955_v46 = vrot.slane %v2954_v25, 4  ;;  %v3158_v25 = vld [vmem:[#allocation2 + $0x28] sm:$0xe] }
 0x1a7   :  { %7271 = vmatprep.mubr.msk.bf16.mxu0 %vm1065_vm11, %v6696_v40  ;;  %v8837_v40 = vld [vmem:[#allocation2 + $0x74] sm:$0x1] }
 0x1a8   :  { %v2890_v3 = vsel %vm8186_vm10, %v2885_v50, %v2889_v55  ;;  %v2985_v55 = vshll.u32 %v8857_v33, 16  ;;  %v2960_v15 = vsel %vm8186_vm10, %v2955_v46, %v2959_v17  ;;  %v3161_v46 = vld [vmem:[#allocation2 + $0x40] sm:$0xe] }
 0x1a9   :  { %v6700_v19 = vcombine.low %v2890_v3, %v2904_v30 }
 0x1aa   :  { %v2987_v30 = vrot.slane %v2985_v55, 5  ;;  %v3241_v55 = vrot.slane %v8818_v43, 5 }
 0x1ae   :  { %7272 = vmatmul.mubr.msk.bf16.vlgmr.msra.gmra.mrb[0].mxu0 %vm1065_vm11, %v6697_v54  ;;  %v2915_v54 = vshll.u32 %v8837_v40, 16 }
 0x1af   :  { %7288 = vmatpush3.bf16.msra.mxu0 %v3318_v2  ;;  %7275 = vmatprep.mubr.msk.bf16.mxu0 %vm1065_vm11, %v6698_v18  ;;  %v2962_v2 = vshrl.u32 %v2761_v49, 16  ;;  %v2982_v18 = vor.u32 %v2981_v23, %v2978_v28  ;;  %v2945_v49 = vrot.slane %v2943_v31, 5  ;;  %v6716_v28 = vrot.slane %v3159_v29, 9  ;;  %v194_v29 = vld [vmem:[#allocation3 + $0x8] sm:$0x1] }
 0x1b0   :  { %v2917_v35 = vrot.slane %v2915_v54, 5  ;;  %v3210_v54 = vsel %vm8385_vm14, %v6713_v41, %v3209_v22  ;;  %v3221_v23 = vrot.slane %v8796_v1, 5  ;;  %v3229_v1 = vrot.slane %v8807_v8, 5 }
 0x1b1   :  { %v2964_v52 = vrot.slane %v2962_v2, 4  ;;  %v2946_v63 = vsel %vm8186_vm10, %v2941_v4, %v2945_v49  ;;  %v2983_v32 = vrot.slane %v2982_v18, 4  ;;  %v6712_v2 = vrot.slane %v3155_v12, 9 }
 0x1b2   :  { %v2918_v47 = vsel %vm8186_vm10, %v2913_v44, %v2917_v35  ;;  %v6702_v50 = vcombine.low %v2946_v63, %v2960_v15  ;;  %v3162_v44 = vld [vmem:[#allocation2 + $0x48] sm:$0xe]  ;;  %v3222_v4 = vsel %vm8385_vm14, %v6716_v28, %v3221_v23  ;;  %v6721_v18 = vrot.slane %v3164_v11, 9  ;;  %v197_v23 = vld [vmem:[#allocation3 + $0x10] sm:$0x1] }
 0x1b3   :  { %v2968_v58 = vor.u32 %v2967_v34, %v2964_v52  ;;  %v6701_v36 = vcombine.low %v2918_v47, %v2932_v42  ;;  %v2988_v21 = vsel %vm8186_vm10, %v2983_v32, %v2987_v30  ;;  %v3206_v53 = vsel %vm8385_vm14, %v6712_v2, %v3205_v45 }
 0x1b4   :  { %v6729_v24 = vcombine.low %v3206_v53, %v3210_v54  ;;  %v6714_v52 = vrot.slane %v3157_v13, 9  ;;  %v3213_v34 = vrot.slane %v8788_v6, 5  ;;  %v6718_v6 = vrot.slane %v3161_v46, 9  ;;  %v3170_v54 = vld [vmem:[#allocation2 + $0x98] sm:$0xe] }
 0x1b5   :  { %v2969_v51 = vrot.slane %v2968_v58, 4  ;;  %v6719_v38 = vrot.slane %v3162_v44, 9  ;;  %v3233_v42 = vrot.slane %v8821_v48, 5  ;;  %v3163_v58 = vld [vmem:[#allocation2 + $0x60] sm:$0xe]  ;;  %v3237_v15 = vrot.slane %v8812_v56, 5 }
 0x1b6   :  { %7276 = vmatmul.mubr.msk.bf16.gmra.mrb[4].mxu0 %vm1065_vm11, %v6699_v62  ;;  %v3160_v62 = vld [vmem:[#allocation2 + $0x38] sm:$0xe]  ;;  %v3214_v26 = vsel %vm8385_vm14, %v6714_v52, %v3213_v34  ;;  %v6720_v49 = vrot.slane %v3163_v58, 9  ;;  %v3230_v47 = vsel %vm8385_vm14, %v6718_v6, %v3229_v1  ;;  %v3242_v48 = vsel %vm8385_vm14, %v6721_v18, %v3241_v55  ;;  %v264_v52 = vld [vmem:[#allocation3 + $0x24] sm:$0x1] }
 0x1b7   :  { %7279 = vmatprep.mubr.msk.bf16.mxu0 %vm1065_vm11, %v6700_v19  ;;  %v2974_v39 = vsel %vm8186_vm10, %v2969_v51, %v2973_v9  ;;  %v6715_v19 = vrot.slane %v3158_v25, 9  ;;  %v6717_v59 = vrot.slane %v3160_v62, 9  ;;  %v3234_v8 = vsel %vm8385_vm14, %v6719_v38, %v3233_v42  ;;  %v3165_v9 = vld [vmem:[#allocation2 + $0x70] sm:$0xe]  ;;  %v3167_v51 = vld [vmem:[#allocation2 + $0x80] sm:$0xe] }
 0x1b8   :  { %v6703_v3 = vcombine.low %v2974_v39, %v2988_v21  ;;  %v6732_v63 = vcombine.low %v3230_v47, %v3234_v8  ;;  %v3238_v43 = vsel %vm8385_vm14, %v6720_v49, %v3237_v15  ;;  %v3249_v56 = vrot.slane %v8841_v37, 5  ;;  %v3169_v37 = vld [vmem:[#allocation2 + $0x90] sm:$0xe]  ;;  %v212_v44 = vld [vmem:[#allocation3 + $0x38] sm:$0x1] }
 0x1b9   :  { %v3218_v31 = vsel %vm8385_vm14, %v6715_v19, %v3217_v61  ;;  %v3226_v57 = vsel %vm8385_vm14, %v6717_v59, %v3225_v60  ;;  %v6733_v32 = vcombine.low %v3238_v43, %v3242_v48  ;;  %v3257_v12 = vrot.slane %v8843_v14, 5  ;;  %v255_v59 = vld [vmem:[#allocation3 + $0xc] sm:$0x1]  ;;  %v203_v60 = vld [vmem:[#allocation3 + $0x20] sm:$0x1] }
 0x1ba   :  { %v6730_v35 = vcombine.low %v3214_v26, %v3218_v31  ;;  %v6731_v17 = vcombine.low %v3222_v4, %v3226_v57  ;;  %v6722_v41 = vrot.slane %v3165_v9, 9  ;;  %v3245_v22 = vrot.slane %v8837_v40, 5  ;;  %v258_v31 = vld [vmem:[#allocation3 + $0x14] sm:$0x1]  ;;  %v273_v26 = vld [vmem:[#allocation3 + $0x3c] sm:$0x1] }
 0x1bb   :  { %v6724_v2 = vrot.slane %v3167_v51, 9  ;;  %v3253_v45 = vrot.slane %v8849_v16, 5  ;;  %v6726_v40 = vrot.slane %v3169_v37, 9  ;;  %v3261_v53 = vrot.slane %v8855_v0, 5  ;;  %v206_v4 = vld [vmem:[#allocation3 + $0x28] sm:$0x1] }
 0x1bc   :  { %v3246_v14 = vsel %vm8385_vm14, %v6722_v41, %v3245_v22  ;;  %v6727_v16 = vrot.slane %v3170_v54, 9  ;;  %v3265_v13 = vrot.slane %v8857_v33, 5  ;;  %v195_v0 = vsel %vm8688_vm1, 0, %v194_v29  ;;  %v215_v38 = vld [vmem:[#allocation3 + $0x40] sm:$0x1] }
 0x1bd   :  { %v3254_v25 = vsel %vm8385_vm14, %v6724_v2, %v3253_v45  ;;  %v256_v33 = vsel %vm8713_vm2, 0, %v255_v59  ;;  %196 = vst [vmem:[#allocation3 + $0x8] sm:$0x1] %v195_v0  ;;  %v204_v34 = vsel %vm8688_vm1, 0, %v203_v60  ;;  %v265_v28 = vsel %vm8713_vm2, 0, %v264_v52 }
 0x1be   :  { %7280 = vmatmul.mubr.msk.bf16.gmra.mrb[8].mxu0 %vm1065_vm11, %v6701_v36  ;;  %v3168_v36 = vld [vmem:[#allocation2 + $0x88] sm:$0xe]  ;;  %v3266_v19 = vsel %vm8385_vm14, %v6727_v16, %v3265_v13  ;;  %257 = vst [vmem:[#allocation3 + $0xc] sm:$0x1] %v256_v33  ;;  %205 = vst [vmem:[#allocation3 + $0x20] sm:$0x1] %v204_v34 }
 0x1bf   :  { %7283 = vmatprep.mubr.msk.bf16.mxu0 %vm1065_vm11, %v6702_v50  ;;  %v6723_v50 = vrot.slane %v3166_v20, 9  ;;  %v6725_v30 = vrot.slane %v3168_v36, 9  ;;  %266 = vst [vmem:[#allocation3 + $0x24] sm:$0x1] %v265_v28  ;;  %v198_v46 = vsel %vm8688_vm1, 0, %v197_v23  ;;  %v259_v57 = vsel %vm8713_vm2, 0, %v258_v31 }
 0x1c0   :  { %199 = vst [vmem:[#allocation3 + $0x10] sm:$0x1] %v198_v46  ;;  %260 = vst [vmem:[#allocation3 + $0x14] sm:$0x1] %v259_v57  ;;  %v213_v11 = vsel %vm8688_vm1, 0, %v212_v44  ;;  %v207_v6 = vsel %vm8688_vm1, 0, %v206_v4 }
 0x1c1   :  { %v3250_v39 = vsel %vm8385_vm14, %v6723_v50, %v3249_v56  ;;  %v3258_v21 = vsel %vm8385_vm14, %v6725_v30, %v3257_v12  ;;  %214 = vst [vmem:[#allocation3 + $0x38] sm:$0x1] %v213_v11  ;;  %208 = vst [vmem:[#allocation3 + $0x28] sm:$0x1] %v207_v6  ;;  %v276_v42 = vld [vmem:[#allocation3 + $0x44] sm:$0x1] }
 0x1c2   :  { %v6734_v62 = vcombine.low %v3246_v14, %v3250_v39  ;;  %v216_v58 = vsel %vm8688_vm1, 0, %v215_v38  ;;  %v277_v18 = vsel %vm8713_vm2, 0, %v276_v42  ;;  %v209_v55 = vld [vmem:[#allocation3 + $0x30] sm:$0x1]  ;;  %v270_v49 = vld [vmem:[#allocation3 + $0x34] sm:$0x1] }
 0x1c3   :  { %217 = vst [vmem:[#allocation3 + $0x40] sm:$0x1] %v216_v58  ;;  %278 = vst [vmem:[#allocation3 + $0x44] sm:$0x1] %v277_v18  ;;  %v230_v15 = vld [vmem:[#allocation3 + $0x68] sm:$0x1] }
 0x1c4   :  { %v210_v47 = vsel %vm8688_vm1, 0, %v209_v55  ;;  %v271_v8 = vsel %vm8713_vm2, 0, %v270_v49  ;;  %v231_v20 = vsel %vm8688_vm1, 0, %v230_v15  ;;  %v291_v48 = vld [vmem:[#allocation3 + $0x6c] sm:$0x1] }
 0x1c5   :  { %211 = vst [vmem:[#allocation3 + $0x30] sm:$0x1] %v210_v47  ;;  %272 = vst [vmem:[#allocation3 + $0x34] sm:$0x1] %v271_v8  ;;  %v292_v36 = vsel %vm8713_vm2, 0, %v291_v48 }
 0x1c6   :  { %7284 = vmatmul.mubr.msk.bf16.gmra.mrb[12].mxu0 %vm1065_vm11, %v6703_v3  ;;  %v6735_v3 = vcombine.low %v3254_v25, %v3258_v21  ;;  %232 = vst [vmem:[#allocation3 + $0x68] sm:$0x1] %v231_v20  ;;  %293 = vst [vmem:[#allocation3 + $0x6c] sm:$0x1] %v292_v36  ;;  %v285_v43 = vld [vmem:[#allocation3 + $0x5c] sm:$0x1] }
 0x1c7   :  { %7289 = vmatprep.mubr.msk.bf16.mxu0 %vm1065_vm11, %v6729_v24  ;;  %v3262_v24 = vsel %vm8385_vm14, %v6726_v40, %v3261_v53  ;;  %v233_v9 = vld [vmem:[#allocation3 + $0x70] sm:$0x1]  ;;  %v286_v51 = vsel %vm8713_vm2, 0, %v285_v43  ;;  %v294_v56 = vld [vmem:[#allocation3 + $0x74] sm:$0x1] }
 0x1c8   :  { %v6736_v61 = vcombine.low %v3262_v24, %v3266_v19  ;;  %287 = vst [vmem:[#allocation3 + $0x5c] sm:$0x1] %v286_v51  ;;  %v295_v30 = vsel %vm8713_vm2, 0, %v294_v56  ;;  %v227_v12 = vld [vmem:[#allocation3 + $0x60] sm:$0x1] }
 0x1c9   :  { %296 = vst [vmem:[#allocation3 + $0x74] sm:$0x1] %v295_v30  ;;  %v288_v41 = vld [vmem:[#allocation3 + $0x64] sm:$0x1]  ;;  %v228_v22 = vsel %vm8688_vm1, 0, %v227_v12 }
 0x1ca   :  { %v289_v2 = vsel %vm8713_vm2, 0, %v288_v41  ;;  %v242_v45 = vld [vmem:[#allocation3 + $0x88] sm:$0x1]  ;;  %v303_v39 = vld [vmem:[#allocation3 + $0x8c] sm:$0x1] }
 0x1cb   :  { %229 = vst [vmem:[#allocation3 + $0x60] sm:$0x1] %v228_v22  ;;  %290 = vst [vmem:[#allocation3 + $0x64] sm:$0x1] %v289_v2  ;;  %v243_v21 = vsel %vm8688_vm1, 0, %v242_v45  ;;  %v304_v37 = vsel %vm8713_vm2, 0, %v303_v39 }
 0x1cc   :  { %244 = vst [vmem:[#allocation3 + $0x88] sm:$0x1] %v243_v21  ;;  %305 = vst [vmem:[#allocation3 + $0x8c] sm:$0x1] %v304_v37  ;;  %v236_v54 = vld [vmem:[#allocation3 + $0x78] sm:$0x1] }
 0x1cd   :  { %v297_v14 = vld [vmem:[#allocation3 + $0x7c] sm:$0x1]  ;;  %v245_v25 = vld [vmem:[#allocation3 + $0x90] sm:$0x1]  ;;  %v306_v53 = vld [vmem:[#allocation3 + $0x94] sm:$0x1] }
 0x1ce   :  { %7290 = vmatmul.mubr.msk.bf16.vlgmr.msra.gmra.mrb[0].mxu0 %vm1065_vm11, %v6730_v35  ;;  %v274_v35 = vsel %vm8713_vm2, 0, %v273_v26  ;;  %v246_v40 = vsel %vm8688_vm1, 0, %v245_v25  ;;  %v307_v16 = vsel %vm8713_vm2, 0, %v306_v53  ;;  %v239_v13 = vld [vmem:[#allocation3 + $0x80] sm:$0x1] }
 0x1cf   :  { %7293 = vmatprep.mubr.msk.bf16.mxu0 %vm1065_vm11, %v6731_v17  ;;  %275 = vst [vmem:[#allocation3 + $0x3c] sm:$0x1] %v274_v35  ;;  %v267_v17 = vld [vmem:[#allocation3 + $0x2c] sm:$0x1]  ;;  %247 = vst [vmem:[#allocation3 + $0x90] sm:$0x1] %v246_v40 }
 0x1d0   :  { %v268_v1 = vsel %vm8713_vm2, 0, %v267_v17  ;;  %308 = vst [vmem:[#allocation3 + $0x94] sm:$0x1] %v307_v16  ;;  %v300_v24 = vld [vmem:[#allocation3 + $0x84] sm:$0x1] }
 0x1d1   :  { %269 = vst [vmem:[#allocation3 + $0x2c] sm:$0x1] %v268_v1  ;;  %v6763_v19 = vld [vmem:[%s9859_s4 + $0x4] sm:$0xf]  ;;  %v301_v29 = vsel %vm8713_vm2, 0, %v300_v24 }
 0x1d2   :  { %v191_v59 = vld [vmem:[#allocation3] sm:$0x1]  ;;  %302 = vst [vmem:[#allocation3 + $0x84] sm:$0x1] %v301_v29  ;;  %7732 = vmatprep.subr.msk.bf16.mxu1 %vm4110_vm4, %v6763_v19  ;;  %v4112_v0 = vsel %vm4110_vm4, %v6763_v19, 0 }
 0x1d3   :  { %v192_v33 = vsel %vm8688_vm1, 0, %v191_v59  ;;  %v252_v60 = vld [vmem:[#allocation3 + $0x4] sm:$0x1]  ;;  %7306 = vmatpush3.bf16.msra.mxu1 %v4112_v0  ;;  %v3818_v34 = vld [vmem:[%s9859_s4] sm:$0xf] }
 0x1d4   :  { %193 = vst [vmem:[#allocation3] sm:$0x1] %v192_v33  ;;  %v253_v52 = vsel %vm8713_vm2, 0, %v252_v60  ;;  %7733 = vmatprep.subr.msk.bf16.mxu1 %vm4110_vm4, %v3818_v34  ;;  %v221_v28 = vld [vmem:[#allocation3 + $0x50] sm:$0x1]  ;;  %v9047_v39 = vsel %vm4110_vm4, %v3818_v34, 0 }
 0x1d5   :  { %254 = vst [vmem:[#allocation3 + $0x4] sm:$0x1] %v253_v52  ;;  %v282_v23 = vld [vmem:[#allocation3 + $0x54] sm:$0x1]  ;;  %v222_v31 = vsel %vm8688_vm1, 0, %v221_v28 }
 0x1d6   :  { %7294 = vmatmul.mubr.msk.bf16.gmra.mrb[4].mxu0 %vm1065_vm11, %v6732_v63  ;;  %v224_v63 = vld [vmem:[#allocation3 + $0x58] sm:$0x1]  ;;  %v283_v46 = vsel %vm8713_vm2, 0, %v282_v23  ;;  %223 = vst [vmem:[#allocation3 + $0x50] sm:$0x1] %v222_v31 }
 0x1d7   :  { %7297 = vmatprep.mubr.msk.bf16.mxu0 %vm1065_vm11, %v6733_v32  ;;  %v225_v50 = vsel %vm8688_vm1, 0, %v224_v63  ;;  %v234_v32 = vsel %vm8688_vm1, 0, %v233_v9  ;;  %284 = vst [vmem:[#allocation3 + $0x54] sm:$0x1] %v283_v46  ;;  %v9016_v6 = vld [vmem:[%s9857_s2] ss:$0 sm:$0xff] }
 0x1d8   :  { %226 = vst [vmem:[#allocation3 + $0x58] sm:$0x1] %v225_v50  ;;  %235 = vst [vmem:[#allocation3 + $0x70] sm:$0x1] %v234_v32  ;;  %v9024_v58 = vld [vmem:[%s9858_s3] ss:$0 sm:$0xff] }
 0x1d9   :  { %v3718_v24 = vld [vmem:[#allocation3 + $0x18] sm:$0xf]  ;;  %v3721_v19 = vld [vmem:[#allocation3 + $0x1c] sm:$0x1]  ;;  %v3706_v52 = vld [vmem:[#allocation3 + $0x8] sm:$0xf] }
 0x1db   :  { %v9009_v57 = vld [vmem:[#allocation3] sm:$0xf] }
 0x1dc   :  { %v3836_v44 = vshrl.u32 %v9009_v57, 16  ;;  %v3839_v26 = vshll.u32 %v9009_v57, 16  ;;  %v9018_v17 = vld [vmem:[#allocation3 + $0x4] sm:$0x1] }
 0x1dd   :  { %v3810_v4 = vld [vmem:[#allocation3 + $0x50] sm:$0xf]  ;;  %v3845_v38 = vshll.u32 %v9018_v17, 16  ;;  %v4425_v46 = vrot.slane %v9018_v17, 5 }
 0x1de   :  { %7298 = vmatmul.mubr.msk.bf16.gmra.mrb[8].mxu0 %vm1065_vm11, %v6734_v62  ;;  %v237_v62 = vsel %vm8688_vm1, 0, %v236_v54  ;;  %v3838_v11 = vrot.slane %v3836_v44, 4  ;;  %v3841_v35 = vrot.slane %v3839_v26, 5  ;;  %v3948_v18 = vshrl.u32 %v3810_v4, 16  ;;  %v9049_v21 = vld [vmem:[#allocation3 + $0x54] sm:$0x1] }
 0x1df   :  { %7301 = vmatprep.mubr.msk.bf16.mxu0 %vm1065_vm11, %v6735_v3  ;;  %v298_v3 = vsel %vm8713_vm2, 0, %v297_v14  ;;  %238 = vst [vmem:[#allocation3 + $0x78] sm:$0x1] %v237_v62  ;;  %v3951_v55 = vshll.u32 %v3810_v4, 16  ;;  %v9032_v43 = vrot.slane %v3845_v38, 5  ;;  %v3957_v62 = vshll.u32 %v9049_v21, 16 }
 0x1e0   :  { %299 = vst [vmem:[#allocation3 + $0x7c] sm:$0x1] %v298_v3  ;;  %v3842_v1 = vor.u32 %v3841_v35, %v3838_v11  ;;  %v9036_v51 = vrot.slane %v3948_v18, 4  ;;  %v3709_v26 = vld [vmem:[#allocation3 + $0xc] sm:$0x1] }
 0x1e1   :  { %v9038_v32 = vrot.slane %v3951_v55, 5  ;;  %v3724_v18 = vld [vmem:[#allocation3 + $0x20] sm:$0xf] }
 0x1e2   :  { %v9030_v63 = vrot.slane %v3842_v1, 4 }
 0x1e3   :  { %v3954_v25 = vor.u32 %v9038_v32, %v9036_v51 }
 0x1e4   :  { %v3848_v45 = vsel %vm8186_vm10, %v9030_v63, %v9032_v43 }
 0x1e6   :  { %7302 = vmatmul.mubr.msk.bf16.gmra.mrb[12].mxu0 %vm1065_vm11, %v6736_v61  ;;  %v240_v61 = vsel %vm8688_vm1, 0, %v239_v13 }
 0x1e7   :  { %241 = vst [vmem:[#allocation3 + $0x80] sm:$0x1] %v240_v61 }
 0x2a1   :  { %v7291_v42 = vpop.f32.mrb[0].mxu0 }
 0x2a2   :  { %v3442_v49 = vmul.f32 %v7291_v42, %v9016_v6  ;;  %v3354_v15 = vpop.f32.mrb[1].mxu0 }
 0x2a3   :  { %v3440_v47 = vmul.f32 %v9016_v6, %v3354_v15  ;;  %v7292_v8 = vpop.f32.mrb[2].mxu0 }
 0x2a4   :  { %v3465_v20 = vadd.f32 %v9024_v58, %v3442_v49  ;;  %v3443_v48 = vmul.f32 %v7292_v8, %v9016_v6  ;;  %v3357_v36 = vpop.f32.mrb[3].mxu0 }
 0x2a5   :  { %v3463_v9 = vadd.f32 %v9024_v58, %v3440_v47  ;;  %v3441_v50 = vmul.f32 %v9016_v6, %v3357_v36  ;;  %v3727_v47 = vld [vmem:[#allocation3 + $0x24] sm:$0x1] }
 0x2a6   :  { %v3481_v56 = vmax.f32 %v3465_v20, 0.0  ;;  %v3466_v30 = vadd.f32 %v9024_v58, %v3443_v48 }
 0x2a7   :  { %v3479_v12 = vmax.f32 %v3463_v9, 0.0  ;;  %v3464_v41 = vadd.f32 %v9024_v58, %v3441_v50 }
 0x2a8   :  { %v6967_v22 = vpack.c.bf16 %v3481_v56, %v3481_v56  ;;  %v3482_v2 = vmax.f32 %v3466_v30, 0.0  ;;  %v3712_v56 = vld [vmem:[#allocation3 + $0x10] sm:$0xf]  ;;  %v3715_v30 = vld [vmem:[#allocation3 + $0x14] sm:$0x1] }
 0x2a9   :  { %v6965_v37 = vpack.c.bf16 %v3479_v12, %v3479_v12  ;;  %v3480_v54 = vmax.f32 %v3464_v41, 0.0  ;;  %v7295_v14 = vpop.f32.mrb[4].mxu0 }
 0x2aa   :  { %v3560_v3 = vshrl.u32 %v6967_v22, 16  ;;  %v3563_v40 = vshll.u32 %v6967_v22, 16  ;;  %v6968_v53 = vpack.c.bf16 %v3482_v2, %v3482_v2  ;;  %v3446_v16 = vmul.f32 %v7295_v14, %v9016_v6  ;;  %v3370_v13 = vpop.f32.mrb[5].mxu0 }
 0x2ab   :  { %v3544_v61 = vshrl.u32 %v6965_v37, 16  ;;  %v3547_v29 = vshll.u32 %v6965_v37, 16  ;;  %v6966_v59 = vpack.c.bf16 %v3480_v54, %v3480_v54  ;;  %v3444_v0 = vmul.f32 %v9016_v6, %v3370_v13  ;;  %v7296_v33 = vpop.f32.mrb[6].mxu0 }
 0x2ac   :  { %v3562_v60 = vrot.slane %v3560_v3, 7  ;;  %v3568_v34 = vshrl.u32 %v6968_v53, 16  ;;  %v3571_v28 = vshll.u32 %v6968_v53, 16  ;;  %v3469_v23 = vadd.f32 %v9024_v58, %v3446_v16  ;;  %v3373_v31 = vpop.f32.mrb[7].mxu0 }
 0x2ad   :  { %v3546_v44 = vrot.slane %v3544_v61, 7  ;;  %v3552_v11 = vshrl.u32 %v6966_v59, 16  ;;  %v3555_v35 = vshll.u32 %v6966_v59, 16  ;;  %v3467_v4 = vadd.f32 %v9024_v58, %v3444_v0 }
 0x2ae   :  { %v3565_v1 = vor.u32 %v3563_v40, %v3562_v60  ;;  %v3566_v38 = vrot.slane %v3562_v60, 4  ;;  %v3570_v42 = vrot.slane %v3568_v34, 7  ;;  %v3485_v55 = vmax.f32 %v3469_v23, 0.0 }
 0x2af   :  { %v3549_v49 = vor.u32 %v3547_v29, %v3546_v44  ;;  %v3550_v15 = vrot.slane %v3546_v44, 4  ;;  %v3554_v8 = vrot.slane %v3552_v11, 7  ;;  %v3483_v20 = vmax.f32 %v3467_v4, 0.0  ;;  %v3745_v11 = vld [vmem:[#allocation3 + $0x3c] sm:$0x1] }
 0x2b0   :  { %v3719_v48 = vsel %vm9059_vm5, %v3565_v1, %v3718_v24  ;;  %v3722_v36 = vsel %vm8688_vm1, %v3566_v38, %v3721_v19  ;;  %v3573_v9 = vor.u32 %v3571_v28, %v3570_v42  ;;  %v3574_v50 = vrot.slane %v3570_v42, 4  ;;  %v3730_v1 = vld [vmem:[#allocation3 + $0x28] sm:$0xf]  ;;  %v3733_v38 = vld [vmem:[#allocation3 + $0x2c] sm:$0x1] }
 0x2b1   :  { %3720 = vst [vmem:[#allocation3 + $0x18] sm:$0xf] %v3719_v48  ;;  %3723 = vst [vmem:[#allocation3 + $0x1c] sm:$0x1] %v3722_v36  ;;  %v3707_v12 = vsel %vm9059_vm5, %v3549_v49, %v3706_v52  ;;  %v3710_v41 = vsel %vm8688_vm1, %v3550_v15, %v3709_v26  ;;  %v3557_v22 = vor.u32 %v3555_v35, %v3554_v8  ;;  %v3558_v2 = vrot.slane %v3554_v8, 4  ;;  %v7299_v37 = vpop.f32.mrb[8].mxu0 }
 0x2b2   :  { %3708 = vst [vmem:[#allocation3 + $0x8] sm:$0xf] %v3707_v12  ;;  %3711 = vst [vmem:[#allocation3 + $0xc] sm:$0x1] %v3710_v41  ;;  %v3725_v54 = vsel %vm9059_vm5, %v3573_v9, %v3724_v18  ;;  %v3728_v14 = vsel %vm8688_vm1, %v3574_v50, %v3727_v47  ;;  %v6971_v3 = vpack.c.bf16 %v3485_v55, %v3485_v55  ;;  %v3386_v53 = vpop.f32.mrb[9].mxu0 }
 0x2b3   :  { %v6969_v40 = vpack.c.bf16 %v3483_v20, %v3483_v20  ;;  %3726 = vst [vmem:[#allocation3 + $0x20] sm:$0xf] %v3725_v54  ;;  %3729 = vst [vmem:[#allocation3 + $0x24] sm:$0x1] %v3728_v14  ;;  %v3713_v16 = vsel %vm9059_vm5, %v3557_v22, %v3712_v56  ;;  %v3716_v13 = vsel %vm8688_vm1, %v3558_v2, %v3715_v30  ;;  %v7300_v61 = vpop.f32.mrb[10].mxu0 }
 0x2b4   :  { %v3447_v24 = vmul.f32 %v7296_v33, %v9016_v6  ;;  %v3445_v19 = vmul.f32 %v9016_v6, %v3373_v31  ;;  %3714 = vst [vmem:[#allocation3 + $0x10] sm:$0xf] %v3713_v16  ;;  %3717 = vst [vmem:[#allocation3 + $0x14] sm:$0x1] %v3716_v13  ;;  %v3592_v29 = vshrl.u32 %v6971_v3, 16  ;;  %v3595_v59 = vshll.u32 %v6971_v3, 16 }
 0x2b5   :  { %v3576_v0 = vshrl.u32 %v6969_v40, 16  ;;  %v3579_v60 = vshll.u32 %v6969_v40, 16  ;;  %v3389_v52 = vpop.f32.mrb[11].mxu0  ;;  %v3450_v23 = vmul.f32 %v7299_v37, %v9016_v6  ;;  %v3448_v44 = vmul.f32 %v9016_v6, %v3386_v53  ;;  %v3742_v33 = vld [vmem:[#allocation3 + $0x38] sm:$0xf] }
 0x2b6   :  { %v3470_v34 = vadd.f32 %v9024_v58, %v3447_v24  ;;  %v3468_v28 = vadd.f32 %v9024_v58, %v3445_v19  ;;  %v3594_v26 = vrot.slane %v3592_v29, 7  ;;  %v3451_v35 = vmul.f32 %v7300_v61, %v9016_v6  ;;  %v3748_v53 = vld [vmem:[#allocation3 + $0x40] sm:$0xf] }
 0x2b7   :  { %v3578_v31 = vrot.slane %v3576_v0, 7  ;;  %v3449_v4 = vmul.f32 %v9016_v6, %v3389_v52  ;;  %v3473_v55 = vadd.f32 %v9024_v58, %v3450_v23  ;;  %v3471_v49 = vadd.f32 %v9024_v58, %v3448_v44 }
 0x2b8   :  { %v3486_v42 = vmax.f32 %v3470_v34, 0.0  ;;  %v3484_v18 = vmax.f32 %v3468_v28, 0.0  ;;  %v3597_v15 = vor.u32 %v3595_v59, %v3594_v26  ;;  %v3598_v47 = vrot.slane %v3594_v26, 4  ;;  %v3751_v59 = vld [vmem:[#allocation3 + $0x44] sm:$0x1] }
 0x2b9   :  { %v3581_v8 = vor.u32 %v3579_v60, %v3578_v31  ;;  %v3582_v20 = vrot.slane %v3578_v31, 4  ;;  %v3489_v9 = vmax.f32 %v3473_v55, 0.0  ;;  %v3487_v50 = vmax.f32 %v3471_v49, 0.0  ;;  %v7303_v56 = vpop.f32.mrb[12].mxu0  ;;  %v3736_v60 = vld [vmem:[#allocation3 + $0x30] sm:$0xf] }
 0x2ba   :  { %v6972_v48 = vpack.c.bf16 %v3486_v42, %v3486_v42  ;;  %v6970_v36 = vpack.c.bf16 %v3484_v18, %v3484_v18  ;;  %v3743_v30 = vsel %vm9059_vm5, %v3597_v15, %v3742_v33  ;;  %v3746_v12 = vsel %vm8688_vm1, %v3598_v47, %v3745_v11  ;;  %v3402_v2 = vpop.f32.mrb[13].mxu0  ;;  %v3739_v28 = vld [vmem:[#allocation3 + $0x34] sm:$0x1] }
 0x2bb   :  { %v3731_v41 = vsel %vm9059_vm5, %v3581_v8, %v3730_v1  ;;  %v3734_v22 = vsel %vm8688_vm1, %v3582_v20, %v3733_v38  ;;  %3744 = vst [vmem:[#allocation3 + $0x38] sm:$0xf] %v3743_v30  ;;  %3747 = vst [vmem:[#allocation3 + $0x3c] sm:$0x1] %v3746_v12  ;;  %v9098_v40 = vpop.f32.mrb[14].mxu0  ;;  %v6975_v16 = vpack.c.bf16 %v3489_v9, %v3489_v9 }
 0x2bc   :  { %3732 = vst [vmem:[#allocation3 + $0x28] sm:$0xf] %v3731_v41  ;;  %3735 = vst [vmem:[#allocation3 + $0x2c] sm:$0x1] %v3734_v22  ;;  %v3600_v37 = vshrl.u32 %v6972_v48, 16  ;;  %v3603_v54 = vshll.u32 %v6972_v48, 16  ;;  %v6973_v13 = vpack.c.bf16 %v3487_v50, %v3487_v50  ;;  %v3474_v24 = vadd.f32 %v9024_v58, %v3451_v35 }
 0x2bd   :  { %v3584_v14 = vshrl.u32 %v6970_v36, 16  ;;  %v3587_v3 = vshll.u32 %v6970_v36, 16  ;;  %v3472_v19 = vadd.f32 %v9024_v58, %v3449_v4  ;;  %v3405_v61 = vpop.f32.mrb[15].mxu0  ;;  %v3454_v52 = vmul.f32 %v7303_v56, %v9016_v6  ;;  %v3766_v38 = vld [vmem:[#allocation3 + $0x68] sm:$0xf] }
 0x2be   :  { %v3602_v29 = vrot.slane %v3600_v37, 7  ;;  %v3452_v34 = vmul.f32 %v9016_v6, %v3402_v2  ;;  %v3624_v23 = vshrl.u32 %v6975_v16, 16  ;;  %v3627_v44 = vshll.u32 %v6975_v16, 16  ;;  %v3769_v4 = vld [vmem:[#allocation3 + $0x6c] sm:$0x1] }
 0x2bf   :  { %v3586_v0 = vrot.slane %v3584_v14, 7  ;;  %v3608_v26 = vshrl.u32 %v6973_v13, 16  ;;  %v3611_v33 = vshll.u32 %v6973_v13, 16  ;;  %v3490_v55 = vmax.f32 %v3474_v24, 0.0  ;;  %v3754_v48 = vld [vmem:[#allocation3 + $0x58] sm:$0xf] }
 0x2c0   :  { %v3605_v11 = vor.u32 %v3603_v54, %v3602_v29  ;;  %v3606_v31 = vrot.slane %v3602_v29, 4  ;;  %v3626_v42 = vrot.slane %v3624_v23, 7  ;;  %v3488_v49 = vmax.f32 %v3472_v19, 0.0  ;;  %v3757_v36 = vld [vmem:[#allocation3 + $0x5c] sm:$0x1] }
 0x2c1   :  { %v3589_v1 = vor.u32 %v3587_v3, %v3586_v0  ;;  %v3590_v35 = vrot.slane %v3586_v0, 4  ;;  %v3610_v18 = vrot.slane %v3608_v26, 7  ;;  %v6976_v12 = vpack.c.bf16 %v3490_v55, %v3490_v55  ;;  %v3772_v29 = vld [vmem:[#allocation3 + $0x70] sm:$0xf]  ;;  %v3760_v0 = vld [vmem:[#allocation3 + $0x60] sm:$0xf] }
 0x2c2   :  { %v3749_v15 = vsel %vm9059_vm5, %v3605_v11, %v3748_v53  ;;  %v3752_v47 = vsel %vm8688_vm1, %v3606_v31, %v3751_v59  ;;  %v3629_v9 = vor.u32 %v3627_v44, %v3626_v42  ;;  %v3630_v50 = vrot.slane %v3626_v42, 4  ;;  %v9122_v53 = vld [vmem:[#allocation3 + $0x8] sm:$0xf]  ;;  %v3775_v59 = vld [vmem:[#allocation3 + $0x74] sm:$0x1] }
 0x2c3   :  { %v3737_v8 = vsel %vm9059_vm5, %v3589_v1, %v3736_v60  ;;  %v3740_v20 = vsel %vm8688_vm1, %v3590_v35, %v3739_v28  ;;  %3750 = vst [vmem:[#allocation3 + $0x40] sm:$0xf] %v3749_v15  ;;  %3753 = vst [vmem:[#allocation3 + $0x44] sm:$0x1] %v3752_v47  ;;  %v3613_v56 = vor.u32 %v3611_v33, %v3610_v18  ;;  %v3614_v30 = vrot.slane %v3610_v18, 4 }
 0x2c4   :  { %3738 = vst [vmem:[#allocation3 + $0x30] sm:$0xf] %v3737_v8  ;;  %3741 = vst [vmem:[#allocation3 + $0x34] sm:$0x1] %v3740_v20  ;;  %v6974_v41 = vpack.c.bf16 %v3488_v49, %v3488_v49  ;;  %v3477_v22 = vadd.f32 %v9024_v58, %v3454_v52  ;;  %v3475_v2 = vadd.f32 %v9024_v58, %v3452_v34  ;;  %v3632_v16 = vshrl.u32 %v6976_v12, 16 }
 0x2c5   :  { %v3767_v37 = vsel %vm9059_vm5, %v3629_v9, %v3766_v38  ;;  %v3770_v54 = vsel %vm8688_vm1, %v3630_v50, %v3769_v4  ;;  %v3755_v14 = vsel %vm9059_vm5, %v3613_v56, %v3754_v48  ;;  %v3758_v3 = vsel %vm8688_vm1, %v3614_v30, %v3757_v36  ;;  %v3763_v60 = vld [vmem:[#allocation3 + $0x64] sm:$0x1]  ;;  %v3790_v48 = vld [vmem:[#allocation3 + $0x88] sm:$0xf]  ;;  %v3793_v36 = vld [vmem:[#allocation3 + $0x8c] sm:$0x1] }
 0x2c6   :  { %3768 = vst [vmem:[#allocation3 + $0x68] sm:$0xf] %v3767_v37  ;;  %3771 = vst [vmem:[#allocation3 + $0x6c] sm:$0x1] %v3770_v54  ;;  %v3635_v13 = vshll.u32 %v6976_v12, 16  ;;  %v3616_v24 = vshrl.u32 %v6974_v41, 16  ;;  %v3455_v28 = vmul.f32 %v9098_v40, %v9016_v6  ;;  %v3453_v23 = vmul.f32 %v9016_v6, %v3405_v61 }
 0x2c7   :  { %3756 = vst [vmem:[#allocation3 + $0x58] sm:$0xf] %v3755_v14  ;;  %3759 = vst [vmem:[#allocation3 + $0x5c] sm:$0x1] %v3758_v3  ;;  %v3619_v19 = vshll.u32 %v6974_v41, 16  ;;  %v3493_v52 = vmax.f32 %v3477_v22, 0.0 }
 0x2c8   :  { %v3491_v34 = vmax.f32 %v3475_v2, 0.0  ;;  %v3634_v44 = vrot.slane %v3632_v16, 7  ;;  %v3618_v26 = vrot.slane %v3616_v24, 7  ;;  %v3850_v33 = vshrl.u32 %v9122_v53, 16  ;;  %v9131_v61 = vld [vmem:[#allocation3 + $0xc] sm:$0x1] }
 0x2c9   :  { %v3853_v11 = vshll.u32 %v9122_v53, 16  ;;  %v6979_v31 = vpack.c.bf16 %v3493_v52, %v3493_v52  ;;  %v3478_v35 = vadd.f32 %v9024_v58, %v3455_v28  ;;  %v3476_v38 = vadd.f32 %v9024_v58, %v3453_v23  ;;  %v3778_v56 = vld [vmem:[#allocation3 + $0x78] sm:$0xf]  ;;  %v3781_v41 = vld [vmem:[#allocation3 + $0x7c] sm:$0x1] }
 0x2ca   :  { %v6977_v1 = vpack.c.bf16 %v3491_v34, %v3491_v34  ;;  %v3637_v4 = vor.u32 %v3635_v13, %v3634_v44  ;;  %v3638_v42 = vrot.slane %v3634_v44, 4  ;;  %v3621_v18 = vor.u32 %v3619_v19, %v3618_v26  ;;  %v9163_v28 = vld [vmem:[#allocation3 + $0x14] sm:$0x1]  ;;  %v3796_v44 = vld [vmem:[#allocation3 + $0x90] sm:$0xf] }
 0x2cb   :  { %v3622_v55 = vrot.slane %v3618_v26, 4  ;;  %v3656_v49 = vshrl.u32 %v6979_v31, 16  ;;  %v3659_v40 = vshll.u32 %v6979_v31, 16  ;;  %v3494_v30 = vmax.f32 %v3478_v35, 0.0  ;;  %v3799_v26 = vld [vmem:[#allocation3 + $0x94] sm:$0x1] }
 0x2cc   :  { %v3640_v15 = vshrl.u32 %v6977_v1, 16  ;;  %v3643_v6 = vshll.u32 %v6977_v1, 16  ;;  %v3773_v47 = vsel %vm9059_vm5, %v3637_v4, %v3772_v29  ;;  %v3776_v8 = vsel %vm8688_vm1, %v3638_v42, %v3775_v59  ;;  %v9146_v59 = vld [vmem:[#allocation3 + $0x10] sm:$0xf]  ;;  %v3784_v4 = vld [vmem:[#allocation3 + $0x80] sm:$0xf] }
 0x2cd   :  { %v3761_v20 = vsel %vm9059_vm5, %v3621_v18, %v3760_v0  ;;  %v3764_v58 = vsel %vm8688_vm1, %v3622_v55, %v3763_v60  ;;  %3774 = vst [vmem:[#allocation3 + $0x70] sm:$0xf] %v3773_v47  ;;  %3777 = vst [vmem:[#allocation3 + $0x74] sm:$0x1] %v3776_v8  ;;  %v3658_v9 = vrot.slane %v3656_v49, 7  ;;  %v3492_v12 = vmax.f32 %v3476_v38, 0.0 }
 0x2ce   :  { %3762 = vst [vmem:[#allocation3 + $0x60] sm:$0xf] %v3761_v20  ;;  %3765 = vst [vmem:[#allocation3 + $0x64] sm:$0x1] %v3764_v58  ;;  %v3642_v50 = vrot.slane %v3640_v15, 7  ;;  %v3852_v22 = vrot.slane %v3850_v33, 4  ;;  %v6980_v24 = vpack.c.bf16 %v3494_v30, %v3494_v30 }
 0x2cf   :  { %v3855_v2 = vrot.slane %v3853_v11, 5  ;;  %v3859_v37 = vshll.u32 %v9131_v61, 16  ;;  %v9144_v54 = vrot.slane %v3957_v62, 5  ;;  %v3661_v14 = vor.u32 %v3659_v40, %v3658_v9  ;;  %v9148_v0 = vld [vmem:[#allocation3 + $0x18] sm:$0xf] }
 0x2d0   :  { %v3662_v3 = vrot.slane %v3658_v9, 4  ;;  %v3645_v16 = vor.u32 %v3643_v6, %v3642_v50  ;;  %v3646_v13 = vrot.slane %v3642_v50, 4  ;;  %v6978_v19 = vpack.c.bf16 %v3492_v12, %v3492_v12  ;;  %v3787_v55 = vld [vmem:[#allocation3 + $0x84] sm:$0x1]  ;;  %v9179_v30 = vld [vmem:[#allocation3 + $0x20] sm:$0xf] }
 0x2d1   :  { %v3856_v29 = vor.u32 %v3855_v2, %v3852_v22  ;;  %v9153_v60 = vrot.slane %v3954_v25, 4  ;;  %v3791_v21 = vsel %vm9059_vm5, %v3661_v14, %v3790_v48  ;;  %v3664_v51 = vshrl.u32 %v6980_v24, 16  ;;  %v9172_v48 = vld [vmem:[#allocation3 + $0x1c] sm:$0x1]  ;;  %v9181_v12 = vld [vmem:[#allocation3 + $0x24] sm:$0x1] }
 0x2d2   :  { %v3794_v62 = vsel %vm8688_vm1, %v3662_v3, %v3793_v36  ;;  %v3779_v52 = vsel %vm9059_vm5, %v3645_v16, %v3778_v56  ;;  %v3782_v34 = vsel %vm8688_vm1, %v3646_v13, %v3781_v41  ;;  %3792 = vst [vmem:[#allocation3 + $0x88] sm:$0xf] %v3791_v21  ;;  %v3667_v32 = vshll.u32 %v6980_v24, 16  ;;  %v9191_v43 = vld [vmem:[#allocation3 + $0x28] sm:$0xf] }
 0x2d3   :  { %3795 = vst [vmem:[#allocation3 + $0x8c] sm:$0x1] %v3794_v62  ;;  %3780 = vst [vmem:[#allocation3 + $0x78] sm:$0xf] %v3779_v52  ;;  %v3648_v25 = vshrl.u32 %v6978_v19, 16  ;;  %v3861_v23 = vrot.slane %v3859_v37, 5 }
 0x2d4   :  { %3783 = vst [vmem:[#allocation3 + $0x7c] sm:$0x1] %v3782_v34  ;;  %v3651_v33 = vshll.u32 %v6978_v19, 16  ;;  %v3857_v11 = vrot.slane %v3856_v29, 4  ;;  %v3864_v31 = vshrl.u32 %v9146_v59, 16  ;;  %v3867_v1 = vshll.u32 %v9146_v59, 16 }
 0x2d5   :  { %v3666_v35 = vrot.slane %v3664_v51, 7  ;;  %v3650_v38 = vrot.slane %v3648_v25, 7  ;;  %v3878_v42 = vshrl.u32 %v9148_v0, 16  ;;  %v3881_v18 = vshll.u32 %v9148_v0, 16  ;;  %v9195_v16 = vld [vmem:[#allocation3 + $0x2c] sm:$0x1] }
 0x2d6   :  { %v3862_v49 = vsel %vm8186_vm10, %v3857_v11, %v3861_v23  ;;  %v3866_v40 = vrot.slane %v3864_v31, 4  ;;  %v3869_v15 = vrot.slane %v3867_v1, 5  ;;  %v3873_v6 = vshll.u32 %v9163_v28, 16  ;;  %v9201_v29 = vld [vmem:[#allocation3 + $0x30] sm:$0xf] }
 0x2d7   :  { %v3669_v47 = vor.u32 %v3667_v32, %v3666_v35  ;;  %v3670_v8 = vrot.slane %v3666_v35, 4  ;;  %v3653_v20 = vor.u32 %v3651_v33, %v3650_v38  ;;  %v3654_v58 = vrot.slane %v3650_v38, 4  ;;  %v9206_v51 = vld [vmem:[#allocation3 + $0x38] sm:$0xf]  ;;  %v9222_v35 = vld [vmem:[%s9859_s4 + $0x8] sm:$0xf] }
 0x2d8   :  { %v6764_v36 = vcombine.low %v3848_v45, %v3862_v49  ;;  %v3870_v9 = vor.u32 %v3869_v15, %v3866_v40  ;;  %v3880_v50 = vrot.slane %v3878_v42, 4  ;;  %v3883_v56 = vrot.slane %v3881_v18, 5  ;;  %v9224_v18 = vld [vmem:[#allocation3 + $0x3c] sm:$0x1]  ;;  %v9227_v49 = vld [vmem:[#allocation3 + $0x58] sm:$0xf] }
 0x2d9   :  { %v3797_v41 = vsel %vm9059_vm5, %v3669_v47, %v3796_v44  ;;  %v3800_v22 = vsel %vm8688_vm1, %v3670_v8, %v3799_v26  ;;  %v3785_v2 = vsel %vm9059_vm5, %v3653_v20, %v3784_v4  ;;  %v3788_v63 = vsel %vm8688_vm1, %v3654_v58, %v3787_v55  ;;  %v9209_v44 = vld [vmem:[#allocation3 + $0x34] sm:$0x1] }
 0x2da   :  { %3798 = vst [vmem:[#allocation3 + $0x90] sm:$0xf] %v3797_v41  ;;  %3801 = vst [vmem:[#allocation3 + $0x94] sm:$0x1] %v3800_v22  ;;  %7307 = vmatprep.mubr.msk.bf16.mxu1 %vm4085_vm3, %v6764_v36  ;;  %v3871_v45 = vrot.slane %v3870_v9, 4  ;;  %v3875_v37 = vrot.slane %v3873_v6, 5  ;;  %v3884_v14 = vor.u32 %v3883_v56, %v3880_v50  ;;  %v3960_v26 = vsel %vm8186_vm10, %v9153_v60, %v9144_v54 }
 0x2db   :  { %3786 = vst [vmem:[#allocation3 + $0x80] sm:$0xf] %v3785_v2  ;;  %3789 = vst [vmem:[#allocation3 + $0x84] sm:$0x1] %v3788_v63  ;;  %v3887_v3 = vshll.u32 %v9172_v48, 16  ;;  %v3892_v13 = vshrl.u32 %v9179_v30, 16 }
 0x2dc   :  { %v3895_v24 = vshll.u32 %v9179_v30, 16  ;;  %v3901_v19 = vshll.u32 %v9181_v12, 16  ;;  %v3876_v21 = vsel %vm8186_vm10, %v3871_v45, %v3875_v37  ;;  %v3885_v62 = vrot.slane %v3884_v14, 4  ;;  %v9233_v9 = vld [vmem:[#allocation3 + $0x5c] sm:$0x1] }
 0x2dd   :  { %v3889_v52 = vrot.slane %v3887_v3, 5  ;;  %v3906_v34 = vshrl.u32 %v9191_v43, 16  ;;  %v3894_v32 = vrot.slane %v3892_v13, 4  ;;  %v3909_v23 = vshll.u32 %v9191_v43, 16  ;;  %v9238_v2 = vld [vmem:[#allocation3 + $0x60] sm:$0xf] }
 0x2de   :  { %v3897_v25 = vrot.slane %v3895_v24, 5  ;;  %v3915_v31 = vshll.u32 %v9195_v16, 16  ;;  %v3920_v1 = vshrl.u32 %v9201_v29, 16  ;;  %v3923_v55 = vshll.u32 %v9201_v29, 16  ;;  %v9240_v3 = vld [vmem:[#allocation3 + $0x68] sm:$0xf] }
 0x2df   :  { %v3890_v33 = vsel %vm8186_vm10, %v3885_v62, %v3889_v52  ;;  %v3908_v11 = vrot.slane %v3906_v34, 4  ;;  %v3911_v42 = vrot.slane %v3909_v23, 5  ;;  %v3903_v40 = vrot.slane %v3901_v19, 5  ;;  %v9250_v62 = vld [vmem:[#allocation3 + $0x6c] sm:$0x1] }
 0x2e0   :  { %v6765_v38 = vcombine.low %v3876_v21, %v3890_v33  ;;  %v3898_v4 = vor.u32 %v3897_v25, %v3894_v32  ;;  %v3922_v15 = vrot.slane %v3920_v1, 4  ;;  %v3929_v6 = vshll.u32 %v9209_v44, 16  ;;  %v9248_v21 = vld [vmem:[#allocation3 + $0x64] sm:$0x1]  ;;  %v9256_v1 = vld [vmem:[#allocation3 + $0x70] sm:$0xf] }
 0x2e1   :  { %v3934_v47 = vshrl.u32 %v9206_v51, 16  ;;  %v3912_v20 = vor.u32 %v3911_v42, %v3908_v11  ;;  %v3925_v58 = vrot.slane %v3923_v55, 5  ;;  %v3937_v36 = vshll.u32 %v9206_v51, 16 }
 0x2e2   :  { %7308 = vmatmul.mubr.msk.bf16.vlgmr.msra.gmra.mrb[0].mxu1 %vm4085_vm3, %v6765_v38  ;;  %v3899_v8 = vrot.slane %v3898_v4, 4  ;;  %v3917_v50 = vrot.slane %v3915_v31, 5  ;;  %v3943_v41 = vshll.u32 %v9224_v18, 16  ;;  %v3962_v22 = vshrl.u32 %v9227_v49, 16  ;;  %v9294_v60 = vld [vmem:[#allocation3 + $0x84] sm:$0x1] }
 0x2e3   :  { %7324 = vmatpush3.bf16.msra.mxu1 %v9047_v39  ;;  %v3936_v56 = vrot.slane %v3934_v47, 4  ;;  %v3913_v63 = vrot.slane %v3912_v20, 4  ;;  %v3926_v45 = vor.u32 %v3925_v58, %v3922_v15  ;;  %v3931_v37 = vrot.slane %v3929_v6, 5 }
 0x2e4   :  { %v3939_v14 = vrot.slane %v3937_v36, 5  ;;  %7734 = vmatprep.subr.msk.bf16.mxu1 %vm4110_vm4, %v9222_v35  ;;  %v3904_v39 = vsel %vm8186_vm10, %v3899_v8, %v3903_v40  ;;  %v3964_v13 = vrot.slane %v3962_v22, 4  ;;  %v3965_v24 = vshll.u32 %v9227_v49, 16  ;;  %v9264_v8 = vld [vmem:[#allocation3 + $0x74] sm:$0x1] }
 0x2e5   :  { %v3971_v19 = vshll.u32 %v9233_v9, 16  ;;  %v3918_v52 = vsel %vm8186_vm10, %v3913_v63, %v3917_v50  ;;  %v3927_v34 = vrot.slane %v3926_v45, 4  ;;  %v3976_v25 = vshrl.u32 %v9238_v2, 16  ;;  %v9269_v50 = vld [vmem:[#allocation3 + $0x78] sm:$0xf] }
 0x2e6   :  { %v3940_v32 = vor.u32 %v3939_v14, %v3936_v56  ;;  %v6766_v23 = vcombine.low %v3904_v39, %v3918_v52  ;;  %v3945_v33 = vrot.slane %v3943_v41, 5  ;;  %v3967_v11 = vrot.slane %v3965_v24, 5  ;;  %v9272_v39 = vld [vmem:[#allocation3 + $0x7c] sm:$0x1] }
 0x2e7   :  { %v3979_v31 = vshll.u32 %v9238_v2, 16  ;;  %v3932_v38 = vsel %vm8186_vm10, %v3927_v34, %v3931_v37  ;;  %v3978_v42 = vrot.slane %v3976_v25, 4  ;;  %v3985_v55 = vshll.u32 %v9248_v21, 16  ;;  %v9280_v25 = vld [vmem:[#allocation3 + $0x80] sm:$0xf] }
 0x2e8   :  { %v3941_v4 = vrot.slane %v3940_v32, 4  ;;  %7311 = vmatprep.mubr.msk.bf16.mxu1 %vm4085_vm3, %v6766_v23  ;;  %v3968_v40 = vor.u32 %v3967_v11, %v3964_v13  ;;  %v3990_v6 = vshrl.u32 %v9240_v3, 16  ;;  %v3993_v47 = vshll.u32 %v9240_v3, 16 }
 0x2e9   :  { %v3981_v15 = vrot.slane %v3979_v31, 5  ;;  %v3973_v58 = vrot.slane %v3971_v19, 5  ;;  %v3999_v36 = vshll.u32 %v9250_v62, 16  ;;  %v4004_v56 = vshrl.u32 %v9256_v1, 16 }
 0x2ea   :  { %v3946_v20 = vsel %vm8186_vm10, %v3941_v4, %v3945_v33  ;;  %v3969_v22 = vrot.slane %v3968_v40, 4  ;;  %v3992_v45 = vrot.slane %v3990_v6, 4  ;;  %v3987_v37 = vrot.slane %v3985_v55, 5  ;;  %v4375_v4 = vld [vmem:[#allocation3] sm:$0xe] }
 0x2eb   :  { %v6767_v41 = vcombine.low %v3932_v38, %v3946_v20  ;;  %v3982_v63 = vor.u32 %v3981_v15, %v3978_v42  ;;  %v3995_v14 = vrot.slane %v3993_v47, 5  ;;  %v4006_v13 = vrot.slane %v4004_v56, 4  ;;  %v9288_v38 = vld [vmem:[#allocation3 + $0x88] sm:$0xf] }
 0x2ec   :  { %v4007_v24 = vshll.u32 %v9256_v1, 16  ;;  %v3974_v19 = vsel %vm8186_vm10, %v3969_v22, %v3973_v58  ;;  %v4013_v34 = vshll.u32 %v9264_v8, 16  ;;  %v4018_v32 = vshrl.u32 %v9269_v50, 16  ;;  %v9297_v58 = vld [vmem:[#allocation3 + $0x8c] sm:$0x1] }
 0x2ed   :  { %7312 = vmatmul.mubr.msk.bf16.gmra.mrb[4].mxu1 %vm4085_vm3, %v6767_v41  ;;  %v3983_v52 = vrot.slane %v3982_v63, 4  ;;  %v6768_v23 = vcombine.low %v3960_v26, %v3974_v19  ;;  %v3996_v33 = vor.u32 %v3995_v14, %v3992_v45  ;;  %v4021_v31 = vshll.u32 %v9269_v50, 16 }
 0x2ee   :  { %v4009_v11 = vrot.slane %v4007_v24, 5  ;;  %v4001_v55 = vrot.slane %v3999_v36, 5  ;;  %v4020_v40 = vrot.slane %v4018_v32, 4  ;;  %v4027_v15 = vshll.u32 %v9272_v39, 16 }
 0x2ef   :  { %v3988_v42 = vsel %vm8186_vm10, %v3983_v52, %v3987_v37  ;;  %7315 = vmatprep.mubr.msk.bf16.mxu1 %vm4085_vm3, %v6768_v23  ;;  %v3997_v6 = vrot.slane %v3996_v33, 4  ;;  %v4023_v54 = vrot.slane %v4021_v31, 5  ;;  %v4032_v26 = vshrl.u32 %v9280_v25, 16  ;;  %v4376_v31 = vld [vmem:[#allocation3 + $0x8] sm:$0xe] }
 0x2f0   :  { %v4010_v47 = vor.u32 %v4009_v11, %v4006_v13  ;;  %v4015_v20 = vrot.slane %v4013_v34, 5  ;;  %v4035_v56 = vshll.u32 %v9280_v25, 16  ;;  %v4046_v41 = vshrl.u32 %v9288_v38, 16 }
 0x2f1   :  { %v6796_v36 = vrot.slane %v4375_v4, 9  ;;  %v4002_v22 = vsel %vm8186_vm10, %v3997_v6, %v4001_v55  ;;  %v4024_v45 = vor.u32 %v4023_v54, %v4020_v40  ;;  %v4034_v37 = vrot.slane %v4032_v26, 4  ;;  %v4377_v4 = vld [vmem:[#allocation3 + $0x10] sm:$0xe]  ;;  %v4378_v6 = vld [vmem:[#allocation3 + $0x18] sm:$0xe] }
 0x2f2   :  { %v4011_v63 = vrot.slane %v4010_v47, 4  ;;  %v6769_v14 = vcombine.low %v3988_v42, %v4002_v22  ;;  %v4029_v13 = vrot.slane %v4027_v15, 5  ;;  %v4037_v24 = vrot.slane %v4035_v56, 5  ;;  %v4379_v47 = vld [vmem:[#allocation3 + $0x20] sm:$0xe] }
 0x2f3   :  { %v4041_v19 = vshll.u32 %v9294_v60, 16  ;;  %v4025_v52 = vrot.slane %v4024_v45, 4  ;;  %v4048_v34 = vrot.slane %v4046_v41, 4  ;;  %v4049_v32 = vshll.u32 %v9288_v38, 16  ;;  %v4380_v41 = vld [vmem:[#allocation3 + $0x28] sm:$0xe] }
 0x2f4   :  { %v4055_v23 = vshll.u32 %v9297_v58, 16  ;;  %v4429_v33 = vrot.slane %v9131_v61, 5  ;;  %v4038_v11 = vor.u32 %v4037_v24, %v4034_v37  ;;  %v4433_v55 = vrot.slane %v9163_v28, 5 }
 0x2f5   :  { %7316 = vmatmul.mubr.msk.bf16.gmra.mrb[8].mxu1 %vm4085_vm3, %v6769_v14  ;;  %v4016_v42 = vsel %vm8186_vm10, %v4011_v63, %v4015_v20  ;;  %v4030_v40 = vsel %vm8186_vm10, %v4025_v52, %v4029_v13  ;;  %v4051_v15 = vrot.slane %v4049_v32, 5  ;;  %v4437_v54 = vrot.slane %v9172_v48, 5  ;;  %v4381_v13 = vld [vmem:[#allocation3 + $0x30] sm:$0xe] }
 0x2f6   :  { %v6770_v26 = vcombine.low %v4016_v42, %v4030_v40  ;;  %v4039_v61 = vrot.slane %v4038_v11, 4  ;;  %v4043_v56 = vrot.slane %v4041_v19, 5  ;;  %v4057_v45 = vrot.slane %v4055_v23, 5 }
 0x2f7   :  { %v4052_v22 = vor.u32 %v4051_v15, %v4048_v34  ;;  %v9318_v28 = vsel %vm8385_vm14, %v6796_v36, %v4425_v46  ;;  %v6797_v20 = vrot.slane %v4376_v31, 9  ;;  %v6798_v37 = vrot.slane %v4377_v4, 9  ;;  %v4382_v46 = vld [vmem:[#allocation3 + $0x38] sm:$0xe]  ;;  %v4385_v4 = vld [vmem:[#allocation3 + $0x60] sm:$0xe] }
 0x2f8   :  { %7319 = vmatprep.mubr.msk.bf16.mxu1 %vm4085_vm3, %v6770_v26  ;;  %v4044_v63 = vsel %vm8186_vm10, %v4039_v61, %v4043_v56  ;;  %v6799_v48 = vrot.slane %v4378_v6, 9  ;;  %v6800_v14 = vrot.slane %v4379_v47, 9  ;;  %v4441_v17 = vrot.slane %v9181_v12, 5  ;;  %v4386_v15 = vld [vmem:[#allocation3 + $0x68] sm:$0xe] }
 0x2f9   :  { %v4053_v24 = vrot.slane %v4052_v22, 4  ;;  %v9325_v19 = vsel %vm8385_vm14, %v6797_v20, %v4429_v33  ;;  %v6801_v52 = vrot.slane %v4380_v41, 9  ;;  %v9332_v34 = vsel %vm8385_vm14, %v6798_v37, %v4433_v55  ;;  %v4387_v26 = vld [vmem:[#allocation3 + $0x70] sm:$0xe]  ;;  %v4388_v41 = vld [vmem:[#allocation3 + $0x78] sm:$0xe] }
 0x2fa   :  { %v6813_v36 = vcombine.low %v9318_v28, %v9325_v19  ;;  %v9336_v32 = vsel %vm8385_vm14, %v6799_v48, %v4437_v54  ;;  %v4445_v23 = vrot.slane %v9195_v16, 5  ;;  %v9345_v11 = vsel %vm8385_vm14, %v6800_v14, %v4441_v17  ;;  %v4389_v22 = vld [vmem:[#allocation3 + $0x80] sm:$0xe] }
 0x2fb   :  { %v4058_v33 = vsel %vm8186_vm10, %v4053_v24, %v4057_v45  ;;  %v6814_v12 = vcombine.low %v9332_v34, %v9336_v32  ;;  %v6802_v31 = vrot.slane %v4381_v13, 9  ;;  %v4449_v40 = vrot.slane %v9209_v44, 5  ;;  %v248_v32 = vld [vmem:[#allocation3 + $0x98] sm:$0x1] }
 0x2fc   :  { %v6771_v55 = vcombine.low %v4044_v63, %v4058_v33  ;;  %v9349_v42 = vsel %vm8385_vm14, %v6801_v52, %v4445_v23  ;;  %v6803_v16 = vrot.slane %v4382_v46, 9  ;;  %v6780_v6 = vcombine.low %v9009_v57, %v9122_v53  ;;  %v4390_v63 = vld [vmem:[#allocation3 + $0x88] sm:$0xe] }
 0x2fd   :  { %v6815_v47 = vcombine.low %v9345_v11, %v9349_v42  ;;  %v4453_v54 = vrot.slane %v9224_v18, 5  ;;  %v9360_v61 = vsel %vm8385_vm14, %v6802_v31, %v4449_v40  ;;  %v6806_v56 = vrot.slane %v4385_v4, 9  ;;  %v7780_v42 = vld [vmem:[#allocation3 + $0x8] ss:$8 sps:$4 sm:$0xff]  }
 0x2fe   :  { %7320 = vmatmul.mubr.msk.bf16.gmra.mrb[12].mxu1 %vm4085_vm3, %v6771_v55  ;;  %v4465_v57 = vrot.slane %v9248_v21, 5  ;;  %v6807_v53 = vrot.slane %v4386_v15, 9  ;;  %v4469_v45 = vrot.slane %v9250_v62, 5  ;;  %v6808_v20 = vrot.slane %v4387_v26, 9  ;;  %v4853_v26 = vld [vmem:[#allocation3 + $0x10] sm:$0xf] }
 0x2ff   :  { %7325 = vmatprep.mubr.msk.bf16.mxu1 %vm4085_vm3, %v6780_v6  ;;  %v4454_v44 = vsel %vm8385_vm14, %v6803_v16, %v4453_v54  ;;  %v4473_v48 = vrot.slane %v9264_v8, 5  ;;  %v6809_v14 = vrot.slane %v4388_v41, 9  ;;  %v4477_v24 = vrot.slane %v9272_v39, 5  ;;  %v7781_v16 = vld [vmem:[#allocation3 + $0x18] ss:$8 sps:$4 sm:$0xff]  }
 0x300   :  { %v6816_v18 = vcombine.low %v9360_v61, %v4454_v44  ;;  %v4466_v37 = vsel %vm8385_vm14, %v6806_v56, %v4465_v57  ;;  %v4470_v13 = vsel %vm8385_vm14, %v6807_v53, %v4469_v45  ;;  %v6810_v21 = vrot.slane %v4389_v22, 9  ;;  %v7782_v6 = vld [vmem:[#allocation3 + $0x28] ss:$8 sps:$4 sm:$0xff]   ;;  %v9446_v61 = vld [vmem:[%s9859_s4 + $0x14] sm:$0xf] }
 0x301   :  { %v4481_v17 = vrot.slane %v9294_v60, 5  ;;  %v4538_v52 = vsel %vm4110_vm4, %v9222_v35, 0  ;;  %v6818_v62 = vcombine.low %v4466_v37, %v4470_v13  ;;  %v6811_v46 = vrot.slane %v4390_v63, 9  ;;  %v6829_v35 = vld [vmem:[%s9859_s4 + $0xc] sm:$0xf] }
 0x302   :  { %v4485_v23 = vrot.slane %v9297_v58, 5  ;;  %v6781_v33 = vcombine.low %v9146_v59, %v9148_v0  ;;  %v4474_v8 = vsel %vm8385_vm14, %v6808_v20, %v4473_v48  ;;  %v4478_v31 = vsel %vm8385_vm14, %v6809_v14, %v4477_v24  ;;  %v4851_v54 = vld [vmem:[#allocation3 + $0x8] sm:$0xf]  ;;  %v4857_v53 = vld [vmem:[#allocation3 + $0x20] sm:$0xf] }
 0x303   :  { %v4482_v39 = vsel %vm8385_vm14, %v6810_v21, %v4481_v17  ;;  %v6782_v60 = vcombine.low %v9179_v30, %v9191_v43  ;;  %v6819_v58 = vcombine.low %v4474_v8, %v4478_v31  ;;  %v6783_v4 = vcombine.low %v9201_v29, %v9206_v51  ;;  %v7797_v30 = vld [vmem:[#allocation3 + $0x50] sm:$0xf]  ;;  %v7783_v22 = vld [vmem:[#allocation3 + $0x38] ss:$8 sps:$4 sm:$0xff]   ;;  %v9455_v24 = vld [vmem:[#allocation3 + $0xc] sm:$0x1] }
 0x304   :  { %v4486_v59 = vsel %vm8385_vm14, %v6811_v46, %v4485_v23  ;;  %v6784_v43 = vcombine.low %v7797_v30, %v9227_v49  ;;  %v6785_v55 = vcombine.low %v9238_v2, %v9240_v3  ;;  %v6786_v40 = vcombine.low %v9256_v1, %v9269_v50  ;;  %v4383_v51 = vld [vmem:[#allocation3 + $0x50] sm:$0xe]  ;;  %v4384_v49 = vld [vmem:[#allocation3 + $0x58] sm:$0xe]  ;;  %v7798_v50 = vld [vmem:[#allocation3 + $0x54] sm:$0x1] }
 0x305   :  { %v6820_v0 = vcombine.low %v4482_v39, %v4486_v59  ;;  %v6787_v29 = vcombine.low %v9280_v25, %v9288_v38  ;;  %v4736_v2 = vsel %vm4110_vm4, %v6829_v35, 0  ;;  %v6846_v3 = vld [vmem:[%s9859_s4 + $0x10] sm:$0xf]  ;;  %v6804_v1 = vrot.slane %v4383_v51, 9  ;;  %v4855_v37 = vld [vmem:[#allocation3 + $0x18] sm:$0xf] }
 0x306   :  { %7326 = vmatmul.mubr.msk.bf16.vlgmr.msra.gmra.mrb[0].mxu1 %vm4085_vm3, %v6781_v33  ;;  %v4457_v25 = vrot.slane %v7798_v50, 5  ;;  %v6805_v38 = vrot.slane %v4384_v49, 9  ;;  %v4461_v28 = vrot.slane %v9233_v9, 5  ;;  %v218_v9 = vld [vmem:[#allocation3 + $0x48] sm:$0x1]  ;;  %v249_v11 = vsel %vm8688_vm1, 0, %v248_v32 }
 0x307   :  { %7342 = vmatpush3.bf16.msra.mxu1 %v4538_v52  ;;  %7329 = vmatprep.mubr.msk.bf16.mxu1 %vm4085_vm3, %v6782_v60  ;;  %250 = vst [vmem:[#allocation3 + $0x98] sm:$0x1] %v249_v11  ;;  %v5158_v15 = vsel %vm4110_vm4, %v6846_v3, 0  ;;  %v4884_v56 = vshrl.u32 %v4851_v54, 16  ;;  %v4887_v41 = vshll.u32 %v4851_v54, 16  ;;  %v4898_v44 = vshrl.u32 %v4853_v26, 16 }
 0x308   :  { %7735 = vmatprep.subr.msk.bf16.mxu1 %vm4110_vm4, %v6829_v35  ;;  %v4458_v19 = vsel %vm8385_vm14, %v6804_v1, %v4457_v25  ;;  %v4901_v57 = vshll.u32 %v4853_v26, 16  ;;  %v7784_v48 = vld [vmem:[#allocation3 + $0x58] ss:$8 sps:$4 sm:$0xff]   ;;  %v4926_v14 = vshrl.u32 %v4857_v53, 16  ;;  %v4929_v13 = vshll.u32 %v4857_v53, 16 }
 0x309   :  { %v4889_v45 = vrot.slane %v4887_v41, 5  ;;  %v4900_v20 = vrot.slane %v4898_v44, 4  ;;  %v4859_v21 = vld [vmem:[#allocation3 + $0x28] sm:$0xf]  ;;  %v9458_v17 = vld [vmem:[#allocation3 + $0x14] sm:$0x1] }
 0x30a   :  { %v4903_v63 = vrot.slane %v4901_v57, 5  ;;  %v4912_v52 = vshrl.u32 %v4855_v37, 16  ;;  %v4861_v46 = vld [vmem:[#allocation3 + $0x30] sm:$0xf]  ;;  %v9460_v8 = vld [vmem:[#allocation3 + $0x1c] sm:$0x1] }
 0x30b   :  { %v9462_v31 = vld [vmem:[#allocation3 + $0x24] sm:$0x1]  ;;  %v4928_v39 = vrot.slane %v4926_v14, 4  ;;  %v4931_v60 = vrot.slane %v4929_v13, 5  ;;  %v4940_v35 = vshrl.u32 %v4859_v21, 16  ;;  %v4954_v30 = vshrl.u32 %v4861_v46, 16 }
 0x30c   :  { %v4904_v33 = vor.u32 %v4903_v63, %v4900_v20  ;;  %v7785_v59 = vld [vmem:[#allocation3 + $0x68] ss:$8 sps:$4 sm:$0xff]   ;;  %v4921_v51 = vshll.u32 %v9460_v8, 16  ;;  %v4863_v1 = vld [vmem:[#allocation3 + $0x38] sm:$0xf]  ;;  %v5436_v5 = vsel %vm4110_vm4, %v9446_v61, 0 }
 0x30d   :  { %v4932_v50 = vor.u32 %v4931_v60, %v4928_v39  ;;  %v9468_v25 = vld [vmem:[#allocation3 + $0x2c] sm:$0x1]  ;;  %v9479_v41 = vld [vmem:[#allocation3 + $0x3c] sm:$0x1] }
 0x30e   :  { %7330 = vmatmul.mubr.msk.bf16.gmra.mrb[4].mxu1 %vm4085_vm3, %v6783_v4  ;;  %v4907_v4 = vshll.u32 %v9458_v17, 16 }
 0x30f   :  { %7333 = vmatprep.mubr.msk.bf16.mxu1 %vm4085_vm3, %v6784_v43  ;;  %v4957_v43 = vshll.u32 %v4861_v46, 16  ;;  %v4933_v44 = vrot.slane %v4932_v50, 4  ;;  %v4977_v46 = vshll.u32 %v9479_v41, 16  ;;  %v4871_v50 = vld [vmem:[#allocation3 + $0x68] sm:$0xf] }
 0x311   :  { %v4959_v32 = vrot.slane %v4957_v43, 5 }
 0x316   :  { %7334 = vmatmul.mubr.msk.bf16.gmra.mrb[8].mxu1 %vm4085_vm3, %v6785_v55  ;;  %v7786_v55 = vld [vmem:[#allocation3 + $0x78] ss:$8 sps:$4 sm:$0xff]  }
 0x317   :  { %7337 = vmatprep.mubr.msk.bf16.mxu1 %vm4085_vm3, %v6786_v40  ;;  %v4914_v40 = vrot.slane %v4912_v52, 4  ;;  %v7787_v52 = vld [vmem:[#allocation3 + $0x88] ss:$8 sps:$4 sm:$0xff]  }
 0x31e   :  { %7338 = vmatmul.mubr.msk.bf16.gmra.mrb[12].mxu1 %vm4085_vm3, %v6787_v29 }
 0x31f   :  { %7343 = vmatprep.mubr.msk.bf16.mxu1 %vm4085_vm3, %v6813_v36  ;;  %v4462_v36 = vsel %vm8385_vm14, %v6805_v38, %v4461_v28  ;;  %v4942_v38 = vrot.slane %v4940_v35, 4 }
 0x320   :  { %v6817_v34 = vcombine.low %v4458_v19, %v4462_v36  ;;  %v4865_v19 = vld [vmem:[#allocation3 + $0x40] sm:$0xf] }
 0x321   :  { %v4982_v53 = vshrl.u32 %v4865_v19, 16 }
 0x323   :  { %v4984_v35 = vrot.slane %v4982_v53, 4 }
 0x326   :  { %7344 = vmatmul.mubr.msk.bf16.vlgmr.msra.gmra.mrb[0].mxu1 %vm4085_vm3, %v6814_v12  ;;  %v219_v12 = vsel %vm8688_vm1, 0, %v218_v9  ;;  %v4956_v9 = vrot.slane %v4954_v30, 4  ;;  %v4873_v30 = vld [vmem:[#allocation3 + $0x70] sm:$0xf] }
 0x327   :  { %7360 = vmatpush3.bf16.msra.mxu1 %v4736_v2  ;;  %7347 = vmatprep.mubr.msk.bf16.mxu1 %vm4085_vm3, %v6815_v47  ;;  %220 = vst [vmem:[#allocation3 + $0x48] sm:$0x1] %v219_v12  ;;  %v279_v47 = vld [vmem:[#allocation3 + $0x4c] sm:$0x1]  ;;  %v4905_v2 = vrot.slane %v4904_v33, 4 }
 0x328   :  { %7736 = vmatprep.subr.msk.bf16.mxu1 %vm4110_vm4, %v6846_v3  ;;  %v280_v7 = vsel %vm8713_vm2, 0, %v279_v47  ;;  %v4935_v3 = vshll.u32 %v9462_v31, 16  ;;  %v4869_v12 = vld [vmem:[#allocation3 + $0x60] sm:$0xf] }
 0x329   :  { %281 = vst [vmem:[#allocation3 + $0x4c] sm:$0x1] %v280_v7  ;;  %v9476_v7 = vld [vmem:[#allocation3 + $0x34] sm:$0x1]  ;;  %v5010_v20 = vshrl.u32 %v4869_v12, 16  ;;  %v5013_v63 = vshll.u32 %v4869_v12, 16 }
 0x32a   :  { %v4937_v26 = vrot.slane %v4935_v3, 5  ;;  %v4963_v14 = vshll.u32 %v9476_v7, 16  ;;  %v9495_v3 = vrot.slane %v4977_v46, 5  ;;  %v9520_v46 = vld [vmem:[#allocation3 + $0x74] sm:$0x1] }
 0x32c   :  { %v4938_v39 = vsel %vm8186_vm10, %v4933_v44, %v4937_v26 }
 0x32e   :  { %7348 = vmatmul.mubr.msk.bf16.gmra.mrb[4].mxu1 %vm4085_vm3, %v6816_v18  ;;  %v4886_v18 = vrot.slane %v4884_v56, 4  ;;  %v4949_v56 = vshll.u32 %v9468_v25, 16 }
 0x32f   :  { %7351 = vmatprep.mubr.msk.bf16.mxu1 %vm4085_vm3, %v6817_v34  ;;  %v4909_v34 = vrot.slane %v4907_v4, 5  ;;  %v5015_v4 = vrot.slane %v5013_v63, 5  ;;  %v9512_v63 = vld [vmem:[%s9859_s4 + $0x18] sm:$0xf] }
 0x330   :  { %v4890_v23 = vor.u32 %v4889_v45, %v4886_v18  ;;  %v4867_v18 = vld [vmem:[#allocation3 + $0x58] sm:$0xf]  ;;  %v4960_v45 = vor.u32 %v4959_v32, %v4956_v9 }
 0x331   :  { %v4910_v54 = vsel %vm8186_vm10, %v4905_v2, %v4909_v34  ;;  %v4999_v33 = vshll.u32 %v4867_v18, 16  ;;  %v5041_v34 = vshll.u32 %v4873_v30, 16  ;;  %v4875_v9 = vld [vmem:[#allocation3 + $0x78] sm:$0xf] }
 0x332   :  { %v4891_v49 = vrot.slane %v4890_v23, 4  ;;  %v4996_v23 = vshrl.u32 %v4867_v18, 16  ;;  %v5052_v44 = vshrl.u32 %v4875_v9, 16  ;;  %v9507_v18 = vld [vmem:[#allocation3 + $0x6c] sm:$0x1] }
 0x336   :  { %7352 = vmatmul.mubr.msk.bf16.gmra.mrb[8].mxu1 %vm4085_vm3, %v6818_v62  ;;  %v4915_v62 = vshll.u32 %v4855_v37, 16 }
 0x337   :  { %7355 = vmatprep.mubr.msk.bf16.mxu1 %vm4085_vm3, %v6819_v58  ;;  %v4943_v58 = vshll.u32 %v4859_v21, 16 }
 0x338   :  { %v4917_v29 = vrot.slane %v4915_v62, 5 }
 0x339   :  { %v4945_v28 = vrot.slane %v4943_v58, 5 }
 0x33a   :  { %v4918_v11 = vor.u32 %v4917_v29, %v4914_v40  ;;  %v4965_v40 = vrot.slane %v4963_v14, 5  ;;  %v9493_v29 = vld [vmem:[#allocation3 + $0x44] sm:$0x1] }
 0x33b   :  { %v4946_v57 = vor.u32 %v4945_v28, %v4942_v38 }
 0x33d   :  { %v4947_v60 = vrot.slane %v4946_v57, 4  ;;  %v5055_v57 = vshll.u32 %v4875_v9, 16 }
 0x33e   :  { %7356 = vmatmul.mubr.msk.bf16.gmra.mrb[12].mxu1 %vm4085_vm3, %v6820_v0  ;;  %v4893_v0 = vshll.u32 %v9455_v24, 16 }
 0x33f   :  { %7361 = vmatprep.mubr.msk.bf16.mxu1 %vm4085_vm3, %v7780_v42  ;;  %v4923_v42 = vrot.slane %v4921_v51, 5 }
 0x340   :  { %v4895_v36 = vrot.slane %v4893_v0, 5  ;;  %v5012_v0 = vrot.slane %v5010_v20, 4  ;;  %v5043_v20 = vrot.slane %v5041_v34, 5 }
 0x342   :  { %v4896_v47 = vsel %vm8186_vm10, %v4891_v49, %v4895_v36  ;;  %v4877_v49 = vld [vmem:[#allocation3 + $0x80] sm:$0xf]  ;;  %v5038_v36 = vshrl.u32 %v4873_v30, 16  ;;  %v5016_v12 = vor.u32 %v5015_v4, %v5012_v0  ;;  %v9526_v4 = vld [vmem:[#allocation3 + $0x84] sm:$0x1] }
 0x343   :  { %v6847_v62 = vcombine.low %v4896_v47, %v4910_v54  ;;  %v5024_v47 = vshrl.u32 %v4871_v50, 16  ;;  %v5027_v54 = vshll.u32 %v4871_v50, 16  ;;  %v5075_v34 = vshll.u32 %v9526_v4, 16 }
 0x346   :  { %7362 = vmatmul.mubr.msk.bf16.vlgmr.msra.gmra.mrb[0].mxu1 %vm4085_vm3, %v7781_v16  ;;  %v4968_v16 = vshrl.u32 %v4863_v1, 16 }
 0x347   :  { %7378 = vmatpush3.bf16.msra.mxu1 %v5158_v15  ;;  %7365 = vmatprep.mubr.msk.bf16.mxu1 %vm4085_vm3, %v7782_v6  ;;  %v4971_v15 = vshll.u32 %v4863_v1, 16  ;;  %v309_v6 = vld [vmem:[#allocation3 + $0x9c] sm:$0x1]  ;;  %v4998_v1 = vrot.slane %v4996_v23, 4  ;;  %v5026_v23 = vrot.slane %v5024_v47, 4 }
 0x348   :  { %7737 = vmatprep.subr.msk.bf16.mxu1 %vm4110_vm4, %v9446_v61  ;;  %v310_v37 = vsel %vm8713_vm2, 0, %v309_v6  ;;  %v4970_v13 = vrot.slane %v4968_v16, 4  ;;  %v5001_v61 = vrot.slane %v4999_v33, 5  ;;  %v9504_v6 = vld [vmem:[#allocation3 + $0x5c] sm:$0x1]  ;;  %v5029_v33 = vrot.slane %v5027_v54, 5 }
 0x349   :  { %v4973_v21 = vrot.slane %v4971_v15, 5  ;;  %311 = vst [vmem:[#allocation3 + $0x9c] sm:$0x1] %v310_v37  ;;  %v4991_v15 = vshll.u32 %v9493_v29, 16  ;;  %v5005_v37 = vshll.u32 %v9504_v6, 16 }
 0x34a   :  { %v5002_v26 = vor.u32 %v5001_v61, %v4998_v1  ;;  %v9532_v1 = vld [vmem:[#allocation3 + $0x7c] sm:$0x1] }
 0x34b   :  { %v4974_v51 = vor.u32 %v4973_v21, %v4970_v13  ;;  %v4881_v21 = vld [vmem:[#allocation3 + $0x90] sm:$0xf] }
 0x34c   :  { %v5094_v30 = vshrl.u32 %v4881_v21, 16 }
 0x34d   :  { %v4975_v16 = vrot.slane %v4974_v51, 4  ;;  %v5033_v51 = vshll.u32 %v9507_v18, 16 }
 0x34e   :  { %7366 = vmatmul.mubr.msk.bf16.gmra.mrb[4].mxu1 %vm4085_vm3, %v7783_v22  ;;  %v4985_v22 = vshll.u32 %v4865_v19, 16  ;;  %v9499_v19 = vld [vmem:[#allocation3 + $0x64] sm:$0x1] }
 0x34f   :  { %7369 = vmatprep.mubr.msk.bf16.mxu1 %vm4085_vm3, %v7784_v48  ;;  %v4919_v48 = vrot.slane %v4918_v11, 4  ;;  %v5066_v11 = vshrl.u32 %v4877_v49, 16 }
 0x350   :  { %v4987_v58 = vrot.slane %v4985_v22, 5 }
 0x351   :  { %v4924_v43 = vsel %vm8186_vm10, %v4919_v48, %v4923_v42  ;;  %v5069_v42 = vshll.u32 %v4877_v49, 16  ;;  %v5017_v48 = vrot.slane %v5016_v12, 4  ;;  %v5068_v14 = vrot.slane %v5066_v11, 4 }
 0x352   :  { %v6848_v2 = vcombine.low %v4924_v43, %v4938_v39  ;;  %v4988_v28 = vor.u32 %v4987_v58, %v4984_v35  ;;  %v5003_v39 = vrot.slane %v5002_v26, 4  ;;  %v5054_v35 = vrot.slane %v5052_v44, 4 }
 0x353   :  { %v5071_v13 = vrot.slane %v5069_v42, 5  ;;  %v5057_v58 = vrot.slane %v5055_v57, 5  ;;  %v5097_v43 = vshll.u32 %v4881_v21, 16  ;;  %v5096_v12 = vrot.slane %v5094_v30, 4  ;;  %v9540_v57 = vld [vmem:[#allocation3 + $0x94] sm:$0x1] }
 0x354   :  { %v4989_v22 = vrot.slane %v4988_v28, 4  ;;  %v5061_v42 = vshll.u32 %v9532_v1, 16  ;;  %v5077_v44 = vrot.slane %v5075_v34, 5  ;;  %v5103_v21 = vshll.u32 %v9540_v57, 16 }
 0x355   :  { %v5072_v49 = vor.u32 %v5071_v13, %v5068_v14  ;;  %v5099_v11 = vrot.slane %v5097_v43, 5  ;;  %v5323_v43 = vrot.slane %v9455_v24, 5  ;;  %v5335_v24 = vrot.slane %v9462_v31, 5 }
 0x356   :  { %7370 = vmatmul.mubr.msk.bf16.gmra.mrb[8].mxu1 %vm4085_vm3, %v7785_v59  ;;  %v4961_v59 = vrot.slane %v4960_v45, 4  ;;  %v5040_v45 = vrot.slane %v5038_v36, 4  ;;  %v5058_v36 = vor.u32 %v5057_v58, %v5054_v35  ;;  %v5273_v35 = vld [vmem:[#allocation3 + $0x8] sm:$0xe] }
 0x357   :  { %7373 = vmatprep.mubr.msk.bf16.mxu1 %vm4085_vm3, %v7786_v55  ;;  %v4951_v55 = vrot.slane %v4949_v56, 5  ;;  %v5019_v56 = vshll.u32 %v9499_v19, 16  ;;  %v6863_v30 = vrot.slane %v5273_v35, 9  ;;  %v5367_v35 = vrot.slane %v9520_v46, 5 }
 0x358   :  { %v4966_v32 = vsel %vm8186_vm10, %v4961_v59, %v4965_v40  ;;  %v4879_v59 = vld [vmem:[#allocation3 + $0x88] sm:$0xf]  ;;  %v5044_v0 = vor.u32 %v5043_v20, %v5040_v45  ;;  %v5100_v45 = vor.u32 %v5099_v11, %v5096_v12  ;;  %v5063_v20 = vrot.slane %v5061_v42, 5 }
 0x359   :  { %v4952_v38 = vsel %vm8186_vm10, %v4947_v60, %v4951_v55  ;;  %v5021_v60 = vrot.slane %v5019_v56, 5  ;;  %v5007_v55 = vrot.slane %v5005_v37, 5  ;;  %v5080_v61 = vshrl.u32 %v4879_v59, 16 }
 0x35a   :  { %v6849_v53 = vcombine.low %v4952_v38, %v4966_v32  ;;  %v5083_v50 = vshll.u32 %v4879_v59, 16  ;;  %v5045_v32 = vrot.slane %v5044_v0, 4  ;;  %v5059_v56 = vrot.slane %v5058_v36, 4  ;;  %v5277_v36 = vld [vmem:[#allocation3 + $0x28] sm:$0xe] }
 0x35b   :  { %v5022_v40 = vsel %vm8186_vm10, %v5017_v48, %v5021_v60  ;;  %v5008_v28 = vsel %vm8186_vm10, %v5003_v39, %v5007_v55  ;;  %v5082_v54 = vrot.slane %v5080_v61, 4  ;;  %v9546_v48 = vld [vmem:[#allocation3 + $0x8c] sm:$0x1]  ;;  %v5101_v60 = vrot.slane %v5100_v45, 4  ;;  %v6913_v45 = vld [vmem:[%s9859_s4 + $0x1c] sm:$0xf] }
 0x35c   :  { %v6851_v9 = vcombine.low %v5008_v28, %v5022_v40  ;;  %v5085_v26 = vrot.slane %v5083_v50, 5  ;;  %v5089_v39 = vshll.u32 %v9546_v48, 16  ;;  %v5327_v59 = vrot.slane %v9458_v17, 5  ;;  %v5275_v50 = vld [vmem:[#allocation3 + $0x18] sm:$0xe] }
 0x35d   :  { %v5105_v0 = vrot.slane %v5103_v21, 5  ;;  %v5324_v61 = vsel %vm8385_vm14, %v6863_v30, %v5323_v43  ;;  %v5331_v12 = vrot.slane %v9460_v8, 5  ;;  %v6867_v11 = vrot.slane %v5277_v36, 9  ;;  %v7788_v36 = vld [vmem:[#allocation3 + $0x10] ss:$8 sps:$4 sm:$0xff]  }
 0x35e   :  { %7374 = vmatmul.mubr.msk.bf16.gmra.mrb[12].mxu1 %vm4085_vm3, %v7787_v52  ;;  %v4980_v52 = vsel %vm8186_vm10, %v4975_v16, %v9495_v3  ;;  %v5047_v3 = vshll.u32 %v9520_v46, 16  ;;  %v5073_v16 = vrot.slane %v5072_v49, 4  ;;  %v5086_v13 = vor.u32 %v5085_v26, %v5082_v54  ;;  %v5276_v49 = vld [vmem:[#allocation3 + $0x20] sm:$0xe] }
 0x35f   :  { %7379 = vmatprep.mubr.msk.bf16.mxu1 %vm4085_vm3, %v6847_v62  ;;  %v4993_v62 = vrot.slane %v4991_v15, 5  ;;  %v5091_v55 = vrot.slane %v5089_v39, 5  ;;  %v5106_v40 = vsel %vm8186_vm10, %v5101_v60, %v5105_v0  ;;  %v6866_v28 = vrot.slane %v5276_v49, 9  ;;  %v5282_v54 = vld [vmem:[#allocation3 + $0x60] sm:$0xe] }
 0x360   :  { %v5049_v47 = vrot.slane %v5047_v3, 5  ;;  %v5078_v37 = vsel %vm8186_vm10, %v5073_v16, %v5077_v44  ;;  %v5278_v3 = vld [vmem:[#allocation3 + $0x30] sm:$0xe]  ;;  %v5339_v42 = vrot.slane %v9468_v25, 5  ;;  %v5635_v26 = vsel %vm4110_vm4, %v9512_v63, 0 }
 0x361   :  { %v6868_v34 = vrot.slane %v5278_v3, 9  ;;  %v5336_v16 = vsel %vm8385_vm14, %v6866_v28, %v5335_v24  ;;  %v5355_v21 = vrot.slane %v9504_v6, 5  ;;  %v5283_v39 = vld [vmem:[#allocation3 + $0x68] sm:$0xe]  ;;  %v5363_v30 = vrot.slane %v9507_v18, 5 }
 0x362   :  { %v5340_v8 = vsel %vm8385_vm14, %v6867_v11, %v5339_v42  ;;  %v6873_v0 = vrot.slane %v5283_v39, 9  ;;  %v5287_v3 = vld [vmem:[#allocation3 + $0x88] sm:$0xe] }
 0x364   :  { %v5364_v49 = vsel %vm8385_vm14, %v6873_v0, %v5363_v30 }
 0x366   :  { %7380 = vmatmul.mubr.msk.bf16.vlgmr.msra.gmra.mrb[0].mxu1 %vm4085_vm3, %v6848_v2  ;;  %v5030_v2 = vor.u32 %v5029_v33, %v5026_v23  ;;  %v5064_v23 = vsel %vm8186_vm10, %v5059_v56, %v5063_v20  ;;  %v5279_v56 = vld [vmem:[#allocation3 + $0x38] sm:$0xe]  ;;  %v6872_v20 = vrot.slane %v5282_v54, 9  ;;  %v9634_v54 = vld [vmem:[#allocation3 + $0x14] sm:$0x1] }
 0x367   :  { %7396 = vmatpush3.bf16.msra.mxu1 %v5436_v5  ;;  %7383 = vmatprep.mubr.msk.bf16.mxu1 %vm4085_vm3, %v6849_v53  ;;  %v4994_v5 = vsel %vm8186_vm10, %v4989_v22, %v4993_v62  ;;  %v5035_v53 = vrot.slane %v5033_v51, 5  ;;  %v5050_v22 = vsel %vm8186_vm10, %v5045_v32, %v5049_v47  ;;  %v6853_v33 = vcombine.low %v5064_v23, %v5078_v37  ;;  %v5286_v23 = vld [vmem:[#allocation3 + $0x80] sm:$0xe] }
 0x368   :  { %7738 = vmatprep.subr.msk.bf16.mxu1 %vm4110_vm4, %v9512_v63  ;;  %v6850_v38 = vcombine.low %v4980_v52, %v4994_v5  ;;  %v5031_v15 = vrot.slane %v5030_v2, 4  ;;  %v5274_v52 = vld [vmem:[#allocation3 + $0x10] sm:$0xe]  ;;  %v5087_v5 = vrot.slane %v5086_v13, 4  ;;  %v6865_v32 = vrot.slane %v5275_v50, 9 }
 0x369   :  { %v6864_v58 = vrot.slane %v5274_v52, 9  ;;  %v5359_v37 = vrot.slane %v9499_v19, 5  ;;  %v6869_v63 = vrot.slane %v5279_v56, 9  ;;  %v5379_v50 = vrot.slane %v9546_v48, 5  ;;  %v9628_v48 = vld [vmem:[%s9859_s4 + $0x20] sm:$0xf] }
 0x36a   :  { %v5036_v14 = vsel %vm8186_vm10, %v5031_v15, %v5035_v53  ;;  %v5092_v2 = vsel %vm8186_vm10, %v5087_v5, %v5091_v55  ;;  %v5280_v15 = vld [vmem:[#allocation3 + $0x40] sm:$0xe]  ;;  %v5332_v47 = vsel %vm8385_vm14, %v6865_v32, %v5331_v12  ;;  %v5351_v53 = vrot.slane %v9493_v29, 5  ;;  %v7790_v32 = vld [vmem:[#allocation3 + $0x30] ss:$8 sps:$4 sm:$0xff]  }
 0x36b   :  { %v6852_v62 = vcombine.low %v5036_v14, %v5050_v22  ;;  %v5328_v51 = vsel %vm8385_vm14, %v6864_v58, %v5327_v59  ;;  %v6854_v17 = vcombine.low %v5092_v2, %v5106_v40  ;;  %v6870_v44 = vrot.slane %v5280_v15, 9  ;;  %v5281_v22 = vld [vmem:[#allocation3 + $0x58] sm:$0xe] }
 0x36c   :  { %v5347_v14 = vrot.slane %v9479_v41, 5  ;;  %v6871_v13 = vrot.slane %v5281_v22, 9  ;;  %v5360_v52 = vsel %vm8385_vm14, %v6872_v20, %v5359_v37  ;;  %v5285_v58 = vld [vmem:[#allocation3 + $0x78] sm:$0xe]  ;;  %v6876_v59 = vrot.slane %v5286_v23, 9 }
 0x36d   :  { %v5352_v29 = vsel %vm8385_vm14, %v6870_v44, %v5351_v53  ;;  %v5375_v5 = vrot.slane %v9526_v4, 5  ;;  %v6875_v43 = vrot.slane %v5285_v58, 9  ;;  %v5371_v55 = vrot.slane %v9532_v1, 5  ;;  %v5752_v12 = vld [vmem:[#allocation3 + $0x18] sm:$0xf] }
 0x36e   :  { %7384 = vmatmul.mubr.msk.bf16.gmra.mrb[4].mxu1 %vm4085_vm3, %v6850_v38  ;;  %v6880_v38 = vcombine.low %v5324_v61, %v5328_v51  ;;  %v5348_v19 = vsel %vm8385_vm14, %v6869_v63, %v5347_v14  ;;  %v5356_v41 = vsel %vm8385_vm14, %v6871_v13, %v5355_v21  ;;  %v5288_v51 = vld [vmem:[#allocation3 + $0x90] sm:$0xe]  ;;  %v5383_v61 = vrot.slane %v9540_v57, 5  ;;  %v7789_v57 = vld [vmem:[#allocation3 + $0x20] ss:$8 sps:$4 sm:$0xff]  }
 0x36f   :  { %7387 = vmatprep.mubr.msk.bf16.mxu1 %vm4085_vm3, %v6851_v9  ;;  %v5343_v9 = vrot.slane %v9476_v7, 5  ;;  %v6881_v7 = vcombine.low %v5332_v47, %v5336_v16  ;;  %v6884_v60 = vcombine.low %v5356_v41, %v5360_v52  ;;  %v5376_v46 = vsel %vm8385_vm14, %v6876_v59, %v5375_v5  ;;  %v5754_v16 = vld [vmem:[#allocation3 + $0x20] sm:$0xf]  ;;  %v9637_v20 = vld [vmem:[#allocation3 + $0x1c] sm:$0x1] }
 0x370   :  { %v5372_v4 = vsel %vm8385_vm14, %v6875_v43, %v5371_v55  ;;  %v6878_v18 = vrot.slane %v5288_v51, 9  ;;  %v6877_v1 = vrot.slane %v5287_v3, 9  ;;  %v5797_v15 = vshrl.u32 %v5752_v12, 16  ;;  %v7792_v22 = vld [vmem:[#allocation3 + $0x60] ss:$8 sps:$4 sm:$0xff]  }
 0x371   :  { %v5344_v31 = vsel %vm8385_vm14, %v6868_v34, %v5343_v9  ;;  %v6057_v34 = vsel %vm4110_vm4, %v6913_v45, 0  ;;  %v5750_v9 = vld [vmem:[#allocation3 + $0x10] sm:$0xf]  ;;  %v5800_v47 = vshll.u32 %v5752_v12, 16  ;;  %v5814_v56 = vshll.u32 %v5754_v16, 16 }
 0x372   :  { %v6882_v25 = vcombine.low %v5340_v8, %v5344_v31  ;;  %v5380_v28 = vsel %vm8385_vm14, %v6877_v1, %v5379_v50  ;;  %v5783_v11 = vshrl.u32 %v5750_v9, 16  ;;  %v5786_v42 = vshll.u32 %v5750_v9, 16  ;;  %v5756_v31 = vld [vmem:[#allocation3 + $0x28] sm:$0xf]  ;;  %v5760_v14 = vld [vmem:[#allocation3 + $0x38] sm:$0xf] }
 0x373   :  { %v5811_v8 = vshrl.u32 %v5754_v16, 16  ;;  %v5825_v44 = vshrl.u32 %v5756_v31, 16  ;;  %v5828_v53 = vshll.u32 %v5756_v31, 16  ;;  %v5792_v37 = vshll.u32 %v9634_v54, 16  ;;  %v5762_v59 = vld [vmem:[#allocation3 + $0x40] sm:$0xf] }
 0x374   :  { %v5799_v63 = vrot.slane %v5797_v15, 4  ;;  %v5802_v21 = vrot.slane %v5800_v47, 5  ;;  %v5764_v55 = vld [vmem:[#allocation3 + $0x48] sm:$0xf]  ;;  %v5870_v1 = vshll.u32 %v5762_v59, 16 }
 0x375   :  { %v5813_v52 = vrot.slane %v5811_v8, 4  ;;  %v5827_v23 = vrot.slane %v5825_v44, 4  ;;  %v5794_v0 = vrot.slane %v5792_v37, 5  ;;  %v7794_v3 = vld [vmem:[#allocation3 + $0x80] ss:$8 sps:$4 sm:$0xff]  }
 0x376   :  { %7388 = vmatmul.mubr.msk.bf16.gmra.mrb[8].mxu1 %vm4085_vm3, %v6852_v62  ;;  %v5284_v62 = vld [vmem:[#allocation3 + $0x70] sm:$0xe]  ;;  %v5803_v30 = vor.u32 %v5802_v21, %v5799_v63  ;;  %v5768_v9 = vld [vmem:[#allocation3 + $0x68] sm:$0xf]  ;;  %v9654_v31 = vld [vmem:[#allocation3 + $0x3c] sm:$0x1] }
 0x377   :  { %7391 = vmatprep.mubr.msk.bf16.mxu1 %vm4085_vm3, %v6853_v33  ;;  %v6883_v33 = vcombine.low %v5348_v19, %v5352_v29  ;;  %v6874_v6 = vrot.slane %v5284_v62, 9  ;;  %v9641_v29 = vld [vmem:[#allocation3 + $0x24] sm:$0x1]  ;;  %v5816_v62 = vrot.slane %v5814_v56, 5  ;;  %v9643_v19 = vld [vmem:[#allocation3 + $0x2c] sm:$0x1] }
 0x378   :  { %v5820_v58 = vshll.u32 %v9641_v29, 16  ;;  %v5834_v43 = vshll.u32 %v9643_v19, 16  ;;  %v5872_v56 = vrot.slane %v5870_v1, 5  ;;  %v5862_v37 = vshll.u32 %v9654_v31, 16 }
 0x379   :  { %v5368_v40 = vsel %vm8385_vm14, %v6874_v6, %v5367_v35  ;;  %v5856_v6 = vshll.u32 %v5760_v14, 16  ;;  %v5806_v35 = vshll.u32 %v9637_v20, 16 }
 0x37a   :  { %v6885_v2 = vcombine.low %v5364_v49, %v5368_v40  ;;  %v7793_v40 = vld [vmem:[#allocation3 + $0x70] ss:$8 sps:$4 sm:$0xff]   ;;  %v5836_v16 = vrot.slane %v5834_v43, 5 }
 0x37b   :  { %v5808_v50 = vrot.slane %v5806_v35, 5  ;;  %v9671_v35 = vld [vmem:[#allocation3 + $0x6c] sm:$0x1] }
 0x37e   :  { %7392 = vmatmul.mubr.msk.bf16.gmra.mrb[12].mxu1 %vm4085_vm3, %v6854_v17  ;;  %v6886_v17 = vcombine.low %v5372_v4, %v5376_v46  ;;  %v5817_v46 = vor.u32 %v5816_v62, %v5813_v52  ;;  %v5766_v4 = vld [vmem:[#allocation3 + $0x60] sm:$0xf] }
 0x37f   :  { %7397 = vmatprep.mubr.msk.bf16.mxu1 %vm4085_vm3, %v6880_v38  ;;  %v5384_v38 = vsel %vm8385_vm14, %v6878_v18, %v5383_v61  ;;  %v5858_v18 = vrot.slane %v5856_v6, 5  ;;  %v5867_v61 = vshrl.u32 %v5762_v59, 16  ;;  %v5898_v12 = vshll.u32 %v5766_v4, 16 }
 0x380   :  { %v6887_v24 = vcombine.low %v5380_v28, %v5384_v38  ;;  %v5822_v38 = vrot.slane %v5820_v58, 5  ;;  %v9649_v28 = vld [vmem:[#allocation3 + $0x34] sm:$0x1]  ;;  %v5772_v58 = vld [vmem:[#allocation3 + $0x78] sm:$0xf] }
 0x381   :  { %v5848_v47 = vshll.u32 %v9649_v28, 16  ;;  %v5869_v8 = vrot.slane %v5867_v61, 4  ;;  %v6238_v27 = vrot.slane %v9649_v28, 5  ;;  %v6180_v28 = vld [vmem:[#allocation3 + $0x60] sm:$0xe] }
 0x383   :  { %v5873_v6 = vor.u32 %v5872_v56, %v5869_v8  ;;  %v5850_v59 = vrot.slane %v5848_v47, 5  ;;  %v5778_v56 = vld [vmem:[#allocation3 + $0x90] sm:$0xf] }
 0x385   :  { %v5874_v61 = vrot.slane %v5873_v6, 4  ;;  %v9696_v6 = vld [vmem:[#allocation3 + $0x84] sm:$0x1] }
 0x386   :  { %7398 = vmatmul.mubr.msk.bf16.vlgmr.msra.gmra.mrb[0].mxu1 %vm4085_vm3, %v6881_v7  ;;  %v5785_v7 = vrot.slane %v5783_v11, 4  ;;  %v5818_v11 = vrot.slane %v5817_v46, 4 }
 0x387   :  { %7414 = vmatpush3.bf16.msra.mxu1 %v5635_v26  ;;  %7401 = vmatprep.mubr.msk.bf16.mxu1 %vm4085_vm3, %v6882_v25  ;;  %v5788_v26 = vrot.slane %v5786_v42, 5  ;;  %v7791_v25 = vld [vmem:[#allocation3 + $0x40] ss:$8 sps:$4 sm:$0xff]  }
 0x388   :  { %7739 = vmatprep.subr.msk.bf16.mxu1 %vm4110_vm4, %v6913_v45  ;;  %v5758_v45 = vld [vmem:[#allocation3 + $0x30] sm:$0xf] }
 0x389   :  { %v5789_v13 = vor.u32 %v5788_v26, %v5785_v7  ;;  %v5839_v41 = vshrl.u32 %v5758_v45, 16  ;;  %v5842_v39 = vshll.u32 %v5758_v45, 16  ;;  %v9657_v26 = vld [vmem:[#allocation3 + $0x44] sm:$0x1] }
 0x38b   :  { %v5790_v5 = vrot.slane %v5789_v13, 4  ;;  %v5841_v49 = vrot.slane %v5839_v41, 4  ;;  %v7795_v13 = vld [vmem:[#allocation3 + $0x90] ss:$8 sps:$4 sm:$0xff]   ;;  %v5823_v41 = vsel %vm8186_vm10, %v5818_v11, %v5822_v38  ;;  %v5776_v38 = vld [vmem:[#allocation3 + $0x88] sm:$0xf] }
 0x38c   :  { %v5968_v47 = vshll.u32 %v5776_v38, 16 }
 0x38e   :  { %7402 = vmatmul.mubr.msk.bf16.gmra.mrb[4].mxu1 %vm4085_vm3, %v6883_v33  ;;  %v5830_v33 = vrot.slane %v5828_v53, 5  ;;  %v5909_v53 = vshrl.u32 %v5768_v9, 16 }
 0x38f   :  { %7405 = vmatprep.mubr.msk.bf16.mxu1 %vm4085_vm3, %v6884_v60  ;;  %v5853_v60 = vshrl.u32 %v5760_v14, 16  ;;  %v5900_v14 = vrot.slane %v5898_v12, 5 }
 0x390   :  { %v5831_v51 = vor.u32 %v5830_v33, %v5827_v23  ;;  %v5876_v23 = vshll.u32 %v9657_v26, 16  ;;  %v9665_v33 = vld [vmem:[#allocation3 + $0x64] sm:$0x1] }
 0x391   :  { %v5904_v1 = vshll.u32 %v9665_v33, 16 }
 0x392   :  { %v5832_v42 = vrot.slane %v5831_v51, 4  ;;  %v5774_v51 = vld [vmem:[#allocation3 + $0x80] sm:$0xf] }
 0x393   :  { %v5906_v8 = vrot.slane %v5904_v1, 5 }
 0x394   :  { %v5837_v52 = vsel %vm8186_vm10, %v5832_v42, %v5836_v16 }
 0x396   :  { %7406 = vmatmul.mubr.msk.bf16.gmra.mrb[8].mxu1 %vm4085_vm3, %v6885_v2  ;;  %v5844_v2 = vrot.slane %v5842_v39, 5  ;;  %v6335_v39 = vsel %vm4110_vm4, %v9628_v48, 0 }
 0x397   :  { %7409 = vmatprep.mubr.msk.bf16.mxu1 %vm4085_vm3, %v6886_v17  ;;  %v5855_v17 = vrot.slane %v5853_v60, 4 }
 0x398   :  { %v5845_v15 = vor.u32 %v5844_v2, %v5841_v49  ;;  %v5878_v2 = vrot.slane %v5876_v23, 5 }
 0x399   :  { %v5859_v7 = vor.u32 %v5858_v18, %v5855_v17  ;;  %v5940_v17 = vshll.u32 %v5772_v58, 16 }
 0x39a   :  { %v5846_v62 = vrot.slane %v5845_v15, 4  ;;  %v5965_v15 = vshrl.u32 %v5776_v38, 16 }
 0x39b   :  { %v5860_v60 = vrot.slane %v5859_v7, 4  ;;  %v5942_v16 = vrot.slane %v5940_v17, 5 }
 0x39c   :  { %v5851_v49 = vsel %vm8186_vm10, %v5846_v62, %v5850_v59  ;;  %v9694_v62 = vld [vmem:[#allocation3 + $0x7c] sm:$0x1] }
 0x39e   :  { %7410 = vmatmul.mubr.msk.bf16.gmra.mrb[12].mxu1 %vm4085_vm3, %v6887_v24  ;;  %v5881_v24 = vshrl.u32 %v5764_v55, 16 }
 0x39f   :  { %7415 = vmatprep.mubr.msk.bf16.mxu1 %vm4085_vm3, %v7788_v36  ;;  %v5884_v36 = vshll.u32 %v5764_v55, 16  ;;  %v6915_v55 = vcombine.low %v5823_v41, %v5837_v52  ;;  %v5967_v41 = vrot.slane %v5965_v15, 4 }
 0x3a1   :  { %v5886_v44 = vrot.slane %v5884_v36, 5 }
 0x3a6   :  { %7416 = vmatmul.mubr.msk.bf16.vlgmr.msra.gmra.mrb[0].mxu1 %vm4085_vm3, %v7789_v57  ;;  %v5795_v57 = vsel %vm8186_vm10, %v5790_v5, %v5794_v0  ;;  %v9674_v5 = vld [vmem:[#allocation3 + $0x4c] sm:$0x1] }
 0x3a7   :  { %7432 = vmatpush3.bf16.msra.mxu1 %v6057_v34  ;;  %7419 = vmatprep.mubr.msk.bf16.mxu1 %vm4085_vm3, %v7790_v32  ;;  %v5804_v34 = vrot.slane %v5803_v30, 4  ;;  %v5895_v32 = vshrl.u32 %v5766_v4, 16  ;;  %v5911_v30 = vrot.slane %v5909_v53, 4  ;;  %v5890_v46 = vshll.u32 %v9674_v5, 16  ;;  %v5770_v4 = vld [vmem:[#allocation3 + $0x70] sm:$0xf] }
 0x3a8   :  { %7740 = vmatprep.subr.msk.bf16.mxu1 %vm4110_vm4, %v9628_v48  ;;  %v5923_v12 = vshrl.u32 %v5770_v4, 16  ;;  %v5926_v11 = vshll.u32 %v5770_v4, 16  ;;  %v5960_v4 = vshll.u32 %v9696_v6, 16 }
 0x3a9   :  { %v5809_v45 = vsel %vm8186_vm10, %v5804_v34, %v5808_v50  ;;  %v5897_v63 = vrot.slane %v5895_v32, 4  ;;  %v5918_v50 = vshll.u32 %v9671_v35, 16  ;;  %v5954_v34 = vshll.u32 %v5774_v51, 16 }
 0x3aa   :  { %v6914_v21 = vcombine.low %v5795_v57, %v5809_v45  ;;  %v5951_v57 = vshrl.u32 %v5774_v51, 16  ;;  %v5780_v45 = vld [vmem:[#allocation3 + $0x98] sm:$0xf]  ;;  %v9702_v51 = vld [vmem:[#allocation3 + $0x8c] sm:$0x1] }
 0x3ab   :  { %v5901_v48 = vor.u32 %v5900_v14, %v5897_v63  ;;  %v9690_v14 = vld [vmem:[#allocation3 + $0x74] sm:$0x1]  ;;  %v5993_v59 = vshrl.u32 %v5780_v45, 16  ;;  %v5974_v38 = vshll.u32 %v9702_v51, 16 }
 0x3ac   :  { %v5953_v53 = vrot.slane %v5951_v57, 4  ;;  %v9708_v57 = vld [vmem:[#allocation3 + $0x94] sm:$0x1] }
 0x3ad   :  { %v5902_v32 = vrot.slane %v5901_v48, 4  ;;  %v5946_v48 = vshll.u32 %v9694_v62, 16 }
 0x3ae   :  { %7420 = vmatmul.mubr.msk.bf16.gmra.mrb[4].mxu1 %vm4085_vm3, %v7791_v25  ;;  %v5883_v25 = vrot.slane %v5881_v24, 4 }
 0x3af   :  { %7423 = vmatprep.mubr.msk.bf16.mxu1 %vm4085_vm3, %v7792_v22  ;;  %v5912_v22 = vshll.u32 %v5768_v9, 16  ;;  %v5892_v9 = vrot.slane %v5890_v46, 5  ;;  %v5907_v52 = vsel %vm8186_vm10, %v5902_v32, %v5906_v8 }
 0x3b0   :  { %v5887_v0 = vor.u32 %v5886_v44, %v5883_v25  ;;  %v5879_v25 = vsel %vm8186_vm10, %v5874_v61, %v5878_v2  ;;  %v5920_v44 = vrot.slane %v5918_v50, 5  ;;  %v5995_v61 = vrot.slane %v5993_v59, 4 }
 0x3b1   :  { %v5914_v43 = vrot.slane %v5912_v22, 5  ;;  %v5956_v22 = vrot.slane %v5954_v34, 5 }
 0x3b2   :  { %v5888_v24 = vrot.slane %v5887_v0, 4  ;;  %v5996_v0 = vshll.u32 %v5780_v45, 16 }
 0x3b3   :  { %v5915_v36 = vor.u32 %v5914_v43, %v5911_v30  ;;  %v5932_v30 = vshll.u32 %v9690_v14, 16  ;;  %v5957_v43 = vor.u32 %v5956_v22, %v5953_v53 }
 0x3b4   :  { %v5998_v1 = vrot.slane %v5996_v0, 5  ;;  %v6175_v0 = vld [vmem:[#allocation3 + $0x28] sm:$0xe] }
 0x3b5   :  { %v5916_v63 = vrot.slane %v5915_v36, 4  ;;  %v5958_v50 = vrot.slane %v5957_v43, 4  ;;  %v5948_v36 = vrot.slane %v5946_v48, 5  ;;  %v5934_v34 = vrot.slane %v5932_v30, 5  ;;  %v6176_v30 = vld [vmem:[#allocation3 + $0x30] sm:$0xe] }
 0x3b6   :  { %7424 = vmatmul.mubr.msk.bf16.gmra.mrb[8].mxu1 %vm4085_vm3, %v7793_v40  ;;  %v5864_v40 = vrot.slane %v5862_v37, 5  ;;  %v5893_v37 = vsel %vm8186_vm10, %v5888_v24, %v5892_v9  ;;  %v5962_v9 = vrot.slane %v5960_v4, 5  ;;  %v6177_v48 = vld [vmem:[#allocation3 + $0x38] sm:$0xe]  ;;  %v6230_v4 = vrot.slane %v9641_v29, 5 }
 0x3b7   :  { %7427 = vmatprep.mubr.msk.bf16.mxu1 %vm4085_vm3, %v7794_v3  ;;  %v5937_v3 = vshrl.u32 %v5772_v58, 16  ;;  %v5982_v58 = vshll.u32 %v5778_v56, 16 }
 0x3b8   :  { %v5865_v18 = vsel %vm8186_vm10, %v5860_v60, %v5864_v40  ;;  %v5970_v60 = vrot.slane %v5968_v47, 5  ;;  %v5921_v40 = vsel %vm8186_vm10, %v5916_v63, %v5920_v44  ;;  %v5963_v47 = vsel %vm8186_vm10, %v5958_v50, %v5962_v9 }
 0x3b9   :  { %v5939_v42 = vrot.slane %v5937_v3, 4  ;;  %v6916_v7 = vcombine.low %v5851_v49, %v5865_v18  ;;  %v6918_v49 = vcombine.low %v5907_v52, %v5921_v40  ;;  %v5984_v18 = vrot.slane %v5982_v58, 5 }
 0x3ba   :  { %v5971_v3 = vor.u32 %v5970_v60, %v5967_v41  ;;  %v6222_v52 = vrot.slane %v9634_v54, 5  ;;  %v6226_v60 = vrot.slane %v9637_v20, 5  ;;  %v6234_v20 = vrot.slane %v9643_v19, 5 }
 0x3bb   :  { %v5943_v23 = vor.u32 %v5942_v16, %v5939_v42  ;;  %v5999_v16 = vor.u32 %v5998_v1, %v5995_v61  ;;  %v6178_v61 = vld [vmem:[#allocation3 + $0x40] sm:$0xe]  ;;  %v6179_v1 = vld [vmem:[#allocation3 + $0x48] sm:$0xe]  ;;  %v6250_v9 = vrot.slane %v9674_v5, 5 }
 0x3bc   :  { %v5972_v32 = vrot.slane %v5971_v3, 4  ;;  %v6935_v3 = vrot.slane %v6177_v48, 9  ;;  %v6936_v29 = vrot.slane %v6178_v61, 9 }
 0x3bd   :  { %v5944_v2 = vrot.slane %v5943_v23, 4 }
 0x3be   :  { %7428 = vmatmul.mubr.msk.bf16.gmra.mrb[12].mxu1 %vm4085_vm3, %v7795_v13  ;;  %v5925_v13 = vrot.slane %v5923_v12, 4  ;;  %v9710_v12 = vld [vmem:[#allocation3 + $0x9c] sm:$0x1] }
 0x3bf   :  { %7433 = vmatprep.mubr.msk.bf16.mxu1 %vm4085_vm3, %v6914_v21  ;;  %v5928_v21 = vrot.slane %v5926_v11, 5  ;;  %v5949_v11 = vsel %vm8186_vm10, %v5944_v2, %v5948_v36  ;;  %v6002_v15 = vshll.u32 %v9710_v12, 16 }
 0x3c1   :  { %v5929_v46 = vor.u32 %v5928_v21, %v5925_v13  ;;  %v6004_v63 = vrot.slane %v6002_v15, 5  ;;  %v6173_v13 = vld [vmem:[#allocation3 + $0x18] sm:$0xe]  ;;  %v6258_v15 = vrot.slane %v9671_v35, 5  ;;  %v6266_v35 = vrot.slane %v9694_v62, 5 }
 0x3c2   :  { %v6931_v41 = vrot.slane %v6173_v13, 9  ;;  %v6262_v13 = vrot.slane %v9690_v14, 5 }
 0x3c3   :  { %v5930_v24 = vrot.slane %v5929_v46, 4  ;;  %v6933_v46 = vrot.slane %v6175_v0, 9  ;;  %v6278_v0 = vrot.slane %v9708_v57, 5 }
 0x3c4   :  { %v6227_v54 = vsel %vm8385_vm14, %v6931_v41, %v6226_v60  ;;  %v6186_v41 = vld [vmem:[#allocation3 + $0x90] sm:$0xe]  ;;  %v6187_v60 = vld [vmem:[#allocation3 + $0x98] sm:$0xe] }
 0x3c5   :  { %v5935_v8 = vsel %vm8186_vm10, %v5930_v24, %v5934_v34  ;;  %v6937_v34 = vrot.slane %v6179_v1, 9 }
 0x3c6   :  { %7434 = vmatmul.mubr.msk.bf16.vlgmr.msra.gmra.mrb[0].mxu1 %vm4085_vm3, %v6915_v55  ;;  %v6917_v55 = vcombine.low %v5879_v25, %v5893_v37  ;;  %v6172_v25 = vld [vmem:[#allocation3 + $0x10] sm:$0xe]  ;;  %v6919_v44 = vcombine.low %v5935_v8, %v5949_v11  ;;  %v6000_v37 = vrot.slane %v5999_v16, 4  ;;  %v6938_v11 = vrot.slane %v6180_v28, 9  ;;  %v6184_v8 = vld [vmem:[#allocation3 + $0x80] sm:$0xe] }
 0x3c7   :  { %7450 = vmatpush3.bf16.msra.mxu1 %v6335_v39  ;;  %7437 = vmatprep.mubr.msk.bf16.mxu1 %vm4085_vm3, %v6916_v7  ;;  %v5979_v39 = vshrl.u32 %v5778_v56, 16  ;;  %v5976_v7 = vrot.slane %v5974_v38, 5  ;;  %v5988_v56 = vshll.u32 %v9708_v57, 16  ;;  %v6930_v21 = vrot.slane %v6172_v25, 9  ;;  %v6182_v25 = vld [vmem:[#allocation3 + $0x70] sm:$0xe] }
 0x3c8   :  { %v6005_v58 = vsel %vm8186_vm10, %v6000_v37, %v6004_v63  ;;  %v6270_v37 = vrot.slane %v9696_v6, 5  ;;  %v6940_v63 = vrot.slane %v6182_v25, 9  ;;  %v9788_v57 = vld [vmem:[%s9860_s5] ss:$0 sm:$0xff]  ;;  %s7852_s5 = smov [#allocation7]  }
 0x3c9   :  { %v5981_v17 = vrot.slane %v5979_v39, 4  ;;  %v5977_v53 = vsel %vm8186_vm10, %v5972_v32, %v5976_v7  ;;  %v5990_v23 = vrot.slane %v5988_v56, 5  ;;  %v6223_v59 = vsel %vm8385_vm14, %v6930_v21, %v6222_v52  ;;  %v6181_v32 = vld [vmem:[#allocation3 + $0x68] sm:$0xe]  ;;  %v6183_v7 = vld [vmem:[#allocation3 + $0x78] sm:$0xe] }
 0x3ca   :  { %v6920_v22 = vcombine.low %v5963_v47, %v5977_v53  ;;  %v6947_v40 = vcombine.low %v6223_v59, %v6227_v54  ;;  %v6939_v16 = vrot.slane %v6181_v32, 9  ;;  %v6941_v53 = vrot.slane %v6183_v7, 9 }
 0x3cb   :  { %v5985_v42 = vor.u32 %v5984_v18, %v5981_v17  ;;  %v6242_v17 = vrot.slane %v9654_v31, 5  ;;  %v6235_v18 = vsel %vm8385_vm14, %v6933_v46, %v6234_v20  ;;  %v6246_v31 = vrot.slane %v9657_v26, 5 }
 0x3cc   :  { %v6251_v26 = vsel %vm8385_vm14, %v6937_v34, %v6250_v9  ;;  %v6274_v52 = vrot.slane %v9702_v51, 5  ;;  %v6944_v59 = vrot.slane %v6186_v41, 9  ;;  %v6945_v51 = vrot.slane %v6187_v60, 9 }
 0x3cd   :  { %v5986_v45 = vrot.slane %v5985_v42, 4  ;;  %v6243_v24 = vsel %vm8385_vm14, %v6935_v3, %v6242_v17  ;;  %v6254_v42 = vrot.slane %v9665_v33, 5  ;;  %v6247_v47 = vsel %vm8385_vm14, %v6936_v29, %v6246_v31 }
 0x3ce   :  { %7438 = vmatmul.mubr.msk.bf16.gmra.mrb[4].mxu1 %vm4085_vm3, %v6917_v55  ;;  %v6174_v55 = vld [vmem:[#allocation3 + $0x20] sm:$0xe]  ;;  %v6950_v56 = vcombine.low %v6247_v47, %v6251_v26  ;;  %v6259_v33 = vsel %vm8385_vm14, %v6939_v16, %v6258_v15 }
 0x3cf   :  { %7441 = vmatprep.mubr.msk.bf16.mxu1 %vm4085_vm3, %v6918_v49  ;;  %v5991_v39 = vsel %vm8186_vm10, %v5986_v45, %v5990_v23  ;;  %v6934_v49 = vrot.slane %v6176_v30, 9  ;;  %v6932_v2 = vrot.slane %v6174_v55, 9  ;;  %v6255_v5 = vsel %vm8385_vm14, %v6938_v11, %v6254_v42 }
 0x3d0   :  { %v6921_v43 = vcombine.low %v5991_v39, %v6005_v58  ;;  %v6942_v45 = vrot.slane %v6184_v8, 9  ;;  %v6267_v23 = vsel %vm8385_vm14, %v6941_v53, %v6266_v35  ;;  %v6263_v39 = vsel %vm8385_vm14, %v6940_v63, %v6262_v13 }
 0x3d1   :  { %v6239_v19 = vsel %vm8385_vm14, %v6934_v49, %v6238_v27  ;;  %v6231_v50 = vsel %vm8385_vm14, %v6932_v2, %v6230_v4  ;;  %v6952_v6 = vcombine.low %v6263_v39, %v6267_v23  ;;  %v6282_v30 = vrot.slane %v9710_v12, 5  ;;  %v9793_v12 = vld [vmem:[%s9861_s6] ss:$0 sm:$0xff]  ;;  %s6533_s6 = sshll.u32 %s7852_s5, 4  ;;  %s6534_s6 = int_to_ptr.vmem [resolvable:$true] %s6533_s6 }
 0x3d2   :  { %v6948_v38 = vcombine.low %v6231_v50, %v6235_v18  ;;  %v6949_v36 = vcombine.low %v6239_v19, %v6243_v24  ;;  %v6271_v62 = vsel %vm8385_vm14, %v6942_v45, %v6270_v37  ;;  %s7821_s8 = scalar_lea.vmem %s6534_s6, 2048  ;;  %p7826_p9 = scmp.lt.s32.totalorder %s6534_s6, %s6534_s6 }
 0x3d3   :  { %v6283_v54 = vsel %vm8385_vm14, %v6945_v51, %v6282_v30  ;;  %p7822_p8 = scmp.ne.s32.totalorder %s6534_s6, %s7821_s8  ;;  %p7827_p10 = scmp.lt.s32.totalorder %s7821_s8, %s7821_s8 }
 0x3d5   :  { %p7828_p11 = por %p7827_p10, %p7826_p9 }
 0x3d6   :  { %7442 = vmatmul.mubr.msk.bf16.gmra.mrb[8].mxu1 %vm4085_vm3, %v6919_v44  ;;  %v6951_v44 = vcombine.low %v6255_v5, %v6259_v33 }
 0x3d7   :  { %7445 = vmatprep.mubr.msk.bf16.mxu1 %vm4085_vm3, %v6920_v22  ;;  %v6185_v22 = vld [vmem:[#allocation3 + $0x88] sm:$0xe]  ;;  %p7829_p12 = pnand %p7828_p11, %p7822_p8 }
 0x3d8   :  { %v6943_v21 = vrot.slane %v6185_v22, 9 }
 0x3da   :  { %v6275_v58 = vsel %vm8385_vm14, %v6943_v21, %v6274_v52 }
 0x3db   :  { %v6953_v14 = vcombine.low %v6271_v62, %v6275_v58 }
 0x3de   :  { %7446 = vmatmul.mubr.msk.bf16.gmra.mrb[12].mxu1 %vm4085_vm3, %v6921_v43  ;;  %v6279_v43 = vsel %vm8385_vm14, %v6944_v59, %v6278_v0 }
 0x3df   :  { %7451 = vmatprep.mubr.msk.bf16.mxu1 %vm4085_vm3, %v6947_v40  ;;  %v6954_v55 = vcombine.low %v6279_v43, %v6283_v54 }
 0x3e6   :  { %7452 = vmatmul.mubr.msk.bf16.vlgmr.msra.gmra.mrb[0].mxu1 %vm4085_vm3, %v6948_v38 }
 0x3e7   :  { %7455 = vmatprep.mubr.msk.bf16.mxu1 %vm4085_vm3, %v6949_v36 }
 0x3ee   :  { %7456 = vmatmul.mubr.msk.bf16.gmra.mrb[4].mxu1 %vm4085_vm3, %v6950_v56 }
 0x3ef   :  { %7459 = vmatprep.mubr.msk.bf16.mxu1 %vm4085_vm3, %v6951_v44 }
 0x3f6   :  { %7460 = vmatmul.mubr.msk.bf16.gmra.mrb[8].mxu1 %vm4085_vm3, %v6952_v6 }
 0x3f7   :  { %7463 = vmatprep.mubr.msk.bf16.mxu1 %vm4085_vm3, %v6953_v14 }
 0x3fe   :  { %7464 = vmatmul.mubr.msk.bf16.gmra.mrb[12].mxu1 %vm4085_vm3, %v6954_v55 }
 0x4b9   :  { %v7453_v40 = vpop.f32.mrb[0].mxu1 }
 0x4ba   :  { %v6459_v46 = vmul.f32 %v7453_v40, %v9788_v57  ;;  %v6371_v20 = vpop.f32.mrb[1].mxu1 }
 0x4bb   :  { %v6457_v10 = vmul.f32 %v9788_v57, %v6371_v20  ;;  %v7454_v48 = vpop.f32.mrb[2].mxu1 }
 0x4bc   :  { %v6482_v49 = vadd.f32 %v9793_v12, %v6459_v46  ;;  %v6460_v27 = vmul.f32 %v7454_v48, %v9788_v57  ;;  %v6374_v2 = vpop.f32.mrb[3].mxu1 }
 0x4bd   :  { %v6480_v4 = vadd.f32 %v9793_v12, %v6457_v10  ;;  %v6458_v3 = vmul.f32 %v9788_v57, %v6374_v2 }
 0x4be   :  { %v6498_v17 = vmax.f32 %v6482_v49, 0.0  ;;  %v6483_v18 = vadd.f32 %v9793_v12, %v6460_v27 }
 0x4bf   :  { %v6496_v61 = vmax.f32 %v6480_v4, 0.0  ;;  %v6481_v19 = vadd.f32 %v9793_v12, %v6458_v3 }
 0x4c0   :  { %6514 = vst.msk [vmem:[#allocation7 + $0x10] sm:$0xff] %vm4085_vm3, %v6498_v17  ;;  %v6499_v1 = vmax.f32 %v6483_v18, 0.0 }
 0x4c1   :  { %6512 = vst.msk [vmem:[#allocation7] sm:$0xff] %vm4085_vm3, %v6496_v61  ;;  %v6497_v50 = vmax.f32 %v6481_v19, 0.0  ;;  %v7457_v28 = vpop.f32.mrb[4].mxu1 }
 0x4c2   :  { %6515 = vst.msk [vmem:[#allocation7 + $0x18] sm:$0xff] %vm4085_vm3, %v6499_v1  ;;  %v6463_v38 = vmul.f32 %v7457_v28, %v9788_v57  ;;  %v6387_v24 = vpop.f32.mrb[5].mxu1 }
 0x4c3   :  { %6513 = vst.msk [vmem:[#allocation7 + $0x8] sm:$0xff] %vm4085_vm3, %v6497_v50  ;;  %v6461_v29 = vmul.f32 %v9788_v57, %v6387_v24  ;;  %v7458_v36 = vpop.f32.mrb[6].mxu1 }
 0x4c4   :  { %v6486_v31 = vadd.f32 %v9793_v12, %v6463_v38  ;;  %v6464_v34 = vmul.f32 %v7458_v36, %v9788_v57  ;;  %v6390_v9 = vpop.f32.mrb[7].mxu1 }
 0x4c5   :  { %v6484_v32 = vadd.f32 %v9793_v12, %v6461_v29  ;;  %v6462_v11 = vmul.f32 %v9788_v57, %v6390_v9 }
 0x4c6   :  { %v6502_v42 = vmax.f32 %v6486_v31, 0.0  ;;  %v6487_v16 = vadd.f32 %v9793_v12, %v6464_v34 }
 0x4c7   :  { %v6500_v15 = vmax.f32 %v6484_v32, 0.0  ;;  %v6485_v47 = vadd.f32 %v9793_v12, %v6462_v11 }
 0x4c8   :  { %6518 = vst.msk [vmem:[#allocation7 + $0x30] sm:$0xff] %vm4085_vm3, %v6502_v42  ;;  %v6503_v26 = vmax.f32 %v6487_v16, 0.0 }
 0x4c9   :  { %6516 = vst.msk [vmem:[#allocation7 + $0x20] sm:$0xff] %vm4085_vm3, %v6500_v15  ;;  %v6501_v5 = vmax.f32 %v6485_v47, 0.0  ;;  %v7461_v7 = vpop.f32.mrb[8].mxu1 }
 0x4ca   :  { %6519 = vst.msk [vmem:[#allocation7 + $0x38] sm:$0xff] %vm4085_vm3, %v6503_v26  ;;  %v6467_v8 = vmul.f32 %v7461_v7, %v9788_v57  ;;  %v6403_v56 = vpop.f32.mrb[9].mxu1 }
 0x4cb   :  { %6517 = vst.msk [vmem:[#allocation7 + $0x28] sm:$0xff] %vm4085_vm3, %v6501_v5  ;;  %v6465_v33 = vmul.f32 %v9788_v57, %v6403_v56  ;;  %v7462_v25 = vpop.f32.mrb[10].mxu1 }
 0x4cc   :  { %v6490_v44 = vadd.f32 %v9793_v12, %v6467_v8  ;;  %v6468_v53 = vmul.f32 %v7462_v25, %v9788_v57  ;;  %v6406_v35 = vpop.f32.mrb[11].mxu1 }
 0x4cd   :  { %v6488_v22 = vadd.f32 %v9793_v12, %v6465_v33  ;;  %v6466_v45 = vmul.f32 %v9788_v57, %v6406_v35 }
 0x4ce   :  { %v6506_v37 = vmax.f32 %v6490_v44, 0.0  ;;  %v6491_v63 = vadd.f32 %v9793_v12, %v6468_v53 }
 0x4cf   :  { %v6504_v13 = vmax.f32 %v6488_v22, 0.0  ;;  %v6489_v21 = vadd.f32 %v9793_v12, %v6466_v45 }
 0x4d0   :  { %6522 = vst.msk [vmem:[#allocation7 + $0x50] sm:$0xff] %vm4085_vm3, %v6506_v37  ;;  %v6507_v52 = vmax.f32 %v6491_v63, 0.0 }
 0x4d1   :  { %6520 = vst.msk [vmem:[#allocation7 + $0x40] sm:$0xff] %vm4085_vm3, %v6504_v13  ;;  %v6505_v23 = vmax.f32 %v6489_v21, 0.0  ;;  %v7465_v41 = vpop.f32.mrb[12].mxu1 }
 0x4d2   :  { %6523 = vst.msk [vmem:[#allocation7 + $0x58] sm:$0xff] %vm4085_vm3, %v6507_v52  ;;  %v6471_v62 = vmul.f32 %v7465_v41, %v9788_v57  ;;  %v6419_v60 = vpop.f32.mrb[13].mxu1 }
 0x4d3   :  { %6521 = vst.msk [vmem:[#allocation7 + $0x48] sm:$0xff] %vm4085_vm3, %v6505_v23  ;;  %v6469_v39 = vmul.f32 %v9788_v57, %v6419_v60  ;;  %v7466_v6 = vpop.f32.mrb[14].mxu1 }
 0x4d4   :  { %v6494_v58 = vadd.f32 %v9793_v12, %v6471_v62  ;;  %v6472_v59 = vmul.f32 %v7466_v6, %v9788_v57  ;;  %v6422_v14 = vpop.f32.mrb[15].mxu1 }
 0x4d5   :  { %v6492_v0 = vadd.f32 %v9793_v12, %v6469_v39  ;;  %v6470_v51 = vmul.f32 %v9788_v57, %v6422_v14 }
 0x4d6   :  { %v6510_v30 = vmax.f32 %v6494_v58, 0.0  ;;  %v6495_v43 = vadd.f32 %v9793_v12, %v6472_v59 }
 0x4d7   :  { %v6508_v54 = vmax.f32 %v6492_v0, 0.0  ;;  %v6493_v55 = vadd.f32 %v9793_v12, %v6470_v51 }
 0x4d8   :  { %6526 = vst.msk [vmem:[#allocation7 + $0x70] sm:$0xff] %vm4085_vm3, %v6510_v30  ;;  %v6511_v40 = vmax.f32 %v6495_v43, 0.0 }
 0x4d9   :  { %6524 = vst.msk [vmem:[#allocation7 + $0x60] sm:$0xff] %vm4085_vm3, %v6508_v54  ;;  %v6509_v46 = vmax.f32 %v6493_v55, 0.0 }
 0x4da   :  { %6527 = vst.msk [vmem:[#allocation7 + $0x78] sm:$0xff] %vm4085_vm3, %v6511_v40 }
 0x4db   :  { %6525 = vst.msk [vmem:[#allocation7 + $0x68] sm:$0xff] %vm4085_vm3, %v6509_v46 }
 0x4dc   :  { %7832 = shalt.err (!%p7829_p12)
}
 0x4dd   :  { %s7833_s10 = scalar_lea.hbm %s9862_s7, 2048 }
 0x4de   :  { %p7834_p13 = scmp.ne.s32.totalorder %s9862_s7, %s7833_s10  ;;  %p7837_p0 = scmp.lt.u32.totalorder %s7833_s10, %s9862_s7 }
 0x4e0   :  { %p7839_p1 = pnand %p7837_p0, %p7834_p13 }
 0x4e2   :  { %7842 = shalt.err (!%p7839_p1)
}
 0x4e3   :  { %s7853_s0 = smov 128   ;;  %s7854_s15 = smov 8  }
 0x4e4   :  { %6539 = dma.vmem_to_hbm [thread:$0]  %s6534_s6, 2048, %s9862_s7, [#allocation6], %s7853_s0, %s7853_s0, %s7854_s15  }
 0x4e5   :  { %7845 = dma.done.wait [#allocation6], 2048  }
 0x4e6   :  { %7846 = vsyncadd [#allocation6], 4294965248 }
 0x4e7   :  { %6543 = vsyncpa [#allocation5], 1 }
 0x4e8   :  { %6544 = vsyncpa [#allocation6], 1 }

</bundles_post_ra>
